<compile_context>
chip_gen: v5e
topology: v5e:2x2
jax: 0.10.0
libtpu: 0.0.40
codegen_flags: <defaults>
</compile_context>

<pallas_src>
import functools

import jax
import jax.numpy as jnp
from jax.experimental import pallas as pl
from jax.experimental.pallas import tpu as pltpu

_COMPUTE_DTYPE = jnp.bfloat16  # MXU operand dtype (f32 accumulation)


# ----------------------------- Pallas kernel --------------------------------


def _fused_resblock_kernel(xpad_ref, w1_ref, b1_ref, w2_ref, b2_ref,
                           out_ref, o1p_ref, *, H, W, C):
    # xpad_ref : (H+2, W+2, C)  bf16   zero-padded input image (one per grid step)
    # w1_ref/w2_ref : (9, C, C) bf16   conv weights, BN scale already folded in
    # b1_ref/b2_ref : (1, C)    f32    folded BN bias (incl. conv bias)
    # out_ref  : (H*W, C)       f32
    # o1p_ref  : (H+2, W+2, C)  f32    VMEM scratch: zero-padded stage-1 output
    HW = H * W
    f32 = jnp.float32
    cdt = _COMPUTE_DTYPE

    # Load the padded block once and upcast; all shifted slices below are on
    # unpacked f32 values (robust layouts), operands re-cast to bf16 for MXU.
    xp = xpad_ref[...].astype(f32)                               # (H+2, W+2, C)

    # ---- stage 1:  o1 = relu( conv1(x) * s1 + b1 )  -------------------------
    acc = jnp.zeros((HW, C), f32)
    for k in range(9):
        ky, kx = divmod(k, 3)
        xs = xp[ky:ky + H, kx:kx + W, :].reshape(HW, C)
        acc = acc + jnp.dot(xs.astype(cdt), w1_ref[k],
                            preferred_element_type=f32)
    o1 = jnp.maximum(acc + b1_ref[...], 0.0)                     # (HW, C) f32

    # Keep o1 resident in VMEM, zero-padded by 1 pixel (conv2 has padding=1).
    o1p_ref[...] = jnp.zeros_like(o1p_ref)
    o1p_ref[1:1 + H, 1:1 + W, :] = o1.reshape(H, W, C)

    # ---- stage 2:  out = relu( conv2(o1) * s2 + b2 + x )  -------------------
    acc = jnp.zeros((HW, C), f32)
    for k in range(9):
        ky, kx = divmod(k, 3)
        o1s = o1p_ref[ky:ky + H, kx:kx + W, :].reshape(HW, C)
        acc = acc + jnp.dot(o1s.astype(cdt), w2_ref[k],
                            preferred_element_type=f32)
    res = xp[1:1 + H, 1:1 + W, :].reshape(HW, C)                 # identity ('D')
    out_ref[...] = jnp.maximum(acc + b2_ref[...] + res, 0.0).astype(out_ref.dtype)


# ------------------------------- JAX glue ------------------------------------


def _fold_bn(gamma, beta, running_mean, running_var, conv_bias, eps=1e-5):
    """Inference-mode BN + conv bias -> per-channel (scale, bias)."""
    scale = gamma / jnp.sqrt(running_var + eps)
    bias = beta + scale * (conv_bias - running_mean)
    return scale.astype(jnp.float32), bias.astype(jnp.float32)


@jax.jit
def residual_block_forward(x_nchw, params):
    """x_nchw: (N, C, H, W) float32.  Returns (N, C, H, W) float32."""
    n, c, h, w = x_nchw.shape
    x = jnp.transpose(x_nchw, (0, 2, 3, 1))                       # -> NHWC
    xpad = jnp.pad(x, ((0, 0), (1, 1), (1, 1), (0, 0))).astype(_COMPUTE_DTYPE)

    scale1, bias1 = _fold_bn(params["bn1_gamma"], params["bn1_beta"],
                             params["bn1_mean"], params["bn1_var"],
                             params["conv1_b"])
    scale2, bias2 = _fold_bn(params["bn2_gamma"], params["bn2_beta"],
                             params["bn2_mean"], params["bn2_var"],
                             params["conv2_b"])

    # Fold the BN scale into the (ky,kx,Cin,Cout) weights, flatten taps to 9.
    w1 = (params["conv1_w"] * scale1[None, None, None, :]
          ).reshape(9, c, c).astype(_COMPUTE_DTYPE)
    w2 = (params["conv2_w"] * scale2[None, None, None, :]
          ).reshape(9, c, c).astype(_COMPUTE_DTYPE)
    b1 = bias1.reshape(1, c)
    b2 = bias2.reshape(1, c)

    hp, wp = h + 2, w + 2
    kernel = functools.partial(_fused_resblock_kernel, H=h, W=w, C=c)

    out = pl.pallas_call(
        kernel,
        out_shape=jax.ShapeDtypeStruct((n, h * w, c), jnp.float32),
        grid=(n,),
        in_specs=[
            pl.BlockSpec((None, hp, wp, c), lambda i: (i, 0, 0, 0)),  # x (padded)
            pl.BlockSpec((9, c, c), lambda i: (0, 0, 0)),             # w1 (resident)
            pl.BlockSpec((1, c), lambda i: (0, 0)),                   # b1
            pl.BlockSpec((9, c, c), lambda i: (0, 0, 0)),             # w2 (resident)
            pl.BlockSpec((1, c), lambda i: (0, 0)),                   # b2
        ],
        out_specs=pl.BlockSpec((None, h * w, c), lambda i: (i, 0, 0)),
        scratch_shapes=[pltpu.VMEM((hp, wp, c), jnp.float32)],        # padded o1
        compiler_params=pltpu.CompilerParams(
            dimension_semantics=("parallel",),
            vmem_limit_bytes=32 * 1024 * 1024,  # explicit; safe on v7x's 64 MiB
        ),
    )(xpad, w1, b1, w2, b2)

    return jnp.transpose(out.reshape(n, h, w, c), (0, 3, 1, 2))      # -> NCHW


# ------------------------- pure-JAX reference (check) ------------------------


def _reference_forward(x_nchw, params):
    x = jnp.transpose(x_nchw, (0, 2, 3, 1))
    dn = jax.lax.conv_dimension_numbers(x.shape, (3, 3, x.shape[-1], x.shape[-1]),
                                        ("NHWC", "HWIO", "NHWC"))

    def conv(inp, w_hwio, b):
        y = jax.lax.conv_general_dilated(inp, w_hwio, (1, 1), ((1, 1), (1, 1)),
                                         dimension_numbers=dn)
        return y + b

    def bn(y, g, b, m, v, eps=1e-5):
        return (y - m) / jnp.sqrt(v + eps) * g + b

    o = conv(x, params["conv1_w"], params["conv1_b"])
    o = jnp.maximum(bn(o, params["bn1_gamma"], params["bn1_beta"],
                       params["bn1_mean"], params["bn1_var"]), 0.0)
    o = conv(o, params["conv2_w"], params["conv2_b"])
    o = bn(o, params["bn2_gamma"], params["bn2_beta"],
           params["bn2_mean"], params["bn2_var"])
    o = jnp.maximum(o + x, 0.0)
    return jnp.transpose(o, (0, 3, 1, 2))


# ----------------------------------- main ------------------------------------


def _init_params(key, channels):
    ks = jax.random.split(key, 10)
    c = channels
    return {
        "conv1_w": jax.random.normal(ks[0], (3, 3, c, c), jnp.float32) * 0.1,
        "conv1_b": jax.random.normal(ks[1], (c,), jnp.float32) * 0.1,
        "bn1_gamma": 1.0 + 0.1 * jax.random.normal(ks[2], (c,), jnp.float32),
        "bn1_beta": 0.1 * jax.random.normal(ks[3], (c,), jnp.float32),
        "bn1_mean": 0.1 * jax.random.normal(ks[4], (c,), jnp.float32),
        "bn1_var": jax.random.uniform(ks[5], (c,), jnp.float32, 0.5, 1.5),
        "conv2_w": jax.random.normal(ks[6], (3, 3, c, c), jnp.float32) * 0.1,
        "conv2_b": jax.random.normal(ks[7], (c,), jnp.float32) * 0.1,
        "bn2_gamma": 1.0 + 0.1 * jax.random.normal(ks[8], (c,), jnp.float32),
        "bn2_beta": 0.1 * jax.random.normal(ks[9], (c,), jnp.float32),
        "bn2_mean": jnp.zeros((c,), jnp.float32),
        "bn2_var": jnp.ones((c,), jnp.float32),
    }


if __name__ == "__main__":
    key = jax.random.PRNGKey(0)
    k_x, k_p = jax.random.split(key)

    N, C, H, W = 2, 4, 16, 16  # in_channels == out_channels, stride=1
    x = jax.random.normal(k_x, (N, C, H, W), jnp.float32)
    params = _init_params(k_p, C)

    out = residual_block_forward(x, params)
    out = jax.block_until_ready(out)

    ref = _reference_forward(x, params)
    assert out.shape == (N, C, H, W)
    # bf16 matmul operands (f32 accumulation) -> loosened tolerance vs f32 ref.
    assert jnp.allclose(out, ref, rtol=5e-2, atol=5e-2), "mismatch vs JAX reference"

    print("KERNEL_OK")
</pallas_src>

<mosaic_0001>
module attributes {stable_mosaic.version = 11 : i64} {
  func.func @_fused_resblock_kernel(%arg0: i32, %arg1: memref<1x18x18x4xbf16, #tpu.memory_space<vmem>>, %arg2: memref<9x4x4xbf16, #tpu.memory_space<vmem>>, %arg3: memref<1x4xf32, #tpu.memory_space<vmem>>, %arg4: memref<9x4x4xbf16, #tpu.memory_space<vmem>>, %arg5: memref<1x4xf32, #tpu.memory_space<vmem>>, %arg6: memref<1x256x4xf32, #tpu.memory_space<vmem>>, %arg7: memref<18x18x4xf32, #tpu.memory_space<vmem>>) attributes {dimension_semantics = [#tpu.dimension_semantics<parallel>], iteration_bounds = array<i64: 2>, scalar_prefetch = 0 : i64, scratch_operands = 1 : i64, tpu.core_type = #tpu.core_type<tc>, window_params = [{transform_indices = @transform_0, window_bounds = array<i64: 1, 18, 18, 4>}, {pipeline_mode = #tpu.pipeline_mode<synchronous>, transform_indices = @transform_1, window_bounds = array<i64: 9, 4, 4>}, {pipeline_mode = #tpu.pipeline_mode<synchronous>, transform_indices = @transform_2, window_bounds = array<i64: 1, 4>}, {pipeline_mode = #tpu.pipeline_mode<synchronous>, transform_indices = @transform_3, window_bounds = array<i64: 9, 4, 4>}, {pipeline_mode = #tpu.pipeline_mode<synchronous>, transform_indices = @transform_4, window_bounds = array<i64: 1, 4>}, {transform_indices = @transform_5, window_bounds = array<i64: 1, 256, 4>}]} {
    %c0 = arith.constant 0 : index
    %c0_0 = arith.constant 0 : index
    %c0_1 = arith.constant 0 : index
    %c0_2 = arith.constant 0 : index
    %0 = vector.load %arg1[%c0, %c0_0, %c0_1, %c0_2] : memref<1x18x18x4xbf16, #tpu.memory_space<vmem>>, vector<1x18x18x4xbf16>
    %1 = vector.shape_cast %0 : vector<1x18x18x4xbf16> to vector<18x18x4xbf16>
    %2 = arith.extf %1 : vector<18x18x4xbf16> to vector<18x18x4xf32>
    %cst = arith.constant 0.000000e+00 : f32
    %3 = vector.broadcast %cst : f32 to vector<256x4xf32>
    %4 = vector.extract_strided_slice %2 {offsets = [0, 0, 0], sizes = [16, 16, 4], strides = [1, 1, 1]} : vector<18x18x4xf32> to vector<16x16x4xf32>
    %5 = vector.shape_cast %4 : vector<16x16x4xf32> to vector<256x4xf32>
    %6 = arith.truncf %5 : vector<256x4xf32> to vector<256x4xbf16>
    %c0_3 = arith.constant 0 : index
    %c0_4 = arith.constant 0 : index
    %c0_5 = arith.constant 0 : index
    %7 = vector.load %arg2[%c0_3, %c0_4, %c0_5] : memref<9x4x4xbf16, #tpu.memory_space<vmem>>, vector<1x4x4xbf16>
    %8 = vector.shape_cast %7 : vector<1x4x4xbf16> to vector<4x4xbf16>
    %cst_6 = arith.constant dense<0.000000e+00> : vector<256x4xf32>
    %9 = tpu.matmul %6, %8, %cst_6 {dimension_numbers = #tpu.dot_dimension_numbers<[1], [0], [0], [1], [0, 0, 1, 1], [], []>} : vector<256x4xbf16>, vector<4x4xbf16>, vector<256x4xf32> -> vector<256x4xf32>
    %10 = arith.addf %3, %9 : vector<256x4xf32>
    %11 = vector.extract_strided_slice %2 {offsets = [0, 1, 0], sizes = [16, 16, 4], strides = [1, 1, 1]} : vector<18x18x4xf32> to vector<16x16x4xf32>
    %12 = vector.shape_cast %11 : vector<16x16x4xf32> to vector<256x4xf32>
    %13 = arith.truncf %12 : vector<256x4xf32> to vector<256x4xbf16>
    %c1 = arith.constant 1 : index
    %c0_7 = arith.constant 0 : index
    %c0_8 = arith.constant 0 : index
    %14 = vector.load %arg2[%c1, %c0_7, %c0_8] : memref<9x4x4xbf16, #tpu.memory_space<vmem>>, vector<1x4x4xbf16>
    %15 = vector.shape_cast %14 : vector<1x4x4xbf16> to vector<4x4xbf16>
    %cst_9 = arith.constant dense<0.000000e+00> : vector<256x4xf32>
    %16 = tpu.matmul %13, %15, %cst_9 {dimension_numbers = #tpu.dot_dimension_numbers<[1], [0], [0], [1], [0, 0, 1, 1], [], []>} : vector<256x4xbf16>, vector<4x4xbf16>, vector<256x4xf32> -> vector<256x4xf32>
    %17 = arith.addf %10, %16 : vector<256x4xf32>
    %18 = vector.extract_strided_slice %2 {offsets = [0, 2, 0], sizes = [16, 16, 4], strides = [1, 1, 1]} : vector<18x18x4xf32> to vector<16x16x4xf32>
    %19 = vector.shape_cast %18 : vector<16x16x4xf32> to vector<256x4xf32>
    %20 = arith.truncf %19 : vector<256x4xf32> to vector<256x4xbf16>
    %c2 = arith.constant 2 : index
    %c0_10 = arith.constant 0 : index
    %c0_11 = arith.constant 0 : index
    %21 = vector.load %arg2[%c2, %c0_10, %c0_11] : memref<9x4x4xbf16, #tpu.memory_space<vmem>>, vector<1x4x4xbf16>
    %22 = vector.shape_cast %21 : vector<1x4x4xbf16> to vector<4x4xbf16>
    %cst_12 = arith.constant dense<0.000000e+00> : vector<256x4xf32>
    %23 = tpu.matmul %20, %22, %cst_12 {dimension_numbers = #tpu.dot_dimension_numbers<[1], [0], [0], [1], [0, 0, 1, 1], [], []>} : vector<256x4xbf16>, vector<4x4xbf16>, vector<256x4xf32> -> vector<256x4xf32>
    %24 = arith.addf %17, %23 : vector<256x4xf32>
    %25 = vector.extract_strided_slice %2 {offsets = [1, 0, 0], sizes = [16, 16, 4], strides = [1, 1, 1]} : vector<18x18x4xf32> to vector<16x16x4xf32>
    %26 = vector.shape_cast %25 : vector<16x16x4xf32> to vector<256x4xf32>
    %27 = arith.truncf %26 : vector<256x4xf32> to vector<256x4xbf16>
    %c3 = arith.constant 3 : index
    %c0_13 = arith.constant 0 : index
    %c0_14 = arith.constant 0 : index
    %28 = vector.load %arg2[%c3, %c0_13, %c0_14] : memref<9x4x4xbf16, #tpu.memory_space<vmem>>, vector<1x4x4xbf16>
    %29 = vector.shape_cast %28 : vector<1x4x4xbf16> to vector<4x4xbf16>
    %cst_15 = arith.constant dense<0.000000e+00> : vector<256x4xf32>
    %30 = tpu.matmul %27, %29, %cst_15 {dimension_numbers = #tpu.dot_dimension_numbers<[1], [0], [0], [1], [0, 0, 1, 1], [], []>} : vector<256x4xbf16>, vector<4x4xbf16>, vector<256x4xf32> -> vector<256x4xf32>
    %31 = arith.addf %24, %30 : vector<256x4xf32>
    %32 = vector.extract_strided_slice %2 {offsets = [1, 1, 0], sizes = [16, 16, 4], strides = [1, 1, 1]} : vector<18x18x4xf32> to vector<16x16x4xf32>
    %33 = vector.shape_cast %32 : vector<16x16x4xf32> to vector<256x4xf32>
    %34 = arith.truncf %33 : vector<256x4xf32> to vector<256x4xbf16>
    %c4 = arith.constant 4 : index
    %c0_16 = arith.constant 0 : index
    %c0_17 = arith.constant 0 : index
    %35 = vector.load %arg2[%c4, %c0_16, %c0_17] : memref<9x4x4xbf16, #tpu.memory_space<vmem>>, vector<1x4x4xbf16>
    %36 = vector.shape_cast %35 : vector<1x4x4xbf16> to vector<4x4xbf16>
    %cst_18 = arith.constant dense<0.000000e+00> : vector<256x4xf32>
    %37 = tpu.matmul %34, %36, %cst_18 {dimension_numbers = #tpu.dot_dimension_numbers<[1], [0], [0], [1], [0, 0, 1, 1], [], []>} : vector<256x4xbf16>, vector<4x4xbf16>, vector<256x4xf32> -> vector<256x4xf32>
    %38 = arith.addf %31, %37 : vector<256x4xf32>
    %39 = vector.extract_strided_slice %2 {offsets = [1, 2, 0], sizes = [16, 16, 4], strides = [1, 1, 1]} : vector<18x18x4xf32> to vector<16x16x4xf32>
    %40 = vector.shape_cast %39 : vector<16x16x4xf32> to vector<256x4xf32>
    %41 = arith.truncf %40 : vector<256x4xf32> to vector<256x4xbf16>
    %c5 = arith.constant 5 : index
    %c0_19 = arith.constant 0 : index
    %c0_20 = arith.constant 0 : index
    %42 = vector.load %arg2[%c5, %c0_19, %c0_20] : memref<9x4x4xbf16, #tpu.memory_space<vmem>>, vector<1x4x4xbf16>
    %43 = vector.shape_cast %42 : vector<1x4x4xbf16> to vector<4x4xbf16>
    %cst_21 = arith.constant dense<0.000000e+00> : vector<256x4xf32>
    %44 = tpu.matmul %41, %43, %cst_21 {dimension_numbers = #tpu.dot_dimension_numbers<[1], [0], [0], [1], [0, 0, 1, 1], [], []>} : vector<256x4xbf16>, vector<4x4xbf16>, vector<256x4xf32> -> vector<256x4xf32>
    %45 = arith.addf %38, %44 : vector<256x4xf32>
    %46 = vector.extract_strided_slice %2 {offsets = [2, 0, 0], sizes = [16, 16, 4], strides = [1, 1, 1]} : vector<18x18x4xf32> to vector<16x16x4xf32>
    %47 = vector.shape_cast %46 : vector<16x16x4xf32> to vector<256x4xf32>
    %48 = arith.truncf %47 : vector<256x4xf32> to vector<256x4xbf16>
    %c6 = arith.constant 6 : index
    %c0_22 = arith.constant 0 : index
    %c0_23 = arith.constant 0 : index
    %49 = vector.load %arg2[%c6, %c0_22, %c0_23] : memref<9x4x4xbf16, #tpu.memory_space<vmem>>, vector<1x4x4xbf16>
    %50 = vector.shape_cast %49 : vector<1x4x4xbf16> to vector<4x4xbf16>
    %cst_24 = arith.constant dense<0.000000e+00> : vector<256x4xf32>
    %51 = tpu.matmul %48, %50, %cst_24 {dimension_numbers = #tpu.dot_dimension_numbers<[1], [0], [0], [1], [0, 0, 1, 1], [], []>} : vector<256x4xbf16>, vector<4x4xbf16>, vector<256x4xf32> -> vector<256x4xf32>
    %52 = arith.addf %45, %51 : vector<256x4xf32>
    %53 = vector.extract_strided_slice %2 {offsets = [2, 1, 0], sizes = [16, 16, 4], strides = [1, 1, 1]} : vector<18x18x4xf32> to vector<16x16x4xf32>
    %54 = vector.shape_cast %53 : vector<16x16x4xf32> to vector<256x4xf32>
    %55 = arith.truncf %54 : vector<256x4xf32> to vector<256x4xbf16>
    %c7 = arith.constant 7 : index
    %c0_25 = arith.constant 0 : index
    %c0_26 = arith.constant 0 : index
    %56 = vector.load %arg2[%c7, %c0_25, %c0_26] : memref<9x4x4xbf16, #tpu.memory_space<vmem>>, vector<1x4x4xbf16>
    %57 = vector.shape_cast %56 : vector<1x4x4xbf16> to vector<4x4xbf16>
    %cst_27 = arith.constant dense<0.000000e+00> : vector<256x4xf32>
    %58 = tpu.matmul %55, %57, %cst_27 {dimension_numbers = #tpu.dot_dimension_numbers<[1], [0], [0], [1], [0, 0, 1, 1], [], []>} : vector<256x4xbf16>, vector<4x4xbf16>, vector<256x4xf32> -> vector<256x4xf32>
    %59 = arith.addf %52, %58 : vector<256x4xf32>
    %60 = vector.extract_strided_slice %2 {offsets = [2, 2, 0], sizes = [16, 16, 4], strides = [1, 1, 1]} : vector<18x18x4xf32> to vector<16x16x4xf32>
    %61 = vector.shape_cast %60 : vector<16x16x4xf32> to vector<256x4xf32>
    %62 = arith.truncf %61 : vector<256x4xf32> to vector<256x4xbf16>
    %c8 = arith.constant 8 : index
    %c0_28 = arith.constant 0 : index
    %c0_29 = arith.constant 0 : index
    %63 = vector.load %arg2[%c8, %c0_28, %c0_29] : memref<9x4x4xbf16, #tpu.memory_space<vmem>>, vector<1x4x4xbf16>
    %64 = vector.shape_cast %63 : vector<1x4x4xbf16> to vector<4x4xbf16>
    %cst_30 = arith.constant dense<0.000000e+00> : vector<256x4xf32>
    %65 = tpu.matmul %62, %64, %cst_30 {dimension_numbers = #tpu.dot_dimension_numbers<[1], [0], [0], [1], [0, 0, 1, 1], [], []>} : vector<256x4xbf16>, vector<4x4xbf16>, vector<256x4xf32> -> vector<256x4xf32>
    %66 = arith.addf %59, %65 : vector<256x4xf32>
    %c0_31 = arith.constant 0 : index
    %c0_32 = arith.constant 0 : index
    %67 = vector.load %arg3[%c0_31, %c0_32] : memref<1x4xf32, #tpu.memory_space<vmem>>, vector<1x4xf32>
    %68 = vector.broadcast %67 : vector<1x4xf32> to vector<256x4xf32>
    %69 = arith.addf %66, %68 : vector<256x4xf32>
    %cst_33 = arith.constant 0.000000e+00 : f32
    %70 = vector.broadcast %cst_33 : f32 to vector<256x4xf32>
    %71 = arith.maximumf %69, %70 : vector<256x4xf32>
    %cst_34 = arith.constant 0.000000e+00 : f32
    %72 = vector.broadcast %cst_34 : f32 to vector<18x18x4xf32>
    %c0_35 = arith.constant 0 : index
    %c0_36 = arith.constant 0 : index
    %c0_37 = arith.constant 0 : index
    %73 = vector.load %arg7[%c0_35, %c0_36, %c0_37] : memref<18x18x4xf32, #tpu.memory_space<vmem>>, vector<18x18x4xf32>
    tpu.vector_store %arg7[%c0_35, %c0_36, %c0_37], %72 {strides = array<i32>} : memref<18x18x4xf32, #tpu.memory_space<vmem>>, vector<18x18x4xf32>,
    %74 = vector.shape_cast %71 : vector<256x4xf32> to vector<16x16x4xf32>
    %c1_38 = arith.constant 1 : index
    %c1_39 = arith.constant 1 : index
    %c0_40 = arith.constant 0 : index
    %75 = vector.load %arg7[%c1_38, %c1_39, %c0_40] : memref<18x18x4xf32, #tpu.memory_space<vmem>>, vector<16x16x4xf32>
    tpu.vector_store %arg7[%c1_38, %c1_39, %c0_40], %74 {strides = array<i32>} : memref<18x18x4xf32, #tpu.memory_space<vmem>>, vector<16x16x4xf32>,
    %cst_41 = arith.constant 0.000000e+00 : f32
    %76 = vector.broadcast %cst_41 : f32 to vector<256x4xf32>
    %c0_42 = arith.constant 0 : index
    %c0_43 = arith.constant 0 : index
    %c0_44 = arith.constant 0 : index
    %77 = vector.load %arg7[%c0_42, %c0_43, %c0_44] : memref<18x18x4xf32, #tpu.memory_space<vmem>>, vector<16x16x4xf32>
    %78 = vector.shape_cast %77 : vector<16x16x4xf32> to vector<256x4xf32>
    %79 = arith.truncf %78 : vector<256x4xf32> to vector<256x4xbf16>
    %c0_45 = arith.constant 0 : index
    %c0_46 = arith.constant 0 : index
    %c0_47 = arith.constant 0 : index
    %80 = vector.load %arg4[%c0_45, %c0_46, %c0_47] : memref<9x4x4xbf16, #tpu.memory_space<vmem>>, vector<1x4x4xbf16>
    %81 = vector.shape_cast %80 : vector<1x4x4xbf16> to vector<4x4xbf16>
    %cst_48 = arith.constant dense<0.000000e+00> : vector<256x4xf32>
    %82 = tpu.matmul %79, %81, %cst_48 {dimension_numbers = #tpu.dot_dimension_numbers<[1], [0], [0], [1], [0, 0, 1, 1], [], []>} : vector<256x4xbf16>, vector<4x4xbf16>, vector<256x4xf32> -> vector<256x4xf32>
    %83 = arith.addf %76, %82 : vector<256x4xf32>
    %c0_49 = arith.constant 0 : index
    %c1_50 = arith.constant 1 : index
    %c0_51 = arith.constant 0 : index
    %84 = vector.load %arg7[%c0_49, %c1_50, %c0_51] : memref<18x18x4xf32, #tpu.memory_space<vmem>>, vector<16x16x4xf32>
    %85 = vector.shape_cast %84 : vector<16x16x4xf32> to vector<256x4xf32>
    %86 = arith.truncf %85 : vector<256x4xf32> to vector<256x4xbf16>
    %c1_52 = arith.constant 1 : index
    %c0_53 = arith.constant 0 : index
    %c0_54 = arith.constant 0 : index
    %87 = vector.load %arg4[%c1_52, %c0_53, %c0_54] : memref<9x4x4xbf16, #tpu.memory_space<vmem>>, vector<1x4x4xbf16>
    %88 = vector.shape_cast %87 : vector<1x4x4xbf16> to vector<4x4xbf16>
    %cst_55 = arith.constant dense<0.000000e+00> : vector<256x4xf32>
    %89 = tpu.matmul %86, %88, %cst_55 {dimension_numbers = #tpu.dot_dimension_numbers<[1], [0], [0], [1], [0, 0, 1, 1], [], []>} : vector<256x4xbf16>, vector<4x4xbf16>, vector<256x4xf32> -> vector<256x4xf32>
    %90 = arith.addf %83, %89 : vector<256x4xf32>
    %c0_56 = arith.constant 0 : index
    %c2_57 = arith.constant 2 : index
    %c0_58 = arith.constant 0 : index
    %91 = vector.load %arg7[%c0_56, %c2_57, %c0_58] : memref<18x18x4xf32, #tpu.memory_space<vmem>>, vector<16x16x4xf32>
    %92 = vector.shape_cast %91 : vector<16x16x4xf32> to vector<256x4xf32>
    %93 = arith.truncf %92 : vector<256x4xf32> to vector<256x4xbf16>
    %c2_59 = arith.constant 2 : index
    %c0_60 = arith.constant 0 : index
    %c0_61 = arith.constant 0 : index
    %94 = vector.load %arg4[%c2_59, %c0_60, %c0_61] : memref<9x4x4xbf16, #tpu.memory_space<vmem>>, vector<1x4x4xbf16>
    %95 = vector.shape_cast %94 : vector<1x4x4xbf16> to vector<4x4xbf16>
    %cst_62 = arith.constant dense<0.000000e+00> : vector<256x4xf32>
    %96 = tpu.matmul %93, %95, %cst_62 {dimension_numbers = #tpu.dot_dimension_numbers<[1], [0], [0], [1], [0, 0, 1, 1], [], []>} : vector<256x4xbf16>, vector<4x4xbf16>, vector<256x4xf32> -> vector<256x4xf32>
    %97 = arith.addf %90, %96 : vector<256x4xf32>
    %c1_63 = arith.constant 1 : index
    %c0_64 = arith.constant 0 : index
    %c0_65 = arith.constant 0 : index
    %98 = vector.load %arg7[%c1_63, %c0_64, %c0_65] : memref<18x18x4xf32, #tpu.memory_space<vmem>>, vector<16x16x4xf32>
    %99 = vector.shape_cast %98 : vector<16x16x4xf32> to vector<256x4xf32>
    %100 = arith.truncf %99 : vector<256x4xf32> to vector<256x4xbf16>
    %c3_66 = arith.constant 3 : index
    %c0_67 = arith.constant 0 : index
    %c0_68 = arith.constant 0 : index
    %101 = vector.load %arg4[%c3_66, %c0_67, %c0_68] : memref<9x4x4xbf16, #tpu.memory_space<vmem>>, vector<1x4x4xbf16>
    %102 = vector.shape_cast %101 : vector<1x4x4xbf16> to vector<4x4xbf16>
    %cst_69 = arith.constant dense<0.000000e+00> : vector<256x4xf32>
    %103 = tpu.matmul %100, %102, %cst_69 {dimension_numbers = #tpu.dot_dimension_numbers<[1], [0], [0], [1], [0, 0, 1, 1], [], []>} : vector<256x4xbf16>, vector<4x4xbf16>, vector<256x4xf32> -> vector<256x4xf32>
    %104 = arith.addf %97, %103 : vector<256x4xf32>
    %c1_70 = arith.constant 1 : index
    %c1_71 = arith.constant 1 : index
    %c0_72 = arith.constant 0 : index
    %105 = vector.load %arg7[%c1_70, %c1_71, %c0_72] : memref<18x18x4xf32, #tpu.memory_space<vmem>>, vector<16x16x4xf32>
    %106 = vector.shape_cast %105 : vector<16x16x4xf32> to vector<256x4xf32>
    %107 = arith.truncf %106 : vector<256x4xf32> to vector<256x4xbf16>
    %c4_73 = arith.constant 4 : index
    %c0_74 = arith.constant 0 : index
    %c0_75 = arith.constant 0 : index
    %108 = vector.load %arg4[%c4_73, %c0_74, %c0_75] : memref<9x4x4xbf16, #tpu.memory_space<vmem>>, vector<1x4x4xbf16>
    %109 = vector.shape_cast %108 : vector<1x4x4xbf16> to vector<4x4xbf16>
    %cst_76 = arith.constant dense<0.000000e+00> : vector<256x4xf32>
    %110 = tpu.matmul %107, %109, %cst_76 {dimension_numbers = #tpu.dot_dimension_numbers<[1], [0], [0], [1], [0, 0, 1, 1], [], []>} : vector<256x4xbf16>, vector<4x4xbf16>, vector<256x4xf32> -> vector<256x4xf32>
    %111 = arith.addf %104, %110 : vector<256x4xf32>
    %c1_77 = arith.constant 1 : index
    %c2_78 = arith.constant 2 : index
    %c0_79 = arith.constant 0 : index
    %112 = vector.load %arg7[%c1_77, %c2_78, %c0_79] : memref<18x18x4xf32, #tpu.memory_space<vmem>>, vector<16x16x4xf32>
    %113 = vector.shape_cast %112 : vector<16x16x4xf32> to vector<256x4xf32>
    %114 = arith.truncf %113 : vector<256x4xf32> to vector<256x4xbf16>
    %c5_80 = arith.constant 5 : index
    %c0_81 = arith.constant 0 : index
    %c0_82 = arith.constant 0 : index
    %115 = vector.load %arg4[%c5_80, %c0_81, %c0_82] : memref<9x4x4xbf16, #tpu.memory_space<vmem>>, vector<1x4x4xbf16>
    %116 = vector.shape_cast %115 : vector<1x4x4xbf16> to vector<4x4xbf16>
    %cst_83 = arith.constant dense<0.000000e+00> : vector<256x4xf32>
    %117 = tpu.matmul %114, %116, %cst_83 {dimension_numbers = #tpu.dot_dimension_numbers<[1], [0], [0], [1], [0, 0, 1, 1], [], []>} : vector<256x4xbf16>, vector<4x4xbf16>, vector<256x4xf32> -> vector<256x4xf32>
    %118 = arith.addf %111, %117 : vector<256x4xf32>
    %c2_84 = arith.constant 2 : index
    %c0_85 = arith.constant 0 : index
    %c0_86 = arith.constant 0 : index
    %119 = vector.load %arg7[%c2_84, %c0_85, %c0_86] : memref<18x18x4xf32, #tpu.memory_space<vmem>>, vector<16x16x4xf32>
    %120 = vector.shape_cast %119 : vector<16x16x4xf32> to vector<256x4xf32>
    %121 = arith.truncf %120 : vector<256x4xf32> to vector<256x4xbf16>
    %c6_87 = arith.constant 6 : index
    %c0_88 = arith.constant 0 : index
    %c0_89 = arith.constant 0 : index
    %122 = vector.load %arg4[%c6_87, %c0_88, %c0_89] : memref<9x4x4xbf16, #tpu.memory_space<vmem>>, vector<1x4x4xbf16>
    %123 = vector.shape_cast %122 : vector<1x4x4xbf16> to vector<4x4xbf16>
    %cst_90 = arith.constant dense<0.000000e+00> : vector<256x4xf32>
    %124 = tpu.matmul %121, %123, %cst_90 {dimension_numbers = #tpu.dot_dimension_numbers<[1], [0], [0], [1], [0, 0, 1, 1], [], []>} : vector<256x4xbf16>, vector<4x4xbf16>, vector<256x4xf32> -> vector<256x4xf32>
    %125 = arith.addf %118, %124 : vector<256x4xf32>
    %c2_91 = arith.constant 2 : index
    %c1_92 = arith.constant 1 : index
    %c0_93 = arith.constant 0 : index
    %126 = vector.load %arg7[%c2_91, %c1_92, %c0_93] : memref<18x18x4xf32, #tpu.memory_space<vmem>>, vector<16x16x4xf32>
    %127 = vector.shape_cast %126 : vector<16x16x4xf32> to vector<256x4xf32>
    %128 = arith.truncf %127 : vector<256x4xf32> to vector<256x4xbf16>
    %c7_94 = arith.constant 7 : index
    %c0_95 = arith.constant 0 : index
    %c0_96 = arith.constant 0 : index
    %129 = vector.load %arg4[%c7_94, %c0_95, %c0_96] : memref<9x4x4xbf16, #tpu.memory_space<vmem>>, vector<1x4x4xbf16>
    %130 = vector.shape_cast %129 : vector<1x4x4xbf16> to vector<4x4xbf16>
    %cst_97 = arith.constant dense<0.000000e+00> : vector<256x4xf32>
    %131 = tpu.matmul %128, %130, %cst_97 {dimension_numbers = #tpu.dot_dimension_numbers<[1], [0], [0], [1], [0, 0, 1, 1], [], []>} : vector<256x4xbf16>, vector<4x4xbf16>, vector<256x4xf32> -> vector<256x4xf32>
    %132 = arith.addf %125, %131 : vector<256x4xf32>
    %c2_98 = arith.constant 2 : index
    %c2_99 = arith.constant 2 : index
    %c0_100 = arith.constant 0 : index
    %133 = vector.load %arg7[%c2_98, %c2_99, %c0_100] : memref<18x18x4xf32, #tpu.memory_space<vmem>>, vector<16x16x4xf32>
    %134 = vector.shape_cast %133 : vector<16x16x4xf32> to vector<256x4xf32>
    %135 = arith.truncf %134 : vector<256x4xf32> to vector<256x4xbf16>
    %c8_101 = arith.constant 8 : index
    %c0_102 = arith.constant 0 : index
    %c0_103 = arith.constant 0 : index
    %136 = vector.load %arg4[%c8_101, %c0_102, %c0_103] : memref<9x4x4xbf16, #tpu.memory_space<vmem>>, vector<1x4x4xbf16>
    %137 = vector.shape_cast %136 : vector<1x4x4xbf16> to vector<4x4xbf16>
    %cst_104 = arith.constant dense<0.000000e+00> : vector<256x4xf32>
    %138 = tpu.matmul %135, %137, %cst_104 {dimension_numbers = #tpu.dot_dimension_numbers<[1], [0], [0], [1], [0, 0, 1, 1], [], []>} : vector<256x4xbf16>, vector<4x4xbf16>, vector<256x4xf32> -> vector<256x4xf32>
    %139 = arith.addf %132, %138 : vector<256x4xf32>
    %140 = vector.extract_strided_slice %2 {offsets = [1, 1, 0], sizes = [16, 16, 4], strides = [1, 1, 1]} : vector<18x18x4xf32> to vector<16x16x4xf32>
    %141 = vector.shape_cast %140 : vector<16x16x4xf32> to vector<256x4xf32>
    %c0_105 = arith.constant 0 : index
    %c0_106 = arith.constant 0 : index
    %142 = vector.load %arg5[%c0_105, %c0_106] : memref<1x4xf32, #tpu.memory_space<vmem>>, vector<1x4xf32>
    %143 = vector.broadcast %142 : vector<1x4xf32> to vector<256x4xf32>
    %144 = arith.addf %139, %143 : vector<256x4xf32>
    %145 = arith.addf %144, %141 : vector<256x4xf32>
    %cst_107 = arith.constant 0.000000e+00 : f32
    %146 = vector.broadcast %cst_107 : f32 to vector<256x4xf32>
    %147 = arith.maximumf %145, %146 : vector<256x4xf32>
    %c0_108 = arith.constant 0 : index
    %c0_109 = arith.constant 0 : index
    %c0_110 = arith.constant 0 : index
    %148 = vector.load %arg6[%c0_108, %c0_109, %c0_110] : memref<1x256x4xf32, #tpu.memory_space<vmem>>, vector<1x256x4xf32>
    %149 = vector.shape_cast %148 : vector<1x256x4xf32> to vector<256x4xf32>
    %150 = vector.shape_cast %147 : vector<256x4xf32> to vector<1x256x4xf32>
    tpu.vector_store %arg6[%c0_108, %c0_109, %c0_110], %150 {strides = array<i32>} : memref<1x256x4xf32, #tpu.memory_space<vmem>>, vector<1x256x4xf32>,
    return
  }
  func.func @transform_0(%arg0: i32) -> (i32, i32, i32, i32) {
    %c0_i32 = arith.constant 0 : i32
    %c0_i32_0 = arith.constant 0 : i32
    %c0_i32_1 = arith.constant 0 : i32
    %c0_i32_2 = arith.constant 0 : i32
    return %arg0, %c0_i32, %c0_i32_0, %c0_i32_1 : i32, i32, i32, i32
  }
  func.func @transform_1(%arg0: i32) -> (i32, i32, i32) {
    %c0_i32 = arith.constant 0 : i32
    %c0_i32_0 = arith.constant 0 : i32
    %c0_i32_1 = arith.constant 0 : i32
    %c0_i32_2 = arith.constant 0 : i32
    return %c0_i32, %c0_i32_0, %c0_i32_1 : i32, i32, i32
  }
  func.func @transform_2(%arg0: i32) -> (i32, i32) {
    %c0_i32 = arith.constant 0 : i32
    %c0_i32_0 = arith.constant 0 : i32
    %c0_i32_1 = arith.constant 0 : i32
    return %c0_i32, %c0_i32_0 : i32, i32
  }
  func.func @transform_3(%arg0: i32) -> (i32, i32, i32) {
    %c0_i32 = arith.constant 0 : i32
    %c0_i32_0 = arith.constant 0 : i32
    %c0_i32_1 = arith.constant 0 : i32
    %c0_i32_2 = arith.constant 0 : i32
    return %c0_i32, %c0_i32_0, %c0_i32_1 : i32, i32, i32
  }
  func.func @transform_4(%arg0: i32) -> (i32, i32) {
    %c0_i32 = arith.constant 0 : i32
    %c0_i32_0 = arith.constant 0 : i32
    %c0_i32_1 = arith.constant 0 : i32
    return %c0_i32, %c0_i32_0 : i32, i32
  }
  func.func @transform_5(%arg0: i32) -> (i32, i32, i32) {
    %c0_i32 = arith.constant 0 : i32
    %c0_i32_0 = arith.constant 0 : i32
    %c0_i32_1 = arith.constant 0 : i32
    return %arg0, %c0_i32, %c0_i32_0 : i32, i32, i32
  }
}

</mosaic_0001>

<bundles_post_ra>
// kernel: residual_block_forward.1
= control target key start
LH: loop header
LB: loop body
LE: loop exit
PB: predicated region body
PF: predicated region fallthrough
CT: control target
= control target key end

     0   :  { %s4626_s18 = smov 0   ;;  %s6812_s0 = inlined_call_operand.vmem [shape: bf16[2,18,18,4], index: 0, kind: input, shape index: {}]   ;;  %s6813_s1 = inlined_call_operand.vmem [shape: bf16[9,4,4], index: 1, kind: input, shape index: {}]   ;;  %s6814_s2 = inlined_call_operand.vmem [shape: f32[1,4], index: 2, kind: input, shape index: {}]   ;;  %s6815_s3 = inlined_call_operand.vmem [shape: bf16[9,4,4], index: 3, kind: input, shape index: {}]   ;;  %s6816_s4 = inlined_call_operand.vmem [shape: f32[1,4], index: 4, kind: input, shape index: {}]   ;;  %s6817_s5 = inlined_call_operand.vmem [shape: f32[2,256,4], index: 5, kind: output, shape index: {}]  }
   0x1 LB: > { %s4206_s19 = sadd.s32 4294967295, %s4593_s18   ;;  %p4210_p0 = scmp.ge.s32.totalorder %s4593_s18, 1  ;;  %s4593_s18 = sphi %s4626_s18, %s15_s18  }
   0x2   : > { %p187_p1 = scmp.lt.s32.totalorder %s4593_s18, 3 }
   0x4   : > { %p188_p2 = pnand %p4210_p0, %p187_p1 }
   0x6   : > { %191 = sbr.rel (%p188_p2) target bundleno = 1450 (0x5aa), region = 40 }
   0xb   : > { %v350_v0 = vld [vmem:[%s6813_s1] sm:$0x3]  ;;  %vm579_vm0 = vcmask 1041408   ;;  %p215_p3 = scmp.lt.s32.totalorder %s4206_s19, 1  ;;  %v4214_v2 = vld [vmem:[%s6813_s1 + $0x2] sm:$0x3] }
   0xc   : > { %v721_v1 = vsel %vm579_vm0, %v350_v0, 0  ;;  %v4247_v3 = vld [vmem:[%s6813_s1 + $0x4] sm:$0x3]  ;;  %v581_v4 = vsel %vm579_vm0, %v4214_v2, 0  ;;  %v4264_v6 = vld [vmem:[%s6813_s1 + $0x6] sm:$0x3] }
   0xd   : > { %4566 = vmatpush.bf16.msra.mxu3 %v721_v1  ;;  %s7155_s19 = smov (!%p215_p3, %s4206_s19), 1  ;;  %730 = vmatpush.bf16.msra.mxu1 %v721_v1  ;;  %v992_v5 = vsel %vm579_vm0, %v4247_v3, 0  ;;  %v1122_v7 = vsel %vm579_vm0, %v4264_v6, 0  ;;  %v4281_v8 = vld [vmem:[%s6813_s1 + $0x8] sm:$0x3]  ;;  %vm530_vm1 = vcmask 31744  }
   0xe   : > { %590 = vmatpush.bf16.msra.mxu0 %v581_v4  ;;  %4565 = vmatpush.bf16.msra.mxu2 %v581_v4  ;;  %s4567_s30 = smul.u32 216, %s7155_s19  ;;  %v1262_v9 = vsel %vm579_vm0, %v4281_v8, 0  ;;  %vm399_vm2 = vcmask 1046528   ;;  %vm812_vm3 = vcmask 1045504   ;;  %vm1999_vm4 = vcmask 25600   ;;  %s4520_s20 = sshll.u32 %s7155_s19, 8 }
   0xf   : > { %s6608_s23 = scalar_lea.vmem %s6817_s5, %s4520_s20 }
  0x10   : > { %s4660_s8 = scalar_lea.vmem %s6812_s0, %s4567_s30 }
  0x11   : > { %1131 = vmatpush.bf16.msrb.mxu3 %v1122_v7  ;;  %v4663_v10 = vld [vmem:[%s4660_s8 + $0x60] sm:$0xff]   ;;  %v4669_v12 = vld [vmem:[%s4660_s8 + $0x8] sm:$0x1]  ;;  %v4699_v28 = vld [vmem:[%s4660_s8 + $0x6c] sm:$0xff]  }
  0x12   : > { %1001 = vmatpush.bf16.msrb.mxu2 %v992_v5  ;;  %1271 = vmatpush.bf16.msrb.mxu0 %v1262_v9  ;;  %v4666_v11 = vld [vmem:[%s4660_s8] sm:$0xff]   ;;  %v6842_v15 = vunpack.c.l.bf16 %v4669_v12  ;;  %v6829_v16 = vunpack.c.l.bf16 %v4663_v10  ;;  %v4678_v17 = vld [vmem:[%s4660_s8 + $0x68] sm:$0x1]  ;;  %v6828_v18 = vunpack.c.h.bf16 %v4663_v10  ;;  %6925 = vst [vmem:[#allocation3_spill] sm:$0xff] %v4699_v28  ;;  %v4708_v32 = vld [vmem:[%s4660_s8 + $0xc] sm:$0xff]   ;;  %v6826_v36 = vunpack.c.l.bf16 %v4699_v28 }
  0x13   : > { %4239 = vmatmul.msk.bf16.vlgmr.msra.gmra.mxu3 %vm530_vm1, %v4663_v10  ;;  %v6844_v13 = vunpack.c.l.bf16 %v4666_v11  ;;  %v6843_v14 = vunpack.c.h.bf16 %v4666_v11  ;;  %4231 = vmatmul.msk.bf16.vlgmr.msra.gmra.mxu1 %vm530_vm1, %v4666_v11  ;;  %v6827_v19 = vunpack.c.l.bf16 %v4678_v17  ;;  %v4711_v33 = vld [vmem:[%s4660_s8 + $0x14] sm:$0x1]  ;;  %v6825_v37 = vunpack.c.h.bf16 %v4699_v28  ;;  %v4766_v54 = vld [vmem:[%s4660_s8 + $0x18] sm:$0xff]   ;;  %v4769_v55 = vld [vmem:[%s4660_s8 + $0x20] sm:$0x1] }
  0x14   : > { %v403_v22 = vrot.slane %v6842_v15, 1  ;;  %v440_v23 = vrot.slane %v6829_v16, 1  ;;  %v441_v24 = vrot.slane %v6828_v18, 1  ;;  %v4718_v35 = vld [vmem:[%s4660_s8 + $0x74] sm:$0x1]  ;;  %v6853_v38 = vunpack.c.l.bf16 %v4708_v32  ;;  %v4772_v56 = vld [vmem:[%s4660_s8 + $0x78] sm:$0xff]  }
  0x15   : > { %v400_v20 = vrot.slane %v6844_v13, 1  ;;  %v401_v21 = vrot.slane %v6843_v14, 1  ;;  %v443_v25 = vrot.slane %v6827_v19, 1  ;;  %v6846_v39 = vunpack.c.h.bf16 %v4708_v32  ;;  %v4775_v57 = vld [vmem:[%s4660_s8 + $0x80] sm:$0x1] }
  0x16   : > { %v4702_v30 = vsel %vm399_vm2, %v440_v23, %v441_v24  ;;  %v6845_v40 = vunpack.c.l.bf16 %v4711_v33  ;;  %v6824_v41 = vunpack.c.l.bf16 %v4718_v35  ;;  %v405_v42 = vrot.slane %v6853_v38, 1  ;;  %v4827_v23 = vld [vmem:[%s4660_s8 + $0x24] sm:$0xff]   ;;  %v5007_v38 = vld [vmem:[%s4660_s8 + $0xb0] sm:$0x1] }
  0x17   : > { %v402_v26 = vsel %vm399_vm2, %v400_v20, %v401_v21  ;;  %v404_v27 = vsel %vm399_vm2, %v401_v21, %v403_v22  ;;  %6926 = vst [vmem:[#allocation4_spill] sm:$0xff] %v4702_v30  ;;  %v4705_v31 = vsel %vm399_vm2, %v441_v24, %v443_v25  ;;  %v406_v43 = vrot.slane %v6846_v39, 1  ;;  %v4824_v22 = vld [vmem:[%s4660_s8 + $0x84] sm:$0xff]   ;;  %v4830_v24 = vld [vmem:[%s4660_s8 + $0x2c] sm:$0x1] }
  0x18   : > { %v512_v29 = vpack.c.bf16 %v404_v27, %v402_v26  ;;  %6927 = vst [vmem:[#allocation5_spill] sm:$0xff] %v4705_v31  ;;  %v4715_v34 = vpack.c.bf16 %v4705_v31, %v4702_v30  ;;  %v408_v44 = vrot.slane %v6845_v40, 1  ;;  %v445_v45 = vrot.slane %v6826_v36, 1  ;;  %v4833_v25 = vld [vmem:[%s4660_s8 + $0x8c] sm:$0x1] }
  0x19   : > { %v446_v46 = vrot.slane %v6825_v37, 1  ;;  %v448_v47 = vrot.slane %v6824_v41, 1  ;;  %v4744_v48 = vsel %vm399_vm2, %v405_v42, %v406_v43  ;;  %v6841_v58 = vunpack.c.l.bf16 %v4766_v54  ;;  %v4315_v31 = vld [vmem:[%s6813_s1 + $0xc] sm:$0x3]  ;;  %v4332_v30 = vld [vmem:[%s6813_s1 + $0xe] sm:$0x3] }
  0x1a   : > { %6928 = vst [vmem:[#allocation6_spill] sm:$0xff] %v4715_v34  ;;  %4215 = vmatmul.msk.bf16.vlgmr.msra.gmra.mxu0 %vm530_vm1, %v512_v29  ;;  %4223 = vmatmul.msk.bf16.vlgmr.msra.gmra.mxu2 %vm530_vm1, %v4715_v34  ;;  %v4747_v49 = vsel %vm399_vm2, %v406_v43, %v408_v44  ;;  %v6840_v59 = vunpack.c.h.bf16 %v4766_v54  ;;  %v6839_v60 = vunpack.c.l.bf16 %v4769_v55  ;;  %v6823_v61 = vunpack.c.l.bf16 %v4772_v56 }
  0x1b   : > { %6929 = vst [vmem:[#allocation7_spill] sm:$0xff] %v4744_v48  ;;  %v4752_v50 = vsel %vm399_vm2, %v445_v45, %v446_v46  ;;  %v4755_v51 = vsel %vm399_vm2, %v446_v46, %v448_v47  ;;  %v4759_v52 = vpack.c.bf16 %v4747_v49, %v4744_v48  ;;  %v6822_v62 = vunpack.c.h.bf16 %v4772_v56 }
  0x1c   : > { %6930 = vst [vmem:[#allocation8_spill] sm:$0xff] %v4747_v49  ;;  %v4763_v53 = vpack.c.bf16 %v4755_v51, %v4752_v50  ;;  %v6821_v63 = vunpack.c.l.bf16 %v4775_v57  ;;  %v410_v0 = vrot.slane %v6841_v58, 1  ;;  %v411_v1 = vrot.slane %v6840_v59, 1 }
  0x1d   : > { %6931 = vst [vmem:[#allocation9_spill] sm:$0xff] %v4752_v50  ;;  %v413_v2 = vrot.slane %v6839_v60, 1  ;;  %v450_v3 = vrot.slane %v6823_v61, 1  ;;  %v451_v4 = vrot.slane %v6822_v62, 1  ;;  %v6820_v26 = vunpack.c.l.bf16 %v4824_v22  ;;  %v5065_v50 = vld [vmem:[%s4660_s8 + $0xbc] sm:$0x1] }
  0x1e   : > { %6932 = vst [vmem:[#allocation10_spill] sm:$0xff] %v4755_v51  ;;  %v453_v5 = vrot.slane %v6821_v63, 1  ;;  %v4802_v6 = vsel %vm399_vm2, %v410_v0, %v411_v1  ;;  %v6818_v27 = vunpack.c.h.bf16 %v4824_v22  ;;  %v6838_v29 = vunpack.c.l.bf16 %v4827_v23  ;;  %v4891_v63 = vld [vmem:[%s4660_s8 + $0x98] sm:$0x1] }
  0x1f   : > { %6933 = vst [vmem:[#allocation11_spill] sm:$0xff] %v4763_v53  ;;  %v4805_v7 = vsel %vm399_vm2, %v411_v1, %v413_v2  ;;  %v4810_v8 = vsel %vm399_vm2, %v450_v3, %v451_v4  ;;  %v6837_v42 = vunpack.c.h.bf16 %v4827_v23  ;;  %v6830_v43 = vunpack.c.l.bf16 %v4830_v24 }
  0x20   : > { %6934 = vst [vmem:[#allocation12_spill] sm:$0xff] %v4802_v6  ;;  %v4813_v9 = vsel %vm399_vm2, %v451_v4, %v453_v5  ;;  %v4817_v20 = vpack.c.bf16 %v4805_v7, %v4802_v6  ;;  %v6819_v44 = vunpack.c.l.bf16 %v4833_v25  ;;  %v415_v45 = vrot.slane %v6838_v29, 1 }
  0x21   : > { %6935 = vst [vmem:[#allocation13_spill] sm:$0xff] %v4805_v7  ;;  %v4821_v21 = vpack.c.bf16 %v4813_v9, %v4810_v8  ;;  %v416_v46 = vrot.slane %v6837_v42, 1  ;;  %v418_v47 = vrot.slane %v6830_v43, 1  ;;  %v455_v0 = vrot.slane %v6820_v26, 1  ;;  %v4882_v26 = vld [vmem:[%s4660_s8 + $0x30] sm:$0xff]  }
  0x22   : > { %6936 = vst [vmem:[#allocation14_spill] sm:$0xff] %v4810_v8  ;;  %v456_v1 = vrot.slane %v6818_v27, 1  ;;  %v458_v2 = vrot.slane %v6819_v44, 1  ;;  %v6835_v41 = vunpack.c.l.bf16 %v4891_v63  ;;  %v4949_v42 = vld [vmem:[%s4660_s8 + $0xa4] sm:$0x1] }
  0x23   : > { %4240 = vmatmul.msk.bf16.gmra.mxu3 %vm530_vm1, %v4699_v28  ;;  %4232 = vmatmul.msk.bf16.gmra.mxu1 %vm530_vm1, %v4708_v32  ;;  %6937 = vst [vmem:[#allocation15_spill] sm:$0xff] %v4813_v9  ;;  %v4860_v3 = vsel %vm399_vm2, %v415_v45, %v416_v46  ;;  %v4863_v4 = vsel %vm399_vm2, %v416_v46, %v418_v47  ;;  %v4885_v46 = vld [vmem:[%s4660_s8 + $0x38] sm:$0x1]  ;;  %v4888_v47 = vld [vmem:[%s4660_s8 + $0x90] sm:$0xff]   ;;  %v6851_v59 = vunpack.c.l.bf16 %v4949_v42 }
  0x24   : > { %6938 = vst [vmem:[#allocation16_spill] sm:$0xff] %v4860_v3  ;;  %v4868_v5 = vsel %vm399_vm2, %v455_v0, %v456_v1  ;;  %v4871_v27 = vsel %vm399_vm2, %v456_v1, %v458_v2  ;;  %v4875_v44 = vpack.c.bf16 %v4863_v4, %v4860_v3  ;;  %v6831_v0 = vunpack.c.l.bf16 %v4882_v26 }
  0x25   : > { %6939 = vst [vmem:[#allocation17_spill] sm:$0xff] %v4863_v4  ;;  %v4879_v45 = vpack.c.bf16 %v4871_v27, %v4868_v5  ;;  %v6832_v1 = vunpack.c.h.bf16 %v4882_v26  ;;  %v6836_v2 = vunpack.c.l.bf16 %v4885_v46  ;;  %v6833_v62 = vunpack.c.l.bf16 %v4888_v47 }
  0x26   : > { %6940 = vst [vmem:[#allocation18_spill] sm:$0xff] %v4868_v5  ;;  %v6834_v61 = vunpack.c.h.bf16 %v4888_v47  ;;  %v420_v37 = vrot.slane %v6831_v0, 1  ;;  %v463_v43 = vrot.slane %v6835_v41, 1  ;;  %v468_v39 = vrot.slane %v6851_v59, 1 }
  0x27   : > { %6941 = vst [vmem:[#allocation19_spill] sm:$0xff] %v4871_v27  ;;  %v421_v36 = vrot.slane %v6832_v1, 1  ;;  %v423_v19 = vrot.slane %v6836_v2, 1  ;;  %v460_v18 = vrot.slane %v6833_v62, 1  ;;  %v4940_v2 = vld [vmem:[%s4660_s8 + $0x9c] sm:$0xff]  }
  0x28   : > { %v461_v16 = vrot.slane %v6834_v61, 1 }
  0x29   : > { %v4918_v0 = vsel %vm399_vm2, %v420_v37, %v421_v36  ;;  %v4921_v1 = vsel %vm399_vm2, %v421_v36, %v423_v19  ;;  %v4943_v19 = vld [vmem:[%s4660_s8 + $0x3c] sm:$0xff]   ;;  %v4946_v36 = vld [vmem:[%s4660_s8 + $0x44] sm:$0x1] }
  0x2a   : > { %4216 = vmatmul.msk.bf16.gmra.mxu0 %vm530_vm1, %v4759_v52  ;;  %4224 = vmatmul.msk.bf16.gmra.mxu2 %vm530_vm1, %v4763_v53  ;;  %6942 = vst [vmem:[#allocation20_spill] sm:$0xff] %v4918_v0  ;;  %v4926_v62 = vsel %vm399_vm2, %v460_v18, %v461_v16  ;;  %v4929_v61 = vsel %vm399_vm2, %v461_v16, %v463_v43  ;;  %v6849_v16 = vunpack.c.l.bf16 %v4940_v2  ;;  %v6850_v18 = vunpack.c.h.bf16 %v4940_v2 }
  0x2b   : > { %6943 = vst [vmem:[#allocation21_spill] sm:$0xff] %v4921_v1  ;;  %v4933_v41 = vpack.c.bf16 %v4921_v1, %v4918_v0  ;;  %v4937_v37 = vpack.c.bf16 %v4929_v61, %v4926_v62  ;;  %v6847_v43 = vunpack.c.l.bf16 %v4943_v19  ;;  %v6848_v29 = vunpack.c.h.bf16 %v4943_v19 }
  0x2c   : > { %6944 = vst [vmem:[#allocation22_spill] sm:$0xff] %v4926_v62  ;;  %v6852_v60 = vunpack.c.l.bf16 %v4946_v36  ;;  %v465_v13 = vrot.slane %v6849_v16, 1  ;;  %v466_v40 = vrot.slane %v6850_v18, 1 }
  0x2d   : > { %6945 = vst [vmem:[#allocation23_spill] sm:$0xff] %v4929_v61  ;;  %v425_v58 = vrot.slane %v6847_v43, 1  ;;  %v426_v15 = vrot.slane %v6848_v29, 1  ;;  %v6867_v61 = vunpack.c.l.bf16 %v5007_v38 }
  0x2e   : > { %6946 = vst [vmem:[#allocation24_spill] sm:$0xff] %v4933_v41  ;;  %v428_v14 = vrot.slane %v6852_v60, 1  ;;  %v4984_v16 = vsel %vm399_vm2, %v465_v13, %v466_v40  ;;  %v4987_v18 = vsel %vm399_vm2, %v466_v40, %v468_v39  ;;  %v4998_v60 = vld [vmem:[%s4660_s8 + $0x48] sm:$0xff]  }
  0x2f   : > { %6947 = vst [vmem:[#allocation25_spill] sm:$0xff] %v4943_v19  ;;  %v4976_v43 = vsel %vm399_vm2, %v425_v58, %v426_v15  ;;  %v4995_v58 = vpack.c.bf16 %v4987_v18, %v4984_v16  ;;  %v6863_v13 = vunpack.c.l.bf16 %v4998_v60  ;;  %v6864_v39 = vunpack.c.h.bf16 %v4998_v60 }
  0x30   : > { %6948 = vst [vmem:[#allocation26_spill] sm:$0xff] %v4976_v43  ;;  %v4979_v29 = vsel %vm399_vm2, %v426_v15, %v428_v14  ;;  %v5001_v14 = vld [vmem:[%s4660_s8 + $0x50] sm:$0x1]  ;;  %v5004_v15 = vld [vmem:[%s4660_s8 + $0xa8] sm:$0xff]   ;;  %v473_v51 = vrot.slane %v6867_v61, 1 }
  0x31   : > { %6949 = vst [vmem:[#allocation27_spill] sm:$0xff] %v4979_v29  ;;  %v4991_v59 = vpack.c.bf16 %v4979_v29, %v4976_v43  ;;  %v6868_v40 = vunpack.c.l.bf16 %v5001_v14  ;;  %v430_v62 = vrot.slane %v6863_v13, 1  ;;  %v431_v27 = vrot.slane %v6864_v39, 1 }
  0x32   : > { %6950 = vst [vmem:[#allocation28_spill] sm:$0xff] %v4984_v16  ;;  %v6866_v16 = vunpack.c.h.bf16 %v5004_v15 }
  0x33   : > { %4241 = vmatmul.msk.bf16.gmra.mxu3 %vm530_vm1, %v4772_v56  ;;  %4233 = vmatmul.msk.bf16.gmra.mxu1 %vm530_vm1, %v4766_v54  ;;  %6951 = vst [vmem:[#allocation29_spill] sm:$0xff] %v4987_v18  ;;  %v6865_v18 = vunpack.c.l.bf16 %v5004_v15  ;;  %v433_v5 = vrot.slane %v6868_v40, 1  ;;  %v5034_v13 = vsel %vm399_vm2, %v430_v62, %v431_v27  ;;  %v5056_v40 = vld [vmem:[%s4660_s8 + $0xb4] sm:$0xff]  }
  0x34   : > { %6952 = vst [vmem:[#allocation30_spill] sm:$0xff] %v4991_v59  ;;  %v471_v8 = vrot.slane %v6866_v16, 1  ;;  %v6962_v1 = vunpack.c.l.bf16 %v5056_v40 }
  0x35   : > { %v470_v9 = vrot.slane %v6865_v18, 1  ;;  %6953 = vst [vmem:[#allocation31_spill] sm:$0xff] %v5034_v13  ;;  %v5037_v39 = vsel %vm399_vm2, %v431_v27, %v433_v5  ;;  %v5059_v27 = vld [vmem:[%s4660_s8 + $0x54] sm:$0xff]   ;;  %v5062_v5 = vld [vmem:[%s4660_s8 + $0x5c] sm:$0x1] }
  0x36   : > { %6954 = vst [vmem:[#allocation32_spill] sm:$0xff] %v5037_v39  ;;  %v5045_v16 = vsel %vm399_vm2, %v471_v8, %v473_v51  ;;  %v5049_v61 = vpack.c.bf16 %v5037_v39, %v5034_v13  ;;  %v1669_v39 = vsel %vm579_vm0, %v4332_v30, 0  ;;  %v6961_v29 = vunpack.c.l.bf16 %v5062_v5 }
  0x37   : > { %v5042_v18 = vsel %vm399_vm2, %v470_v9, %v471_v8  ;;  %6956 = vst [vmem:[#allocation34_spill] sm:$0xff] %v5045_v16  ;;  %v6881_v9 = vunpack.c.l.bf16 %v5059_v27  ;;  %v1529_v8 = vsel %vm579_vm0, %v4315_v31, 0  ;;  %1678 = vmatpush.bf16.msra.mxu3 %v1669_v39  ;;  %v475_v0 = vrot.slane %v6962_v1, 1  ;;  %v4298_v39 = vld [vmem:[%s6813_s1 + $0xa] sm:$0x3] }
  0x38   : > { %6955 = vst [vmem:[#allocation33_spill] sm:$0xff] %v5042_v18  ;;  %v5053_v62 = vpack.c.bf16 %v5045_v16, %v5042_v18  ;;  %1538 = vmatpush.bf16.msra.mxu2 %v1529_v8  ;;  %v6960_v18 = vunpack.c.h.bf16 %v5059_v27  ;;  %v438_v43 = vrot.slane %v6961_v29, 1  ;;  %v6963_v51 = vunpack.c.h.bf16 %v5056_v40 }
  0x39   : > { %6957 = vst [vmem:[#allocation35_spill] sm:$0xff] %v5049_v61  ;;  %v435_v16 = vrot.slane %v6881_v9, 1  ;;  %v6964_v31 = vunpack.c.l.bf16 %v5065_v50  ;;  %v1399_v1 = vsel %vm579_vm0, %v4298_v39, 0  ;;  %v6970_v39 = vunpack.c.l.bf16 %v4708_v32 }
  0x3a   : > { %4217 = vmatmul.msk.bf16.gmra.mxu0 %vm530_vm1, %v4817_v20  ;;  %4225 = vmatmul.msk.bf16.gmra.mxu2 %vm530_vm1, %v4821_v21  ;;  %6958 = vst [vmem:[#allocation36_spill] sm:$0xff] %v5056_v40  ;;  %v436_v13 = vrot.slane %v6960_v18, 1  ;;  %v476_v4 = vrot.slane %v6963_v51, 1  ;;  %v4349_v51 = vld [vmem:[%s6813_s1 + $0x10] sm:$0x3] }
  0x3b   : > { %6959 = vst [vmem:[#allocation37_spill] sm:$0xff] %v5059_v27  ;;  %v478_v30 = vrot.slane %v6964_v31, 1  ;;  %1408 = vmatpush.bf16.msrb.mxu1 %v1399_v1  ;;  %v818_v9 = vrot.slane %v6970_v39, 2  ;;  %v6973_v39 = vunpack.c.l.bf16 %v4666_v11 }
  0x3c   : > { %v5103_v18 = vsel %vm399_vm2, %v435_v16, %v436_v13  ;;  %v5106_v29 = vsel %vm399_vm2, %v436_v13, %v438_v43  ;;  %v5115_v8 = vsel %vm399_vm2, %v475_v0, %v476_v4  ;;  %v1806_v16 = vsel %vm579_vm0, %v4349_v51, 0 }
  0x3d   : > { %6965 = vst [vmem:[#allocation38_spill] sm:$0xff] %v5103_v18  ;;  %v5118_v31 = vsel %vm399_vm2, %v476_v4, %v478_v30  ;;  %1815 = vmatpush.bf16.msra.mxu0 %v1806_v16  ;;  %v5123_v43 = vpack.c.bf16 %v5106_v29, %v5103_v18  ;;  %v6971_v0 = vunpack.c.h.bf16 %v4708_v32  ;;  %v6972_v4 = vunpack.c.l.bf16 %v4711_v33 }
  0x3e   : > { %6966 = vst [vmem:[#allocation39_spill] sm:$0xff] %v5106_v29  ;;  %v5127_v13 = vpack.c.bf16 %v5118_v31, %v5115_v8 }
  0x3f   : > { %6967 = vst [vmem:[#allocation40_spill] sm:$0xff] %v5115_v8  ;;  %v819_v3 = vrot.slane %v6971_v0, 2  ;;  %v821_v30 = vrot.slane %v6972_v4, 2  ;;  %v813_v8 = vrot.slane %v6973_v39, 2  ;;  %v6974_v0 = vunpack.c.h.bf16 %v4666_v11 }
  0x40   : > { %6968 = vst [vmem:[#allocation41_spill] sm:$0xff] %v5118_v31  ;;  %v6975_v4 = vunpack.c.l.bf16 %v4669_v12  ;;  %v6976_v11 = vunpack.c.l.bf16 %v4766_v54  ;;  %v6977_v12 = vunpack.c.h.bf16 %v4766_v54 }
  0x41   : > { %6969 = vst [vmem:[#allocation42_spill] sm:$0xff] %v5123_v43  ;;  %v820_v1 = vsel %vm812_vm3, %v818_v9, %v819_v3  ;;  %v822_v51 = vsel %vm812_vm3, %v819_v3, %v821_v30  ;;  %v814_v33 = vrot.slane %v6974_v0, 2 }
  0x42   : > { %v926_v16 = vpack.c.bf16 %v822_v51, %v820_v1  ;;  %v816_v29 = vrot.slane %v6975_v4, 2  ;;  %v823_v0 = vrot.slane %v6976_v11, 2  ;;  %v824_v4 = vrot.slane %v6977_v12, 2 }
  0x43   : > { %4242 = vmatmul.msk.bf16.gmra.mxu3 %vm530_vm1, %v4824_v22  ;;  %4234 = vmatmul.msk.bf16.gmra.mxu1 %vm530_vm1, %v4827_v23  ;;  %v815_v9 = vsel %vm812_vm3, %v813_v8, %v814_v33 }
  0x44   : > { %v817_v3 = vsel %vm812_vm3, %v814_v33, %v816_v29  ;;  %v825_v29 = vsel %vm812_vm3, %v823_v0, %v824_v4 }
  0x45   : > { %v925_v51 = vpack.c.bf16 %v817_v3, %v815_v9 }
  0x4a   : > { %4218 = vmatmul.msk.bf16.gmra.mxu0 %vm530_vm1, %v4875_v44  ;;  %4226 = vmatmul.msk.bf16.gmra.mxu2 %vm530_vm1, %v4879_v45 }
  0x53   : > { %4243 = vmatmul.msk.bf16.gmra.mxu3 %vm530_vm1, %v4888_v47  ;;  %4235 = vmatmul.msk.bf16.gmra.mxu1 %vm530_vm1, %v4882_v26 }
  0x5a   : > { %4219 = vmatmul.msk.bf16.gmra.mxu0 %vm530_vm1, %v4933_v41  ;;  %4227 = vmatmul.msk.bf16.gmra.mxu2 %vm530_vm1, %v4937_v37 }
  0x63   : > { %4244 = vmatmul.msk.bf16.gmra.mxu3 %vm530_vm1, %v4940_v2  ;;  %4236 = vmatmul.msk.bf16.gmra.mxu1 %vm530_vm1, %v4943_v19 }
  0x6a   : > { %4220 = vmatmul.msk.bf16.gmra.mxu0 %vm530_vm1, %v4991_v59  ;;  %4228 = vmatmul.msk.bf16.gmra.mxu2 %vm530_vm1, %v4995_v58 }
  0x73   : > { %4245 = vmatmul.msk.bf16.gmra.mxu3 %vm530_vm1, %v5004_v15  ;;  %4237 = vmatmul.msk.bf16.gmra.mxu1 %vm530_vm1, %v4998_v60 }
  0x7a   : > { %4221 = vmatmul.msk.bf16.gmra.mxu0 %vm530_vm1, %v5049_v61  ;;  %4229 = vmatmul.msk.bf16.gmra.mxu2 %vm530_vm1, %v5053_v62 }
  0x83   : > { %4246 = vmatmul.msk.bf16.gmra.mxu3 %vm530_vm1, %v5056_v40  ;;  %4238 = vmatmul.msk.bf16.gmra.mxu1 %vm530_vm1, %v5059_v27 }
  0x8a   : > { %4222 = vmatmul.msk.bf16.gmra.mxu0 %vm530_vm1, %v5123_v43  ;;  %4230 = vmatmul.msk.bf16.gmra.mxu2 %vm530_vm1, %v5127_v13 }
  0x90   : > { %v732_v31 = vpop.f32.mrf.mxu1 }
  0x93   : > { %4265 = vmatmul.msk.bf16.vlgmr.msrb.gmra.mxu3 %vm530_vm1, %v4708_v32  ;;  %4299 = vmatmul.msk.bf16.vlgmr.msrb.gmra.mxu1 %vm530_vm1, %v926_v16  ;;  %v6978_v32 = vunpack.c.l.bf16 %v4769_v55 }
  0x95   : > { %v826_v7 = vrot.slane %v6978_v32, 2 }
  0x96   : > { %v772_v30 = vpop.f32.mrf.mxu3 }
  0x97   : > { %v592_v1 = vpop.f32.mrf.mxu0  ;;  %v827_v8 = vsel %vm812_vm3, %v824_v4, %v826_v7  ;;  %v6979_v4 = vunpack.c.l.bf16 %v4827_v23 }
  0x98   : > { %v5152_v18 = vadd.f32 %v732_v31, %v592_v1  ;;  %v734_v39 = vpop.f32.mrf.mxu1  ;;  %v5167_v1 = vpack.c.bf16 %v827_v8, %v825_v29  ;;  %v6981_v8 = vunpack.c.l.bf16 %v4830_v24 }
  0x99   : > { %v828_v32 = vrot.slane %v6979_v4, 2 }
  0x9a   : > { %4282 = vmatmul.msk.bf16.vlgmr.msrb.gmra.mxu0 %vm530_vm1, %v4759_v52  ;;  %4248 = vmatmul.msk.bf16.vlgmr.msrb.gmra.mxu2 %vm530_vm1, %v925_v51 }
  0x9d   : > { %v632_v31 = vpop.f32.mrf.mxu2 }
  0x9e   : > { %v774_v33 = vpop.f32.mrf.mxu3  ;;  %v5165_v9 = vadd.f32 %v772_v30, %v632_v31 }
  0x9f   : > { %v594_v3 = vpop.f32.mrf.mxu0 }
  0xa0   : > { %v5169_v11 = vadd.f32 %v734_v39, %v594_v3  ;;  %v737_v55 = vpop.f32.mrf.mxu1  ;;  %v6980_v39 = vunpack.c.h.bf16 %v4827_v23 }
  0xa2   : > { %v829_v29 = vrot.slane %v6980_v39, 2 }
  0xa3   : > { %4266 = vmatmul.msk.bf16.gmra.mxu3 %vm530_vm1, %v4766_v54  ;;  %4300 = vmatmul.msk.bf16.gmra.mxu1 %vm530_vm1, %v5167_v1  ;;  %v831_v54 = vrot.slane %v6981_v8, 2 }
  0xa4   : > { %v830_v31 = vsel %vm812_vm3, %v828_v32, %v829_v29 }
  0xa5   : > { %v634_v52 = vpop.f32.mrf.mxu2 }
  0xa6   : > { %v777_v51 = vpop.f32.mrf.mxu3  ;;  %v5175_v0 = vadd.f32 %v774_v33, %v634_v52  ;;  %v832_v33 = vsel %vm812_vm3, %v829_v29, %v831_v54 }
  0xa7   : > { %v597_v7 = vpop.f32.mrf.mxu0  ;;  %v5192_v4 = vpack.c.bf16 %v832_v33, %v830_v31  ;;  %v6983_v31 = vunpack.c.l.bf16 %v4882_v26 }
  0xa8   : > { %v5177_v12 = vadd.f32 %v737_v55, %v597_v7  ;;  %v739_v30 = vpop.f32.mrf.mxu1 }
  0xa9   : > { %v833_v33 = vrot.slane %v6983_v31, 2 }
  0xaa   : > { %4283 = vmatmul.msk.bf16.gmra.mxu0 %vm530_vm1, %v4817_v20  ;;  %4249 = vmatmul.msk.bf16.gmra.mxu2 %vm530_vm1, %v926_v16 }
  0xad   : > { %v637_v3 = vpop.f32.mrf.mxu2 }
  0xae   : > { %v779_v55 = vpop.f32.mrf.mxu3  ;;  %v5190_v52 = vadd.f32 %v777_v51, %v637_v3 }
  0xaf   : > { %v599_v7 = vpop.f32.mrf.mxu0 }
  0xb0   : > { %v5194_v39 = vadd.f32 %v739_v30, %v599_v7  ;;  %v742_v24 = vpop.f32.mrf.mxu1  ;;  %v6984_v30 = vunpack.c.h.bf16 %v4882_v26  ;;  %v6985_v7 = vunpack.c.l.bf16 %v4885_v46 }
  0xb2   : > { %v834_v3 = vrot.slane %v6984_v30, 2  ;;  %v836_v6 = vrot.slane %v6985_v7, 2 }
  0xb3   : > { %4267 = vmatmul.msk.bf16.gmra.mxu3 %vm530_vm1, %v4827_v23  ;;  %4301 = vmatmul.msk.bf16.gmra.mxu1 %vm530_vm1, %v5192_v4 }
  0xb5   : > { %v639_v16 = vpop.f32.mrf.mxu2 }
  0xb6   : > { %v782_v32 = vpop.f32.mrf.mxu3  ;;  %v5200_v8 = vadd.f32 %v779_v55, %v639_v16  ;;  %v835_v55 = vsel %vm812_vm3, %v833_v33, %v834_v3 }
  0xb7   : > { %v602_v29 = vpop.f32.mrf.mxu0 }
  0xb8   : > { %6982 = vst [vmem:[#allocation43_spill] sm:$0xff] %v5200_v8  ;;  %v5202_v54 = vadd.f32 %v742_v24, %v602_v29  ;;  %v744_v51 = vpop.f32.mrf.mxu1  ;;  %v837_v24 = vsel %vm812_vm3, %v834_v3, %v836_v6 }
  0xb9   : > { %v5218_v48 = vpack.c.bf16 %v837_v24, %v835_v55  ;;  %v6988_v55 = vunpack.c.l.bf16 %v4943_v19 }
  0xba   : > { %4284 = vmatmul.msk.bf16.gmra.mxu0 %vm530_vm1, %v4875_v44  ;;  %4250 = vmatmul.msk.bf16.gmra.mxu2 %vm530_vm1, %v5167_v1 }
  0xbb   : > { %v838_v24 = vrot.slane %v6988_v55, 2 }
  0xbd   : > { %v642_v16 = vpop.f32.mrf.mxu2 }
  0xbe   : > { %v784_v29 = vpop.f32.mrf.mxu3  ;;  %v5216_v49 = vadd.f32 %v782_v32, %v642_v16 }
  0xbf   : > { %v604_v31 = vpop.f32.mrf.mxu0 }
  0xc0   : > { %6986 = vst [vmem:[#allocation44_spill] sm:$0xff] %v5216_v49  ;;  %v5220_v30 = vadd.f32 %v744_v51, %v604_v31  ;;  %v747_v46 = vpop.f32.mrf.mxu1  ;;  %v6989_v51 = vunpack.c.h.bf16 %v4943_v19  ;;  %v6990_v31 = vunpack.c.l.bf16 %v4946_v36 }
  0xc2   : > { %v839_v16 = vrot.slane %v6989_v51, 2 }
  0xc3   : > { %4268 = vmatmul.msk.bf16.gmra.mxu3 %vm530_vm1, %v4882_v26  ;;  %4302 = vmatmul.msk.bf16.gmra.mxu1 %vm530_vm1, %v5218_v48  ;;  %v841_v26 = vrot.slane %v6990_v31, 2 }
  0xc5   : > { %v644_v7 = vpop.f32.mrf.mxu2 }
  0xc6   : > { %v787_v33 = vpop.f32.mrf.mxu3  ;;  %v5226_v8 = vadd.f32 %v784_v29, %v644_v7  ;;  %v840_v29 = vsel %vm812_vm3, %v838_v24, %v839_v16 }
  0xc7   : > { %v607_v6 = vpop.f32.mrf.mxu0 }
  0xc8   : > { %6987 = vst [vmem:[#allocation45_spill] sm:$0xff] %v5226_v8  ;;  %v5228_v3 = vadd.f32 %v747_v46, %v607_v6  ;;  %v749_v32 = vpop.f32.mrf.mxu1  ;;  %v842_v46 = vsel %vm812_vm3, %v839_v16, %v841_v26 }
  0xc9   : > { %v5244_v49 = vpack.c.bf16 %v842_v46, %v840_v29  ;;  %v6993_v29 = vunpack.c.l.bf16 %v4998_v60 }
  0xca   : > { %4285 = vmatmul.msk.bf16.gmra.mxu0 %vm530_vm1, %v4933_v41  ;;  %4251 = vmatmul.msk.bf16.gmra.mxu2 %vm530_vm1, %v5192_v4 }
  0xcb   : > { %v843_v46 = vrot.slane %v6993_v29, 2 }
  0xcd   : > { %v647_v7 = vpop.f32.mrf.mxu2 }
  0xce   : > { %v789_v6 = vpop.f32.mrf.mxu3  ;;  %v5242_v8 = vadd.f32 %v787_v33, %v647_v7 }
  0xcf   : > { %v609_v55 = vpop.f32.mrf.mxu0 }
  0xd0   : > { %6991 = vst [vmem:[#allocation46_spill] sm:$0xff] %v5242_v8  ;;  %v5246_v51 = vadd.f32 %v749_v32, %v609_v55  ;;  %v752_v36 = vpop.f32.mrf.mxu1  ;;  %v6994_v32 = vunpack.c.h.bf16 %v4998_v60  ;;  %v6995_v55 = vunpack.c.l.bf16 %v5001_v14 }
  0xd2   : > { %v844_v7 = vrot.slane %v6994_v32, 2  ;;  %v846_v8 = vrot.slane %v6995_v55, 2 }
  0xd3   : > { %4269 = vmatmul.msk.bf16.gmra.mxu3 %vm530_vm1, %v4943_v19  ;;  %4303 = vmatmul.msk.bf16.gmra.mxu1 %vm530_vm1, %v5244_v49 }
  0xd5   : > { %v649_v31 = vpop.f32.mrf.mxu2 }
  0xd6   : > { %v792_v24 = vpop.f32.mrf.mxu3  ;;  %v5252_v41 = vadd.f32 %v789_v6, %v649_v31  ;;  %v845_v6 = vsel %vm812_vm3, %v843_v46, %v844_v7 }
  0xd7   : > { %v612_v16 = vpop.f32.mrf.mxu0 }
  0xd8   : > { %6992 = vst [vmem:[#allocation47_spill] sm:$0xff] %v5252_v41  ;;  %v5254_v26 = vadd.f32 %v752_v36, %v612_v16  ;;  %v754_v33 = vpop.f32.mrf.mxu1  ;;  %v847_v36 = vsel %vm812_vm3, %v844_v7, %v846_v8 }
  0xd9   : > { %v5270_v19 = vpack.c.bf16 %v847_v36, %v845_v6  ;;  %v6998_v6 = vunpack.c.l.bf16 %v5059_v27 }
  0xda   : > { %4286 = vmatmul.msk.bf16.gmra.mxu0 %vm530_vm1, %v4991_v59  ;;  %4252 = vmatmul.msk.bf16.gmra.mxu2 %vm530_vm1, %v5218_v48 }
  0xdb   : > { %v848_v36 = vrot.slane %v6998_v6, 2 }
  0xdd   : > { %v652_v31 = vpop.f32.mrf.mxu2 }
  0xde   : > { %v794_v16 = vpop.f32.mrf.mxu3  ;;  %v5268_v41 = vadd.f32 %v792_v24, %v652_v31 }
  0xdf   : > { %v614_v29 = vpop.f32.mrf.mxu0 }
  0xe0   : > { %6996 = vst [vmem:[#allocation48_spill] sm:$0xff] %v5268_v41  ;;  %v5272_v32 = vadd.f32 %v754_v33, %v614_v29  ;;  %v757_v14 = vpop.f32.mrf.mxu1  ;;  %v6999_v33 = vunpack.c.h.bf16 %v5059_v27  ;;  %v7000_v29 = vunpack.c.l.bf16 %v5062_v5 }
  0xe2   : > { %v849_v31 = vrot.slane %v6999_v33, 2 }
  0xe3   : > { %4270 = vmatmul.msk.bf16.gmra.mxu3 %vm530_vm1, %v4998_v60  ;;  %4304 = vmatmul.msk.bf16.gmra.mxu1 %vm530_vm1, %v5270_v19  ;;  %v851_v60 = vrot.slane %v7000_v29, 2 }
  0xe5   : > { %v654_v55 = vpop.f32.mrf.mxu2 }
  0xe6   : > { %v797_v46 = vpop.f32.mrf.mxu3  ;;  %v5278_v59 = vadd.f32 %v794_v16, %v654_v55  ;;  %v850_v16 = vsel %vm812_vm3, %v848_v36, %v849_v31 }
  0xe7   : > { %v617_v8 = vpop.f32.mrf.mxu0 }
  0xe8   : > { %6997 = vst [vmem:[#allocation49_spill] sm:$0xff] %v5278_v59  ;;  %v5280_v7 = vadd.f32 %v757_v14, %v617_v8  ;;  %v759_v24 = vpop.f32.mrf.mxu1  ;;  %v852_v14 = vsel %vm812_vm3, %v849_v31, %v851_v60 }
  0xe9   : > { %v5296_v41 = vpack.c.bf16 %v852_v14, %v850_v16  ;;  %v7004_v16 = vunpack.c.l.bf16 %v4663_v10 }
  0xea   : > { %4287 = vmatmul.msk.bf16.gmra.mxu0 %vm530_vm1, %v5049_v61  ;;  %4253 = vmatmul.msk.bf16.gmra.mxu2 %vm530_vm1, %v5244_v49 }
  0xeb   : > { %7002 = vst [vmem:[#allocation51_spill] sm:$0xff] %v5296_v41  ;;  %v853_v14 = vrot.slane %v7004_v16, 2 }
  0xed   : > { %v657_v55 = vpop.f32.mrf.mxu2 }
  0xee   : > { %v799_v8 = vpop.f32.mrf.mxu3  ;;  %v5294_v59 = vadd.f32 %v797_v46, %v657_v55 }
  0xef   : > { %v619_v6 = vpop.f32.mrf.mxu0 }
  0xf0   : > { %7001 = vst [vmem:[#allocation50_spill] sm:$0xff] %v5294_v59  ;;  %v5298_v33 = vadd.f32 %v759_v24, %v619_v6  ;;  %v762_v5 = vpop.f32.mrf.mxu1  ;;  %v7005_v24 = vunpack.c.h.bf16 %v4663_v10  ;;  %v7006_v6 = vunpack.c.l.bf16 %v4678_v17 }
  0xf2   : > { %v854_v55 = vrot.slane %v7005_v24, 2  ;;  %v856_v59 = vrot.slane %v7006_v6, 2 }
  0xf3   : > { %4271 = vmatmul.msk.bf16.gmra.mxu3 %vm530_vm1, %v5059_v27  ;;  %4305 = vmatmul.msk.bf16.gmra.mxu1 %vm530_vm1, %v5296_v41 }
  0xf5   : > { %v659_v29 = vpop.f32.mrf.mxu2 }
  0xf6   : > { %v802_v36 = vpop.f32.mrf.mxu3  ;;  %v5304_v61 = vadd.f32 %v799_v8, %v659_v29  ;;  %v855_v8 = vsel %vm812_vm3, %v853_v14, %v854_v55 }
  0xf7   : > { %v622_v31 = vpop.f32.mrf.mxu0 }
  0xf8   : > { %7003 = vst [vmem:[#allocation52_spill] sm:$0xff] %v5304_v61  ;;  %v5306_v60 = vadd.f32 %v762_v5, %v622_v31  ;;  %v764_v46 = vpop.f32.mrf.mxu1  ;;  %v857_v5 = vsel %vm812_vm3, %v854_v55, %v856_v59 }
  0xf9   : > { %v5322_v27 = vpack.c.bf16 %v857_v5, %v855_v8  ;;  %v7010_v8 = vunpack.c.l.bf16 %v4699_v28 }
  0xfa   : > { %4288 = vmatmul.msk.bf16.gmra.mxu0 %vm530_vm1, %v5123_v43  ;;  %4254 = vmatmul.msk.bf16.gmra.mxu2 %vm530_vm1, %v5270_v19 }
  0xfb   : > { %7008 = vst [vmem:[#allocation54_spill] sm:$0xff] %v5322_v27  ;;  %v858_v5 = vrot.slane %v7010_v8, 2 }
  0xfd   : > { %v662_v29 = vpop.f32.mrf.mxu2 }
  0xfe   : > { %v804_v31 = vpop.f32.mrf.mxu3  ;;  %v5320_v61 = vadd.f32 %v802_v36, %v662_v29 }
  0xff   : > { %v624_v16 = vpop.f32.mrf.mxu0 }
 0x100   : > { %7007 = vst [vmem:[#allocation53_spill] sm:$0xff] %v5320_v61  ;;  %v5324_v24 = vadd.f32 %v764_v46, %v624_v16  ;;  %v767_v17 = vpop.f32.mrf.mxu1  ;;  %v7011_v46 = vunpack.c.h.bf16 %v4699_v28  ;;  %v7012_v16 = vunpack.c.l.bf16 %v4718_v35 }
 0x102   : > { %v859_v29 = vrot.slane %v7011_v46, 2 }
 0x103   : > { %4272 = vmatmul.msk.bf16.gmra.mxu3 %vm530_vm1, %v4663_v10  ;;  %4306 = vmatmul.msk.bf16.gmra.mxu1 %vm530_vm1, %v5322_v27  ;;  %v861_v10 = vrot.slane %v7012_v16, 2 }
 0x105   : > { %v664_v6 = vpop.f32.mrf.mxu2 }
 0x106   : > { %v807_v14 = vpop.f32.mrf.mxu3  ;;  %v5330_v43 = vadd.f32 %v804_v31, %v664_v6  ;;  %v4366_v31 = vld [vmem:[%s6815_s3 + $0x2] sm:$0x3]  ;;  %v862_v6 = vsel %vm812_vm3, %v859_v29, %v861_v10 }
 0x107   : > { %v627_v59 = vpop.f32.mrf.mxu0 }
 0x108   : > { %7009 = vst [vmem:[#allocation55_spill] sm:$0xff] %v5330_v43  ;;  %v5332_v55 = vadd.f32 %v767_v17, %v627_v59  ;;  %v769_v36 = vpop.f32.mrf.mxu1  ;;  %v860_v17 = vsel %vm812_vm3, %v858_v5, %v859_v29  ;;  %v2233_v59 = vsel %vm579_vm0, %v4366_v31, 0 }
 0x109   : > { %2242 = vmatpush.bf16.msra.mxu1 %v2233_v59  ;;  %v5352_v43 = vpack.c.bf16 %v862_v6, %v860_v17  ;;  %v7016_v17 = vunpack.c.h.bf16 %v4772_v56  ;;  %v7017_v6 = vunpack.c.l.bf16 %v4775_v57 }
 0x10a   : > { %4289 = vmatmul.msk.bf16.gmra.mxu0 %vm530_vm1, %v4715_v34  ;;  %4255 = vmatmul.msk.bf16.gmra.mxu2 %vm530_vm1, %v5296_v41 }
 0x10d   : > { %v667_v8 = vpop.f32.mrf.mxu2 }
 0x10e   : > { %v809_v35 = vpop.f32.mrf.mxu3  ;;  %v5350_v46 = vadd.f32 %v807_v14, %v667_v8  ;;  %v7015_v14 = vunpack.c.l.bf16 %v4772_v56 }
 0x10f   : > { %v629_v16 = vpop.f32.mrf.mxu0 }
 0x110   : > { %7013 = vst [vmem:[#allocation56_spill] sm:$0xff] %v5350_v46  ;;  %v5354_v61 = vadd.f32 %v769_v36, %v629_v16  ;;  %v1410_v34 = vpop.f32.mrf.mxu1  ;;  %v863_v8 = vrot.slane %v7015_v14, 2  ;;  %v864_v36 = vrot.slane %v7016_v17, 2  ;;  %v866_v16 = vrot.slane %v7017_v6, 2 }
 0x113   : > { %4273 = vmatmul.msk.bf16.gmra.mxu3 %vm530_vm1, %v4699_v28  ;;  %4307 = vmatmul.msk.bf16.gmra.mxu1 %vm530_vm1, %v5352_v43 }
 0x115   : > { %v669_v5 = vpop.f32.mrf.mxu2 }
 0x116   : > { %v1133_v29 = vpop.f32.mrf.mxu3  ;;  %v5360_v10 = vadd.f32 %v809_v35, %v669_v5  ;;  %v865_v35 = vsel %vm812_vm3, %v863_v8, %v864_v36  ;;  %v867_v5 = vsel %vm812_vm3, %v864_v36, %v866_v16 }
 0x117   : > { %v1273_v31 = vpop.f32.mrf.mxu0  ;;  %v5375_v41 = vpack.c.bf16 %v867_v5, %v865_v35 }
 0x118   : > { %7014 = vst [vmem:[#allocation57_spill] sm:$0xff] %v5360_v10  ;;  %v1412_v59 = vpop.f32.mrf.mxu1 }
 0x11a   : > { %4290 = vmatmul.msk.bf16.gmra.mxu0 %vm530_vm1, %v4763_v53  ;;  %4256 = vmatmul.msk.bf16.gmra.mxu2 %vm530_vm1, %v5322_v27 }
 0x11d   : > { %v1003_v10 = vpop.f32.mrf.mxu2 }
 0x11e   : > { %v1135_v46 = vpop.f32.mrf.mxu3  ;;  %v1083_v14 = vadd.f32 %v1003_v10, %v5152_v18  ;;  %v7019_v10 = vunpack.c.l.bf16 %v4824_v22 }
 0x11f   : > { %v1275_v28 = vpop.f32.mrf.mxu0 }
 0x120   : > { %v1415_v17 = vpop.f32.mrf.mxu1  ;;  %v1213_v57 = vadd.f32 %v1133_v29, %v1083_v14  ;;  %v868_v35 = vrot.slane %v7019_v10, 2  ;;  %v7020_v29 = vunpack.c.h.bf16 %v4824_v22 }
 0x122   : > { %v1353_v6 = vadd.f32 %v1273_v31, %v1213_v57  ;;  %v869_v5 = vrot.slane %v7020_v29, 2 }
 0x123   : > { %4274 = vmatmul.msk.bf16.gmra.mxu3 %vm530_vm1, %v4772_v56  ;;  %4308 = vmatmul.msk.bf16.gmra.mxu1 %vm530_vm1, %v5375_v41  ;;  %v7021_v56 = vunpack.c.l.bf16 %v4833_v25 }
 0x124   : > { %v5381_v53 = vadd.f32 %v1410_v34, %v1353_v6 }
 0x125   : > { %v1005_v8 = vpop.f32.mrf.mxu2  ;;  %v871_v31 = vrot.slane %v7021_v56, 2 }
 0x126   : > { %7018 = vst [vmem:[#allocation58_spill] sm:$0xff] %v5381_v53  ;;  %v1138_v36 = vpop.f32.mrf.mxu3  ;;  %v1084_v16 = vadd.f32 %v1005_v8, %v5169_v11  ;;  %v870_v11 = vsel %vm812_vm3, %v868_v35, %v869_v5 }
 0x127   : > { %v1278_v27 = vpop.f32.mrf.mxu0  ;;  %v872_v57 = vsel %vm812_vm3, %v869_v5, %v871_v31 }
 0x128   : > { %v1417_v18 = vpop.f32.mrf.mxu1  ;;  %v1214_v14 = vadd.f32 %v1135_v46, %v1084_v16  ;;  %v5399_v56 = vpack.c.bf16 %v872_v57, %v870_v11  ;;  %v7024_v57 = vunpack.c.l.bf16 %v4891_v63 }
 0x12a   : > { %4291 = vmatmul.msk.bf16.gmra.mxu0 %vm530_vm1, %v4821_v21  ;;  %4257 = vmatmul.msk.bf16.gmra.mxu2 %vm530_vm1, %v5352_v43  ;;  %v1354_v34 = vadd.f32 %v1275_v28, %v1214_v14  ;;  %v7022_v14 = vunpack.c.l.bf16 %v4888_v47 }
 0x12c   : > { %v5396_v6 = vadd.f32 %v1412_v59, %v1354_v34  ;;  %v873_v34 = vrot.slane %v7022_v14, 2 }
 0x12d   : > { %v1008_v8 = vpop.f32.mrf.mxu2 }
 0x12e   : > { %v1140_v10 = vpop.f32.mrf.mxu3  ;;  %v1085_v29 = vadd.f32 %v1008_v8, %v5177_v12 }
 0x12f   : > { %v1280_v25 = vpop.f32.mrf.mxu0 }
 0x130   : > { %v1420_v46 = vpop.f32.mrf.mxu1  ;;  %v1215_v16 = vadd.f32 %v1138_v36, %v1085_v29  ;;  %v7023_v36 = vunpack.c.h.bf16 %v4888_v47 }
 0x132   : > { %v1355_v53 = vadd.f32 %v1278_v27, %v1215_v16  ;;  %v874_v11 = vrot.slane %v7023_v36, 2  ;;  %v876_v27 = vrot.slane %v7024_v57, 2 }
 0x133   : > { %4275 = vmatmul.msk.bf16.gmra.mxu3 %vm530_vm1, %v4824_v22  ;;  %4309 = vmatmul.msk.bf16.gmra.mxu1 %vm530_vm1, %v5399_v56 }
 0x134   : > { %v5405_v28 = vadd.f32 %v1415_v17, %v1355_v53  ;;  %v877_v17 = vsel %vm812_vm3, %v874_v11, %v876_v27 }
 0x135   : > { %v1010_v59 = vpop.f32.mrf.mxu2 }
 0x136   : > { %v1143_v35 = vpop.f32.mrf.mxu3  ;;  %v1086_v5 = vadd.f32 %v1010_v59, %v5194_v39  ;;  %v875_v39 = vsel %vm812_vm3, %v873_v34, %v874_v11 }
 0x137   : > { %v1283_v31 = vpop.f32.mrf.mxu0  ;;  %v5423_v36 = vpack.c.bf16 %v877_v17, %v875_v39 }
 0x138   : > { %v1422_v12 = vpop.f32.mrf.mxu1  ;;  %v1216_v8 = vadd.f32 %v1140_v10, %v1086_v5 }
 0x13a   : > { %4292 = vmatmul.msk.bf16.gmra.mxu0 %vm530_vm1, %v4879_v45  ;;  %4258 = vmatmul.msk.bf16.gmra.mxu2 %vm530_vm1, %v5375_v41  ;;  %v1356_v53 = vadd.f32 %v1280_v25, %v1216_v8  ;;  %v7025_v8 = vunpack.c.l.bf16 %v4940_v2 }
 0x13c   : > { %v5420_v29 = vadd.f32 %v1417_v18, %v1356_v53  ;;  %v878_v53 = vrot.slane %v7025_v8, 2 }
 0x13d   : > { %v1013_v16 = vpop.f32.mrf.mxu2 }
 0x13e   : > { %v1145_v59 = vpop.f32.mrf.mxu3  ;;  %v1087_v14 = vadd.f32 %v1013_v16, %v5202_v54 }
 0x13f   : > { %v1285_v63 = vpop.f32.mrf.mxu0 }
 0x140   : > { %v1425_v10 = vpop.f32.mrf.mxu1  ;;  %v1217_v5 = vadd.f32 %v1143_v35, %v1087_v14  ;;  %v7026_v35 = vunpack.c.h.bf16 %v4940_v2 }
 0x142   : > { %v1357_v57 = vadd.f32 %v1283_v31, %v1217_v5  ;;  %v879_v39 = vrot.slane %v7026_v35, 2 }
 0x143   : > { %4276 = vmatmul.msk.bf16.gmra.mxu3 %vm530_vm1, %v4888_v47  ;;  %4310 = vmatmul.msk.bf16.gmra.mxu1 %vm530_vm1, %v5423_v36  ;;  %v7027_v47 = vunpack.c.l.bf16 %v4949_v42 }
 0x144   : > { %v5429_v25 = vadd.f32 %v1420_v46, %v1357_v57 }
 0x145   : > { %v1015_v18 = vpop.f32.mrf.mxu2  ;;  %v881_v31 = vrot.slane %v7027_v47, 2 }
 0x146   : > { %v1148_v34 = vpop.f32.mrf.mxu3  ;;  %v1088_v11 = vadd.f32 %v1015_v18, %v5220_v30  ;;  %v880_v30 = vsel %vm812_vm3, %v878_v53, %v879_v39 }
 0x147   : > { %v1288_v27 = vpop.f32.mrf.mxu0  ;;  %v882_v16 = vsel %vm812_vm3, %v879_v39, %v881_v31  ;;  %v7029_v31 = vunpack.c.l.bf16 %v5004_v15 }
 0x148   : > { %v1427_v54 = vpop.f32.mrf.mxu1  ;;  %v1218_v17 = vadd.f32 %v1145_v59, %v1088_v11  ;;  %v5447_v8 = vpack.c.bf16 %v882_v16, %v880_v30 }
 0x14a   : > { %4293 = vmatmul.msk.bf16.gmra.mxu0 %vm530_vm1, %v4937_v37  ;;  %4259 = vmatmul.msk.bf16.gmra.mxu2 %vm530_vm1, %v5399_v56  ;;  %v1358_v46 = vadd.f32 %v1285_v63, %v1218_v17  ;;  %v883_v17 = vrot.slane %v7029_v31, 2 }
 0x14c   : > { %v5444_v14 = vadd.f32 %v1422_v12, %v1358_v46 }
 0x14d   : > { %v1018_v5 = vpop.f32.mrf.mxu2 }
 0x14e   : > { %v1150_v57 = vpop.f32.mrf.mxu3  ;;  %v1089_v18 = vadd.f32 %v1018_v5, %v5228_v3 }
 0x14f   : > { %v1290_v42 = vpop.f32.mrf.mxu0 }
 0x150   : > { %v1430_v59 = vpop.f32.mrf.mxu1  ;;  %v1219_v11 = vadd.f32 %v1148_v34, %v1089_v18  ;;  %v7030_v34 = vunpack.c.h.bf16 %v5004_v15 }
 0x152   : > { %v1359_v35 = vadd.f32 %v1288_v27, %v1219_v11  ;;  %v884_v46 = vrot.slane %v7030_v34, 2  ;;  %v7031_v27 = vunpack.c.l.bf16 %v5007_v38 }
 0x153   : > { %4277 = vmatmul.msk.bf16.gmra.mxu3 %vm530_vm1, %v4940_v2  ;;  %4311 = vmatmul.msk.bf16.gmra.mxu1 %vm530_vm1, %v5447_v8 }
 0x154   : > { %v5453_v63 = vadd.f32 %v1425_v10, %v1359_v35  ;;  %v886_v30 = vrot.slane %v7031_v27, 2  ;;  %v885_v10 = vsel %vm812_vm3, %v883_v17, %v884_v46 }
 0x155   : > { %v1020_v12 = vpop.f32.mrf.mxu2 }
 0x156   : > { %v1153_v53 = vpop.f32.mrf.mxu3  ;;  %v1090_v39 = vadd.f32 %v1020_v12, %v5246_v51  ;;  %v887_v5 = vsel %vm812_vm3, %v884_v46, %v886_v30  ;;  %v7033_v30 = vunpack.c.l.bf16 %v5056_v40 }
 0x157   : > { %v1293_v47 = vpop.f32.mrf.mxu0  ;;  %v5473_v31 = vpack.c.bf16 %v887_v5, %v885_v10 }
 0x158   : > { %v5456_v3 = vpop.f32.mrf.mxu1  ;;  %v1220_v16 = vadd.f32 %v1150_v57, %v1090_v39 }
 0x159   : > { %7028 = vst [vmem:[#allocation59_spill] sm:$0xff] %v5456_v3 }
 0x15a   : > { %4294 = vmatmul.msk.bf16.gmra.mxu0 %vm530_vm1, %v4995_v58  ;;  %4260 = vmatmul.msk.bf16.gmra.mxu2 %vm530_vm1, %v5423_v36  ;;  %v1360_v51 = vadd.f32 %v1290_v42, %v1220_v16  ;;  %v888_v16 = vrot.slane %v7033_v30, 2  ;;  %v5504_v30 = vld [vmem:[%s4660_s8 + $0xc0] sm:$0xff]  }
 0x15c   : > { %v5470_v18 = vadd.f32 %v1427_v54, %v1360_v51 }
 0x15d   : > { %v1023_v11 = vpop.f32.mrf.mxu2 }
 0x15e   : > { %v1155_v35 = vpop.f32.mrf.mxu3  ;;  %v1091_v12 = vadd.f32 %v1023_v11, %v5254_v26 }
 0x15f   : > { %v1295_v38 = vpop.f32.mrf.mxu0 }
 0x160   : > { %v1435_v57 = vpop.f32.mrf.mxu1  ;;  %v1221_v39 = vadd.f32 %v1153_v53, %v1091_v12  ;;  %v7034_v53 = vunpack.c.h.bf16 %v5056_v40 }
 0x162   : > { %v1361_v34 = vadd.f32 %v1293_v47, %v1221_v39  ;;  %v889_v51 = vrot.slane %v7034_v53, 2 }
 0x163   : > { %4278 = vmatmul.msk.bf16.gmra.mxu3 %vm530_vm1, %v5004_v15  ;;  %4312 = vmatmul.msk.bf16.gmra.mxu1 %vm530_vm1, %v5473_v31  ;;  %v7035_v15 = vunpack.c.l.bf16 %v5065_v50 }
 0x164   : > { %v5479_v42 = vadd.f32 %v1430_v59, %v1361_v34  ;;  %v890_v59 = vsel %vm812_vm3, %v888_v16, %v889_v51 }
 0x165   : > { %v1025_v54 = vpop.f32.mrf.mxu2  ;;  %v891_v47 = vrot.slane %v7035_v15, 2  ;;  %v4556_v15 = vunpack.c.h.bf16 %v5504_v30 }
 0x166   : > { %v1158_v17 = vpop.f32.mrf.mxu3  ;;  %v1092_v46 = vadd.f32 %v1025_v54, %v5272_v32 }
 0x167   : > { %v1298_v27 = vpop.f32.mrf.mxu0  ;;  %v892_v5 = vsel %vm812_vm3, %v889_v51, %v891_v47 }
 0x168   : > { %v5482_v26 = vpop.f32.mrf.mxu1  ;;  %v1222_v10 = vadd.f32 %v1155_v35, %v1092_v46  ;;  %v5499_v34 = vpack.c.bf16 %v892_v5, %v890_v59 }
 0x169   : > { %7032 = vst [vmem:[#allocation60_spill] sm:$0xff] %v5482_v26 }
 0x16a   : > { %4295 = vmatmul.msk.bf16.gmra.mxu0 %vm530_vm1, %v5053_v62  ;;  %4261 = vmatmul.msk.bf16.gmra.mxu2 %vm530_vm1, %v5447_v8  ;;  %v5494_v32 = vadd.f32 %v1295_v38, %v1222_v10  ;;  %v276_v38 = vld [vmem:[%s4660_s8 + $0xc8] sm:$0x1] }
 0x16b   : > { %v330_v47 = vunpack.c.l.bf16 %v276_v38 }
 0x16d   : > { %v1028_v11 = vpop.f32.mrf.mxu2 }
 0x16e   : > { %v1160_v12 = vpop.f32.mrf.mxu3  ;;  %v1093_v50 = vadd.f32 %v1028_v11, %v5280_v7  ;;  %v4555_v7 = vunpack.c.l.bf16 %v5504_v30  ;;  %v1388_v11 = vrot.slane %v330_v47, 2 }
 0x16f   : > { %v1300_v39 = vpop.f32.mrf.mxu0 }
 0x170   : > { %v1440_v35 = vpop.f32.mrf.mxu1  ;;  %v1223_v54 = vadd.f32 %v1158_v17, %v1093_v50  ;;  %v1385_v59 = vrot.slane %v4555_v7, 2 }
 0x172   : > { %v1363_v46 = vadd.f32 %v1298_v27, %v1223_v54  ;;  %v1386_v27 = vrot.slane %v4556_v15, 2 }
 0x173   : > { %4279 = vmatmul.msk.bf16.gmra.mxu3 %vm530_vm1, %v5056_v40  ;;  %4313 = vmatmul.msk.bf16.gmra.mxu1 %vm530_vm1, %v5499_v34 }
 0x174   : > { %v5509_v16 = vadd.f32 %v1435_v57, %v1363_v46  ;;  %v1387_v54 = vsel %vm812_vm3, %v1385_v59, %v1386_v27  ;;  %v1389_v46 = vsel %vm812_vm3, %v1386_v27, %v1388_v11 }
 0x175   : > { %v1030_v53 = vpop.f32.mrf.mxu2 }
 0x176   : > { %7036 = vst [vmem:[#allocation61_spill] sm:$0xff] %v5509_v16  ;;  %v1163_v51 = vpop.f32.mrf.mxu3  ;;  %v1094_v17 = vadd.f32 %v1030_v53, %v5298_v33  ;;  %v1248_v53 = vrot.slane %v4555_v7, 1  ;;  %v1249_v16 = vrot.slane %v4556_v15, 1 }
 0x177   : > { %v1303_v10 = vpop.f32.mrf.mxu0 }
 0x178   : > { %v5514_v5 = vpop.f32.mrf.mxu1  ;;  %v1224_v50 = vadd.f32 %v1160_v12, %v1094_v17  ;;  %v1251_v12 = vrot.slane %v330_v47, 1  ;;  %v5525_v17 = vpack.c.bf16 %v1389_v46, %v1387_v54  ;;  %v5530_v59 = vsel %vm399_vm2, %v1248_v53, %v1249_v16 }
 0x179   : > { %7037 = vst [vmem:[#allocation62_spill] sm:$0xff] %v5514_v5 }
 0x17a   : > { %4296 = vmatmul.msk.bf16.gmra.mxu0 %vm530_vm1, %v5127_v13  ;;  %4262 = vmatmul.msk.bf16.gmra.mxu2 %vm530_vm1, %v5473_v31  ;;  %v5520_v57 = vadd.f32 %v1300_v39, %v1224_v50  ;;  %7038 = vst [vmem:[#allocation63_spill] sm:$0xff] %v5530_v59  ;;  %v5533_v27 = vsel %vm399_vm2, %v1249_v16, %v1251_v12 }
 0x17b   : > { %7039 = vst [vmem:[#allocation64_spill] sm:$0xff] %v5533_v27 }
 0x17d   : > { %v1033_v33 = vpop.f32.mrf.mxu2 }
 0x17e   : > { %v1165_v38 = vpop.f32.mrf.mxu3  ;;  %v1095_v26 = vadd.f32 %v1033_v33, %v5306_v60 }
 0x17f   : > { %v1305_v5 = vpop.f32.mrf.mxu0 }
 0x180   : > { %v1445_v40 = vpop.f32.mrf.mxu1  ;;  %v1225_v3 = vadd.f32 %v1163_v51, %v1095_v26  ;;  %v5541_v26 = vpack.c.bf16 %v5533_v27, %v5530_v59  ;;  %v4581_v59 = vld [vmem:[%s4660_s8 + $0x48] sm:$0xff]  }
 0x182   : > { %v1365_v39 = vadd.f32 %v1303_v10, %v1225_v3 }
 0x183   : > { %4280 = vmatmul.msk.bf16.gmra.mxu3 %vm530_vm1, %v5504_v30  ;;  %4314 = vmatmul.msk.bf16.gmra.mxu1 %vm530_vm1, %v5525_v17 }
 0x184   : > { %v5537_v60 = vadd.f32 %v1440_v35, %v1365_v39 }
 0x185   : > { %v1035_v7 = vpop.f32.mrf.mxu2 }
 0x186   : > { %v1168_v15 = vpop.f32.mrf.mxu3  ;;  %v1096_v51 = vadd.f32 %v1035_v7, %v5324_v24 }
 0x187   : > { %v1308_v3 = vpop.f32.mrf.mxu0 }
 0x188   : > { %v5544_v47 = vpop.f32.mrf.mxu1  ;;  %v1226_v10 = vadd.f32 %v1165_v38, %v1096_v51 }
 0x18a   : > { %4297 = vmatmul.msk.bf16.gmra.mxu0 %vm530_vm1, %v5541_v26  ;;  %4263 = vmatmul.msk.bf16.gmra.mxu2 %vm530_vm1, %v5499_v34  ;;  %v5550_v35 = vadd.f32 %v1305_v5, %v1226_v10 }
 0x18d   : > { %v1038_v16 = vpop.f32.mrf.mxu2 }
 0x18e   : > { %v1170_v11 = vpop.f32.mrf.mxu3  ;;  %v1097_v50 = vadd.f32 %v1038_v16, %v5332_v55  ;;  %v4579_v55 = vld [vmem:[%s4660_s8 + $0x18] sm:$0xff]  }
 0x18f   : > { %v1310_v54 = vpop.f32.mrf.mxu0 }
 0x190   : > { %v1450_v46 = vpop.f32.mrf.mxu1  ;;  %v1227_v24 = vadd.f32 %v1168_v15, %v1097_v50 }
 0x192   : > { %v1367_v33 = vadd.f32 %v1308_v3, %v1227_v24 }
 0x193   : > { %4333 = vmatmul.msk.bf16.vlgmr.msra.gmra.mxu3 %vm530_vm1, %v4817_v20 }
 0x194   : > { %v5555_v38 = vadd.f32 %v1445_v40, %v1367_v33 }
 0x195   : > { %v1040_v53 = vpop.f32.mrf.mxu2 }
 0x196   : > { %v1173_v12 = vpop.f32.mrf.mxu3  ;;  %v1098_v39 = vadd.f32 %v1040_v53, %v5354_v61 }
 0x197   : > { %v1313_v5 = vpop.f32.mrf.mxu0 }
 0x198   : > { %v5558_v7 = vpop.f32.mrf.mxu1  ;;  %v1228_v51 = vadd.f32 %v1170_v11, %v1098_v39 }
 0x19a   : > { %4350 = vmatmul.msk.bf16.vlgmr.msra.gmra.mxu0 %vm530_vm1, %v5167_v1  ;;  %4316 = vmatmul.msk.bf16.vlgmr.msra.gmra.mxu2 %vm530_vm1, %v4579_v55  ;;  %v5564_v15 = vadd.f32 %v1310_v54, %v1228_v51 }
 0x19d   : > { %v1043_v3 = vpop.f32.mrf.mxu2 }
 0x19e   : > { %v1175_v20 = vpop.f32.mrf.mxu3  ;;  %v1099_v40 = vadd.f32 %v1043_v3, %v5165_v9  ;;  %v7040_v3 = vld [vmem:[#allocation24_spill] sm:$0xff] }
 0x19f   : > { %v1315_v10 = vpop.f32.mrf.mxu0 }
 0x1a0   : > { %v1455_v16 = vpop.f32.mrf.mxu1  ;;  %v1229_v50 = vadd.f32 %v1173_v12, %v1099_v40 }
 0x1a2   : > { %v1369_v61 = vadd.f32 %v1313_v5, %v1229_v50  ;;  %v7041_v50 = vld [vmem:[#allocation43_spill] sm:$0xff] }
 0x1a3   : > { %4334 = vmatmul.msk.bf16.gmra.mxu3 %vm530_vm1, %v4875_v44 }
 0x1a4   : > { %v5569_v11 = vadd.f32 %v1450_v46, %v1369_v61 }
 0x1a5   : > { %v1045_v24 = vpop.f32.mrf.mxu2 }
 0x1a6   : > { %v1178_v1 = vpop.f32.mrf.mxu3  ;;  %v1100_v33 = vadd.f32 %v1045_v24, %v5175_v0 }
 0x1a7   : > { %v1318_v53 = vpop.f32.mrf.mxu0 }
 0x1a8   : > { %v5572_v54 = vpop.f32.mrf.mxu1  ;;  %v1230_v39 = vadd.f32 %v1175_v20, %v1100_v33 }
 0x1aa   : > { %4351 = vmatmul.msk.bf16.gmra.mxu0 %vm530_vm1, %v5192_v4  ;;  %4317 = vmatmul.msk.bf16.gmra.mxu2 %vm530_vm1, %v4827_v23  ;;  %v5578_v9 = vadd.f32 %v1315_v10, %v1230_v39 }
 0x1ad   : > { %v1048_v12 = vpop.f32.mrf.mxu2 }
 0x1ae   : > { %v1180_v44 = vpop.f32.mrf.mxu3  ;;  %v1101_v46 = vadd.f32 %v1048_v12, %v5190_v52  ;;  %v4580_v52 = vld [vmem:[%s4660_s8 + $0x30] sm:$0xff]  }
 0x1af   : > { %v1320_v5 = vpop.f32.mrf.mxu0 }
 0x1b0   : > { %v1460_v51 = vpop.f32.mrf.mxu1  ;;  %v1231_v0 = vadd.f32 %v1178_v1, %v1101_v46 }
 0x1b2   : > { %v1371_v55 = vadd.f32 %v1318_v53, %v1231_v0 }
 0x1b3   : > { %4335 = vmatmul.msk.bf16.gmra.mxu3 %vm530_vm1, %v7040_v3  ;;  %v7043_v3 = vld [vmem:[#allocation30_spill] sm:$0xff] }
 0x1b4   : > { %v5583_v20 = vadd.f32 %v1455_v16, %v1371_v55  ;;  %v7042_v16 = vld [vmem:[#allocation44_spill] sm:$0xff] }
 0x1b5   : > { %v1050_v4 = vpop.f32.mrf.mxu2 }
 0x1b6   : > { %v1183_v40 = vpop.f32.mrf.mxu3  ;;  %v1102_v23 = vadd.f32 %v1050_v4, %v7041_v50  ;;  %v7044_v50 = vld [vmem:[#allocation45_spill] sm:$0xff] }
 0x1b7   : > { %v1323_v10 = vpop.f32.mrf.mxu0 }
 0x1b8   : > { %v5586_v61 = vpop.f32.mrf.mxu1  ;;  %v1232_v24 = vadd.f32 %v1180_v44, %v1102_v23 }
 0x1ba   : > { %4352 = vmatmul.msk.bf16.gmra.mxu0 %vm530_vm1, %v5218_v48  ;;  %4318 = vmatmul.msk.bf16.gmra.mxu2 %vm530_vm1, %v4580_v52  ;;  %v5592_v1 = vadd.f32 %v1320_v5, %v1232_v24  ;;  %v7045_v24 = vld [vmem:[#allocation25_spill] sm:$0xff] }
 0x1bd   : > { %v1053_v33 = vpop.f32.mrf.mxu2 }
 0x1be   : > { %v1185_v53 = vpop.f32.mrf.mxu3  ;;  %v1103_v39 = vadd.f32 %v1053_v33, %v7042_v16  ;;  %v7047_v16 = vld [vmem:[#allocation46_spill] sm:$0xff] }
 0x1bf   : > { %v1325_v12 = vpop.f32.mrf.mxu0 }
 0x1c0   : > { %v1233_v46 = vadd.f32 %v1183_v40, %v1103_v39  ;;  %v1465_v0 = vpop.f32.mrf.mxu1 }
 0x1c2   : > { %v1373_v55 = vadd.f32 %v1323_v10, %v1233_v46 }
 0x1c3   : > { %4336 = vmatmul.msk.bf16.gmra.mxu3 %vm530_vm1, %v7043_v3 }
 0x1c4   : > { %v5597_v44 = vadd.f32 %v1460_v51, %v1373_v55 }
 0x1c5   : > { %v1055_v4 = vpop.f32.mrf.mxu2 }
 0x1c6   : > { %v1188_v48 = vpop.f32.mrf.mxu3  ;;  %v1104_v23 = vadd.f32 %v1055_v4, %v7044_v50  ;;  %v7048_v4 = vld [vmem:[#allocation35_spill] sm:$0xff] }
 0x1c7   : > { %v1328_v52 = vpop.f32.mrf.mxu0 }
 0x1c8   : > { %v1234_v5 = vadd.f32 %v1185_v53, %v1104_v23  ;;  %v5606_v10 = vpop.f32.mrf.mxu1 }
 0x1c9   : > { %7046 = vst [vmem:[#allocation24_spill] sm:$0xff] %v5606_v10 }
 0x1ca   : > { %4353 = vmatmul.msk.bf16.gmra.mxu0 %vm530_vm1, %v5244_v49  ;;  %4319 = vmatmul.msk.bf16.gmra.mxu2 %vm530_vm1, %v7045_v24  ;;  %v5604_v40 = vadd.f32 %v1325_v12, %v1234_v5  ;;  %v7049_v12 = vld [vmem:[#allocation47_spill] sm:$0xff] }
 0x1cd   : > { %v1058_v33 = vpop.f32.mrf.mxu2 }
 0x1ce   : > { %v1190_v51 = vpop.f32.mrf.mxu3  ;;  %v1105_v39 = vadd.f32 %v1058_v33, %v7047_v16  ;;  %v7051_v16 = vld [vmem:[#allocation48_spill] sm:$0xff] }
 0x1cf   : > { %v1330_v46 = vpop.f32.mrf.mxu0 }
 0x1d0   : > { %v1235_v55 = vadd.f32 %v1188_v48, %v1105_v39  ;;  %v1470_v49 = vpop.f32.mrf.mxu1 }
 0x1d2   : > { %v1375_v3 = vadd.f32 %v1328_v52, %v1235_v55 }
 0x1d3   : > { %4337 = vmatmul.msk.bf16.gmra.mxu3 %vm530_vm1, %v7048_v4 }
 0x1d4   : > { %v5611_v53 = vadd.f32 %v1465_v0, %v1375_v3 }
 0x1d5   : > { %v1060_v50 = vpop.f32.mrf.mxu2 }
 0x1d6   : > { %v1193_v23 = vpop.f32.mrf.mxu3  ;;  %v1106_v5 = vadd.f32 %v1060_v50, %v7049_v12  ;;  %v7053_v50 = vld [vmem:[#allocation42_spill] sm:$0xff] }
 0x1d7   : > { %v1333_v24 = vpop.f32.mrf.mxu0 }
 0x1d8   : > { %v1236_v27 = vadd.f32 %v1190_v51, %v1106_v5  ;;  %v5621_v55 = vpop.f32.mrf.mxu1  ;;  %v7054_v5 = vld [vmem:[#allocation49_spill] sm:$0xff] }
 0x1d9   : > { %7052 = vst [vmem:[#allocation44_spill] sm:$0xff] %v5621_v55 }
 0x1da   : > { %4354 = vmatmul.msk.bf16.gmra.mxu0 %vm530_vm1, %v5270_v19  ;;  %4320 = vmatmul.msk.bf16.gmra.mxu2 %vm530_vm1, %v4581_v59  ;;  %v5618_v48 = vadd.f32 %v1330_v46, %v1236_v27 }
 0x1dc   : > { %7050 = vst [vmem:[#allocation43_spill] sm:$0xff] %v5618_v48  ;;  %v7055_v48 = vld [vmem:[#allocation51_spill] sm:$0xff] }
 0x1dd   : > { %v1063_v52 = vpop.f32.mrf.mxu2 }
 0x1de   : > { %v1195_v33 = vpop.f32.mrf.mxu3  ;;  %v1107_v0 = vadd.f32 %v1063_v52, %v7051_v16  ;;  %v7056_v52 = vld [vmem:[#allocation37_spill] sm:$0xff] }
 0x1df   : > { %v1335_v39 = vpop.f32.mrf.mxu0 }
 0x1e0   : > { %v1237_v3 = vadd.f32 %v1193_v23, %v1107_v0  ;;  %v1475_v10 = vpop.f32.mrf.mxu1  ;;  %v7058_v0 = vld [vmem:[#allocation50_spill] sm:$0xff] }
 0x1e2   : > { %v1377_v4 = vadd.f32 %v1333_v24, %v1237_v3 }
 0x1e3   : > { %4338 = vmatmul.msk.bf16.gmra.mxu3 %vm530_vm1, %v7053_v50 }
 0x1e4   : > { %v5625_v51 = vadd.f32 %v1470_v49, %v1377_v4 }
 0x1e5   : > { %v1065_v19 = vpop.f32.mrf.mxu2 }
 0x1e6   : > { %v1198_v12 = vpop.f32.mrf.mxu3  ;;  %v1108_v59 = vadd.f32 %v1065_v19, %v7054_v5  ;;  %v7059_v19 = vld [vmem:[#allocation6_spill] sm:$0xff] }
 0x1e7   : > { %v1338_v27 = vpop.f32.mrf.mxu0 }
 0x1e8   : > { %v1238_v46 = vadd.f32 %v1195_v33, %v1108_v59  ;;  %v5637_v33 = vpop.f32.mrf.mxu1 }
 0x1ea   : > { %4355 = vmatmul.msk.bf16.gmra.mxu0 %vm530_vm1, %v7055_v48  ;;  %4321 = vmatmul.msk.bf16.gmra.mxu2 %vm530_vm1, %v7056_v52  ;;  %v5632_v23 = vadd.f32 %v1335_v39, %v1238_v46  ;;  %v7060_v52 = vld [vmem:[#allocation52_spill] sm:$0xff] }
 0x1ec   : > { %7057 = vst [vmem:[#allocation30_spill] sm:$0xff] %v5632_v23  ;;  %v4595_v23 = vmov 0.0  }
 0x1ed   : > { %v1068_v24 = vpop.f32.mrf.mxu2  ;;  %2001 = vst.msk [vmem:[#allocation2 + $0x18] sm:$0xff] %vm530_vm1, %v4595_v23 }
 0x1ee   : > { %v1200_v16 = vpop.f32.mrf.mxu3  ;;  %v1109_v49 = vadd.f32 %v1068_v24, %v7058_v0  ;;  %v7061_v24 = vld [vmem:[#allocation54_spill] sm:$0xff]  ;;  %2002 = vst.msk [vmem:[#allocation2 + $0x20] sm:$0xff] %vm530_vm1, %v4595_v23 }
 0x1ef   : > { %v1340_v3 = vpop.f32.mrf.mxu0  ;;  %1997 = vst.msk [vmem:[#allocation2] sm:$0xff] %vm530_vm1, %v4595_v23 }
 0x1f0   : > { %v1239_v4 = vadd.f32 %v1198_v12, %v1109_v49  ;;  %v4582_v12 = vld [vmem:[%s4660_s8 + $0x60] sm:$0xff]   ;;  %1998 = vst.msk [vmem:[#allocation2 + $0x8] sm:$0xff] %vm530_vm1, %v4595_v23 }
 0x1f1   : > { %2004 = vst.msk [vmem:[#allocation2 + $0x30] sm:$0xff] %vm530_vm1, %v4595_v23  ;;  %v7062_v49 = vld [vmem:[#allocation53_spill] sm:$0xff] }
 0x1f2   : > { %v1379_v50 = vadd.f32 %v1338_v27, %v1239_v4  ;;  %v1480_v27 = vpop.f32.mrf.mxu1  ;;  %2005 = vst.msk [vmem:[#allocation2 + $0x38] sm:$0xff] %vm530_vm1, %v4595_v23 }
 0x1f3   : > { %4339 = vmatmul.msk.bf16.gmra.mxu3 %vm530_vm1, %v7059_v19  ;;  %2007 = vst.msk [vmem:[#allocation2 + $0x48] sm:$0xff] %vm530_vm1, %v4595_v23  ;;  %v7063_v19 = vld [vmem:[#allocation11_spill] sm:$0xff] }
 0x1f4   : > { %v5639_v5 = vadd.f32 %v1475_v10, %v1379_v50  ;;  %2008 = vst.msk [vmem:[#allocation2 + $0x50] sm:$0xff] %vm530_vm1, %v4595_v23 }
 0x1f5   : > { %v1070_v48 = vpop.f32.mrf.mxu2  ;;  %2010 = vst.msk [vmem:[#allocation2 + $0x60] sm:$0xff] %vm530_vm1, %v4595_v23 }
 0x1f6   : > { %v1203_v59 = vpop.f32.mrf.mxu3  ;;  %v1110_v39 = vadd.f32 %v1070_v48, %v7060_v52  ;;  %2011 = vst.msk [vmem:[#allocation2 + $0x68] sm:$0xff] %vm530_vm1, %v4595_v23 }
 0x1f7   : > { %v1343_v46 = vpop.f32.mrf.mxu0  ;;  %2013 = vst.msk [vmem:[#allocation2 + $0x78] sm:$0xff] %vm530_vm1, %v4595_v23 }
 0x1f8   : > { %v1240_v55 = vadd.f32 %v1200_v16, %v1110_v39  ;;  %2014 = vst.msk [vmem:[#allocation2 + $0x80] sm:$0xff] %vm530_vm1, %v4595_v23  ;;  %v7064_v39 = vld [vmem:[#allocation55_spill] sm:$0xff] }
 0x1f9   : > { %2016 = vst.msk [vmem:[#allocation2 + $0x90] sm:$0xff] %vm530_vm1, %v4595_v23 }
 0x1fa   : > { %4356 = vmatmul.msk.bf16.gmra.mxu0 %vm530_vm1, %v7061_v24  ;;  %4322 = vmatmul.msk.bf16.gmra.mxu2 %vm530_vm1, %v4582_v12  ;;  %v5650_v10 = vadd.f32 %v1340_v3, %v1240_v55  ;;  %2017 = vst.msk [vmem:[#allocation2 + $0x98] sm:$0xff] %vm530_vm1, %v4595_v23  ;;  %v5684_v12 = vpop.f32.mrf.mxu1 }
 0x1fb   : > { %2019 = vst.msk [vmem:[#allocation2 + $0xa8] sm:$0xff] %vm530_vm1, %v4595_v23 }
 0x1fc   : > { %2020 = vst.msk [vmem:[#allocation2 + $0xb0] sm:$0xff] %vm530_vm1, %v4595_v23 }
 0x1fd   : > { %v1073_v16 = vpop.f32.mrf.mxu2  ;;  %2022 = vst.msk [vmem:[#allocation2 + $0xc0] sm:$0xff] %vm530_vm1, %v4595_v23 }
 0x1fe   : > { %v1205_v0 = vpop.f32.mrf.mxu3  ;;  %v1111_v4 = vadd.f32 %v1073_v16, %v7062_v49  ;;  %v2133_v16 = vld [vmem:[%s6815_s3] sm:$0x3]  ;;  %v4399_v49 = vld [vmem:[%s6815_s3 + $0x4] sm:$0x3]  ;;  %2023 = vst.msk [vmem:[#allocation2 + $0xc8] sm:$0xff] %vm530_vm1, %v4595_v23 }
 0x1ff   : > { %v1345_v50 = vpop.f32.mrf.mxu0  ;;  %2025 = vst.msk [vmem:[#allocation2 + $0xd8] sm:$0xff] %vm530_vm1, %v4595_v23 }
 0x200   : > { %v1241_v55 = vadd.f32 %v1203_v59, %v1111_v4  ;;  %v2373_v4 = vsel %vm579_vm0, %v2133_v16, 0  ;;  %2026 = vst.msk [vmem:[#allocation2 + $0xe0] sm:$0xff] %vm530_vm1, %v4595_v23  ;;  %v4433_v16 = vld [vmem:[%s6815_s3 + $0x8] sm:$0x3] }
 0x201   : > { %2382 = vmatpush.bf16.msrb.mxu2 %v2373_v4  ;;  %2028 = vst.msk [vmem:[#allocation2 + $0xf0] sm:$0xff] %vm530_vm1, %v4595_v23 }
 0x202   : > { %v1381_v3 = vadd.f32 %v1343_v46, %v1241_v55  ;;  %v7065_v55 = vld [vmem:[#allocation3_spill] sm:$0xff]  ;;  %2029 = vst.msk [vmem:[#allocation2 + $0xf8] sm:$0xff] %vm530_vm1, %v4595_v23 }
 0x203   : > { %4340 = vmatmul.msk.bf16.gmra.mxu3 %vm530_vm1, %v7063_v19  ;;  %2031 = vst.msk [vmem:[#allocation2 + $0x108] sm:$0xff] %vm530_vm1, %v4595_v23 }
 0x204   : > { %v5675_v48 = vadd.f32 %v1480_v27, %v1381_v3  ;;  %2032 = vst.msk [vmem:[#allocation2 + $0x110] sm:$0xff] %vm530_vm1, %v4595_v23 }
 0x205   : > { %v1075_v59 = vpop.f32.mrf.mxu2  ;;  %2034 = vst.msk [vmem:[#allocation2 + $0x120] sm:$0xff] %vm530_vm1, %v4595_v23 }
 0x206   : > { %v1208_v52 = vpop.f32.mrf.mxu3  ;;  %v1112_v46 = vadd.f32 %v1075_v59, %v7064_v39  ;;  %v7066_v59 = vld [vmem:[#allocation56_spill] sm:$0xff]  ;;  %2035 = vst.msk [vmem:[#allocation2 + $0x128] sm:$0xff] %vm530_vm1, %v4595_v23 }
 0x207   : > { %v1348_v24 = vpop.f32.mrf.mxu0  ;;  %2037 = vst.msk [vmem:[#allocation2 + $0x138] sm:$0xff] %vm530_vm1, %v4595_v23 }
 0x208   : > { %v1242_v27 = vadd.f32 %v1205_v0, %v1112_v46  ;;  %v2563_v0 = vsel %vm579_vm0, %v4399_v49, 0  ;;  %v1485_v49 = vpop.f32.mrf.mxu1  ;;  %2038 = vst.msk [vmem:[#allocation2 + $0x140] sm:$0xff] %vm530_vm1, %v4595_v23 }
 0x209   : > { %2572 = vmatpush.bf16.msrb.mxu3 %v2563_v0  ;;  %v3007_v0 = vsel %vm579_vm0, %v4433_v16, 0  ;;  %2040 = vst.msk [vmem:[#allocation2 + $0x150] sm:$0xff] %vm530_vm1, %v4595_v23 }
 0x20a   : > { %4357 = vmatmul.msk.bf16.gmra.mxu0 %vm530_vm1, %v5352_v43  ;;  %4323 = vmatmul.msk.bf16.gmra.mxu2 %vm530_vm1, %v7065_v55  ;;  %v5704_v3 = vadd.f32 %v1345_v50, %v1242_v27  ;;  %v4416_v27 = vld [vmem:[%s6815_s3 + $0x6] sm:$0x3]  ;;  %2041 = vst.msk [vmem:[#allocation2 + $0x158] sm:$0xff] %vm530_vm1, %v4595_v23 }
 0x20b   : > { %v2785_v4 = vsel %vm579_vm0, %v4416_v27, 0  ;;  %3016 = vmatpush.bf16.msrb.mxu1 %v3007_v0  ;;  %2043 = vst.msk [vmem:[#allocation2 + $0x168] sm:$0xff] %vm530_vm1, %v4595_v23  ;;  %v4583_v27 = vld [vmem:[%s4660_s8 + $0x78] sm:$0xff]  }
 0x20c   : > { %2794 = vmatpush.bf16.msrb.mxu0 %v2785_v4  ;;  %2044 = vst.msk [vmem:[#allocation2 + $0x170] sm:$0xff] %vm530_vm1, %v4595_v23 }
 0x20d   : > { %v1078_v43 = vpop.f32.mrf.mxu2  ;;  %2046 = vst.msk [vmem:[#allocation2 + $0x180] sm:$0xff] %vm530_vm1, %v4595_v23 }
 0x20e   : > { %v1210_v19 = vpop.f32.mrf.mxu3  ;;  %v1113_v39 = vadd.f32 %v1078_v43, %v7066_v59  ;;  %2047 = vst.msk [vmem:[#allocation2 + $0x188] sm:$0xff] %vm530_vm1, %v4595_v23 }
 0x20f   : > { %v1350_v50 = vpop.f32.mrf.mxu0  ;;  %2049 = vst.msk [vmem:[#allocation2 + $0x198] sm:$0xff] %vm530_vm1, %v4595_v23 }
 0x210   : > { %v1243_v46 = vadd.f32 %v1208_v52, %v1113_v39  ;;  %2050 = vst.msk [vmem:[#allocation2 + $0x1a0] sm:$0xff] %vm530_vm1, %v4595_v23 }
 0x211   : > { %2000 = vst.msk [vmem:[#allocation2 + $0x10] sm:$0x3] %vm1999_vm4, %v4595_v23 }
 0x212   : > { %v1383_v52 = vadd.f32 %v1348_v24, %v1243_v46  ;;  %2003 = vst.msk [vmem:[#allocation2 + $0x28] sm:$0x3] %vm1999_vm4, %v4595_v23 }
 0x213   : > { %4341 = vmatmul.msk.bf16.gmra.mxu3 %vm530_vm1, %v4821_v21  ;;  %v7067_v21 = vld [vmem:[#allocation57_spill] sm:$0xff]  ;;  %2006 = vst.msk [vmem:[#allocation2 + $0x40] sm:$0x3] %vm1999_vm4, %v4595_v23 }
 0x214   : > { %v5737_v55 = vadd.f32 %v1485_v49, %v1383_v52  ;;  %v7068_v49 = vld [vmem:[#allocation58_spill] sm:$0xff]  ;;  %2009 = vst.msk [vmem:[#allocation2 + $0x58] sm:$0x3] %vm1999_vm4, %v4595_v23  ;;  %v5774_v52 = vld [vmem:[%s6814_s2] ss:$0 sm:$0xff] }
 0x215   : > { %v1080_v43 = vpop.f32.mrf.mxu2  ;;  %2012 = vst.msk [vmem:[#allocation2 + $0x70] sm:$0x3] %vm1999_vm4, %v4595_v23 }
 0x216   : > { %v1680_v59 = vpop.f32.mrf.mxu3  ;;  %v1114_v24 = vadd.f32 %v1080_v43, %v7067_v21  ;;  %v2134_v43 = vld [vmem:[#allocation2 + $0x1] sm:$0xff]  ;;  %2015 = vst.msk [vmem:[#allocation2 + $0x88] sm:$0x3] %vm1999_vm4, %v4595_v23 }
 0x217   : > { %v1817_v39 = vpop.f32.mrf.mxu0  ;;  %2018 = vst.msk [vmem:[#allocation2 + $0xa0] sm:$0x3] %vm1999_vm4, %v4595_v23 }
 0x218   : > { %v1244_v46 = vadd.f32 %v1210_v19, %v1114_v24  ;;  %2021 = vst.msk [vmem:[#allocation2 + $0xb8] sm:$0x3] %vm1999_vm4, %v4595_v23 }
 0x219   : > { %2024 = vst.msk [vmem:[#allocation2 + $0xd0] sm:$0x3] %vm1999_vm4, %v4595_v23 }
 0x21a   : > { %4358 = vmatmul.msk.bf16.gmra.mxu0 %vm530_vm1, %v5375_v41  ;;  %4324 = vmatmul.msk.bf16.gmra.mxu2 %vm530_vm1, %v4583_v27  ;;  %v5756_v16 = vadd.f32 %v1350_v50, %v1244_v46  ;;  %2027 = vst.msk [vmem:[#allocation2 + $0xe8] sm:$0x3] %vm1999_vm4, %v4595_v23 }
 0x21b   : > { %2030 = vst.msk [vmem:[#allocation2 + $0x100] sm:$0x3] %vm1999_vm4, %v4595_v23 }
 0x21c   : > { %2033 = vst.msk [vmem:[#allocation2 + $0x118] sm:$0x3] %vm1999_vm4, %v4595_v23 }
 0x21d   : > { %v1540_v19 = vpop.f32.mrf.mxu2  ;;  %2036 = vst.msk [vmem:[#allocation2 + $0x130] sm:$0x3] %vm1999_vm4, %v4595_v23 }
 0x21e   : > { %v1682_v41 = vpop.f32.mrf.mxu3  ;;  %v1620_v4 = vadd.f32 %v1540_v19, %v7068_v49  ;;  %2039 = vst.msk [vmem:[#allocation2 + $0x148] sm:$0x3] %vm1999_vm4, %v4595_v23 }
 0x21f   : > { %v1819_v0 = vpop.f32.mrf.mxu0  ;;  %2042 = vst.msk [vmem:[#allocation2 + $0x160] sm:$0x3] %vm1999_vm4, %v4595_v23 }
 0x220   : > { %v1760_v50 = vadd.f32 %v1680_v59, %v1620_v4  ;;  %v2135_v59 = vld [vmem:[#allocation2 + $0x9] sm:$0xff]  ;;  %2045 = vst.msk [vmem:[#allocation2 + $0x178] sm:$0x3] %vm1999_vm4, %v4595_v23 }
 0x221   : > { %v2166_v46 = vpack.c.bf16 %v2135_v59, %v2134_v43  ;;  %2048 = vst.msk [vmem:[#allocation2 + $0x190] sm:$0x3] %vm1999_vm4, %v4595_v23 }
 0x222   : > { %v1897_v21 = vadd.f32 %v1817_v39, %v1760_v50  ;;  %2051 = vst.msk [vmem:[#allocation2 + $0x1a8] sm:$0x3] %vm1999_vm4, %v4595_v23 }
 0x223   : > { %4342 = vmatmul.msk.bf16.gmra.mxu3 %vm530_vm1, %v4879_v45  ;;  %4367 = vmatmul.msk.bf16.vlgmr.msra.gmra.mxu1 %vm530_vm1, %v2166_v46 }
 0x224   : > { %v1933_v24 = vadd.f32 %v5774_v52, %v1897_v21 }
 0x225   : > { %v1542_v39 = vpop.f32.mrf.mxu2 }
 0x226   : > { %v1685_v27 = vpop.f32.mrf.mxu3  ;;  %v1965_v19 = vmax.f32 %v1933_v24, 0.0  ;;  %v1621_v45 = vadd.f32 %v1542_v39, %v5396_v6 }
 0x227   : > { %v1822_v49 = vpop.f32.mrf.mxu0 }
 0x228   : > { %2053 = vst.msk [vmem:[#allocation2 + $0x19] sm:$0xff] %vm530_vm1, %v1965_v19  ;;  %v1761_v4 = vadd.f32 %v1682_v41, %v1621_v45 }
 0x22a   : > { %4359 = vmatmul.msk.bf16.gmra.mxu0 %vm530_vm1, %v5399_v56  ;;  %v1898_v50 = vadd.f32 %v1819_v0, %v1761_v4  ;;  %4325 = vmatmul.msk.bf16.gmra.mxu2 %vm530_vm1, %v4824_v22 }
 0x22c   : > { %v1934_v6 = vadd.f32 %v5774_v52, %v1898_v50 }
 0x22d   : > { %v1545_v41 = vpop.f32.mrf.mxu2 }
 0x22e   : > { %v1687_v56 = vpop.f32.mrf.mxu3  ;;  %v1966_v0 = vmax.f32 %v1934_v6, 0.0  ;;  %v1622_v43 = vadd.f32 %v1545_v41, %v5405_v28 }
 0x22f   : > { %v1824_v22 = vpop.f32.mrf.mxu0  ;;  %v2136_v4 = vld [vmem:[#allocation2 + $0x19] sm:$0xff] }
 0x230   : > { %2054 = vst.msk [vmem:[#allocation2 + $0x21] sm:$0xff] %vm530_vm1, %v1966_v0  ;;  %v1762_v21 = vadd.f32 %v1685_v27, %v1622_v43 }
 0x232   : > { %v1899_v59 = vadd.f32 %v1822_v49, %v1762_v21 }
 0x233   : > { %4343 = vmatmul.msk.bf16.gmra.mxu3 %vm530_vm1, %v4937_v37  ;;  %v4584_v37 = vld [vmem:[%s4660_s8 + $0x90] sm:$0xff]  }
 0x234   : > { %v1935_v24 = vadd.f32 %v5774_v52, %v1899_v59 }
 0x235   : > { %v1547_v46 = vpop.f32.mrf.mxu2 }
 0x236   : > { %v1690_v39 = vpop.f32.mrf.mxu3  ;;  %v1967_v19 = vmax.f32 %v1935_v24, 0.0  ;;  %v1623_v45 = vadd.f32 %v1547_v46, %v5420_v29 }
 0x237   : > { %v1827_v23 = vpop.f32.mrf.mxu0  ;;  %v2137_v50 = vld [vmem:[#allocation2 + $0x21] sm:$0xff] }
 0x238   : > { %2055 = vst.msk [vmem:[#allocation2 + $0x31] sm:$0xff] %vm530_vm1, %v1967_v19  ;;  %v1763_v28 = vadd.f32 %v1687_v56, %v1623_v45  ;;  %v5822_v6 = vpack.c.bf16 %v2137_v50, %v2136_v4 }
 0x23a   : > { %4360 = vmatmul.msk.bf16.gmra.mxu0 %vm530_vm1, %v5423_v36  ;;  %v1900_v27 = vadd.f32 %v1824_v22, %v1763_v28  ;;  %4326 = vmatmul.msk.bf16.gmra.mxu2 %vm530_vm1, %v4584_v37 }
 0x23b   : > { %4368 = vmatmul.msk.bf16.gmra.mxu1 %vm530_vm1, %v5822_v6 }
 0x23c   : > { %v1936_v29 = vadd.f32 %v5774_v52, %v1900_v27 }
 0x23d   : > { %v1550_v49 = vpop.f32.mrf.mxu2 }
 0x23e   : > { %v1692_v41 = vpop.f32.mrf.mxu3  ;;  %v1968_v0 = vmax.f32 %v1936_v29, 0.0  ;;  %v1624_v43 = vadd.f32 %v1550_v49, %v5429_v25 }
 0x23f   : > { %v1829_v56 = vpop.f32.mrf.mxu0  ;;  %v2138_v4 = vld [vmem:[#allocation2 + $0x31] sm:$0xff] }
 0x240   : > { %2056 = vst.msk [vmem:[#allocation2 + $0x39] sm:$0xff] %vm530_vm1, %v1968_v0  ;;  %v1764_v21 = vadd.f32 %v1690_v39, %v1624_v43 }
 0x242   : > { %v1901_v59 = vadd.f32 %v1827_v23, %v1764_v21 }
 0x243   : > { %4344 = vmatmul.msk.bf16.gmra.mxu3 %vm530_vm1, %v4995_v58 }
 0x244   : > { %v1937_v36 = vadd.f32 %v5774_v52, %v1901_v59 }
 0x245   : > { %v1552_v22 = vpop.f32.mrf.mxu2 }
 0x246   : > { %v1695_v24 = vpop.f32.mrf.mxu3  ;;  %v1969_v46 = vmax.f32 %v1937_v36, 0.0  ;;  %v1625_v19 = vadd.f32 %v1552_v22, %v5444_v14 }
 0x247   : > { %v1832_v45 = vpop.f32.mrf.mxu0  ;;  %v2139_v50 = vld [vmem:[#allocation2 + $0x39] sm:$0xff] }
 0x248   : > { %2057 = vst.msk [vmem:[#allocation2 + $0x49] sm:$0xff] %vm530_vm1, %v1969_v46  ;;  %v1765_v25 = vadd.f32 %v1692_v41, %v1625_v19  ;;  %v5838_v28 = vpack.c.bf16 %v2139_v50, %v2138_v4 }
 0x24a   : > { %4361 = vmatmul.msk.bf16.gmra.mxu0 %vm530_vm1, %v5447_v8  ;;  %v1902_v39 = vadd.f32 %v1829_v56, %v1765_v25  ;;  %4327 = vmatmul.msk.bf16.gmra.mxu2 %vm530_vm1, %v4940_v2 }
 0x24b   : > { %4369 = vmatmul.msk.bf16.gmra.mxu1 %vm530_vm1, %v5838_v28 }
 0x24c   : > { %v1938_v58 = vadd.f32 %v5774_v52, %v1902_v39 }
 0x24d   : > { %v1555_v14 = vpop.f32.mrf.mxu2 }
 0x24e   : > { %v1697_v23 = vpop.f32.mrf.mxu3  ;;  %v1970_v27 = vmax.f32 %v1938_v58, 0.0  ;;  %v1626_v37 = vadd.f32 %v1555_v14, %v5453_v63 }
 0x24f   : > { %v1834_v29 = vpop.f32.mrf.mxu0  ;;  %v2140_v59 = vld [vmem:[#allocation2 + $0x49] sm:$0xff] }
 0x250   : > { %2058 = vst.msk [vmem:[#allocation2 + $0x51] sm:$0xff] %vm530_vm1, %v1970_v27  ;;  %v1766_v49 = vadd.f32 %v1695_v24, %v1626_v37 }
 0x252   : > { %v1903_v8 = vadd.f32 %v1832_v45, %v1766_v49 }
 0x253   : > { %4345 = vmatmul.msk.bf16.gmra.mxu3 %vm530_vm1, %v5053_v62  ;;  %v4585_v62 = vld [vmem:[%s4660_s8 + $0xa8] sm:$0xff]  }
 0x254   : > { %v1939_v2 = vadd.f32 %v5774_v52, %v1903_v8 }
 0x255   : > { %v1557_v41 = vpop.f32.mrf.mxu2 }
 0x256   : > { %v1700_v0 = vpop.f32.mrf.mxu3  ;;  %v1971_v43 = vmax.f32 %v1939_v2, 0.0  ;;  %v1627_v56 = vadd.f32 %v1557_v41, %v5470_v18 }
 0x257   : > { %v1837_v21 = vpop.f32.mrf.mxu0  ;;  %v2141_v36 = vld [vmem:[#allocation2 + $0x51] sm:$0xff] }
 0x258   : > { %2059 = vst.msk [vmem:[#allocation2 + $0x61] sm:$0xff] %vm530_vm1, %v1971_v43  ;;  %v1767_v63 = vadd.f32 %v1697_v23, %v1627_v56  ;;  %v5854_v22 = vpack.c.bf16 %v2141_v36, %v2140_v59  ;;  %v7071_v59 = vld [vmem:[#allocation61_spill] sm:$0xff] }
 0x25a   : > { %4362 = vmatmul.msk.bf16.gmra.mxu0 %vm530_vm1, %v5473_v31  ;;  %v1904_v24 = vadd.f32 %v1834_v29, %v1767_v63  ;;  %4328 = vmatmul.msk.bf16.gmra.mxu2 %vm530_vm1, %v4585_v62  ;;  %v7069_v31 = vld [vmem:[#allocation59_spill] sm:$0xff] }
 0x25b   : > { %4370 = vmatmul.msk.bf16.gmra.mxu1 %vm530_vm1, %v5854_v22  ;;  %v1499_v58 = vadd.f32 %v7069_v31, %v5494_v32  ;;  %v7070_v32 = vld [vmem:[#allocation36_spill] sm:$0xff]  ;;  %v279_v62 = vld [vmem:[%s4660_s8 + $0xd4] sm:$0x1] }
 0x25c   : > { %v1940_v18 = vadd.f32 %v5774_v52, %v1904_v24  ;;  %v277_v24 = vld [vmem:[%s4660_s8 + $0xcc] sm:$0xff]  }
 0x25d   : > { %v1560_v46 = vpop.f32.mrf.mxu2 }
 0x25e   : > { %v1702_v19 = vpop.f32.mrf.mxu3  ;;  %v1972_v45 = vmax.f32 %v1940_v18, 0.0  ;;  %v1628_v4 = vadd.f32 %v1560_v46, %v5479_v42 }
 0x25f   : > { %v1839_v50 = vpop.f32.mrf.mxu0  ;;  %v2142_v42 = vld [vmem:[#allocation2 + $0x61] sm:$0xff] }
 0x260   : > { %2060 = vst.msk [vmem:[#allocation2 + $0x69] sm:$0xff] %vm530_vm1, %v1972_v45  ;;  %v1768_v25 = vadd.f32 %v1700_v0, %v1628_v4  ;;  %v333_v45 = vunpack.c.l.bf16 %v279_v62  ;;  %v7072_v4 = vld [vmem:[#allocation60_spill] sm:$0xff] }
 0x262   : > { %v1905_v39 = vadd.f32 %v1837_v21, %v1768_v25 }
 0x263   : > { %4346 = vmatmul.msk.bf16.gmra.mxu3 %vm530_vm1, %v5127_v13 }
 0x264   : > { %v1941_v14 = vadd.f32 %v5774_v52, %v1905_v39 }
 0x265   : > { %v1562_v23 = vpop.f32.mrf.mxu2 }
 0x266   : > { %v1705_v27 = vpop.f32.mrf.mxu3  ;;  %v1973_v37 = vmax.f32 %v1941_v14, 0.0  ;;  %v1629_v29 = vadd.f32 %v1562_v23, %v1499_v58 }
 0x267   : > { %v1842_v49 = vpop.f32.mrf.mxu0  ;;  %v2143_v8 = vld [vmem:[#allocation2 + $0x69] sm:$0xff] }
 0x268   : > { %2061 = vst.msk [vmem:[#allocation2 + $0x79] sm:$0xff] %vm530_vm1, %v1973_v37  ;;  %v1769_v2 = vadd.f32 %v1702_v19, %v1629_v29  ;;  %v2170_v41 = vpack.c.bf16 %v2143_v8, %v2142_v42  ;;  %v332_v19 = vunpack.c.h.bf16 %v277_v24 }
 0x26a   : > { %4363 = vmatmul.msk.bf16.gmra.mxu0 %vm530_vm1, %v5499_v34  ;;  %v1906_v13 = vadd.f32 %v1839_v50, %v1769_v2  ;;  %4329 = vmatmul.msk.bf16.gmra.mxu2 %vm530_vm1, %v7070_v32  ;;  %v331_v34 = vunpack.c.l.bf16 %v277_v24  ;;  %v1501_v50 = vadd.f32 %v7072_v4, %v5520_v57  ;;  %v1656_v29 = vrot.slane %v332_v19, 1  ;;  %v7073_v4 = vld [vmem:[#allocation62_spill] sm:$0xff] }
 0x26b   : > { %4371 = vmatmul.msk.bf16.gmra.mxu1 %vm530_vm1, %v2170_v41 }
 0x26c   : > { %v1942_v0 = vadd.f32 %v5774_v52, %v1906_v13  ;;  %v1655_v58 = vrot.slane %v331_v34, 1 }
 0x26d   : > { %v1565_v43 = vpop.f32.mrf.mxu2 }
 0x26e   : > { %v1707_v56 = vpop.f32.mrf.mxu3  ;;  %v1974_v21 = vmax.f32 %v1942_v0, 0.0  ;;  %v1630_v36 = vadd.f32 %v1565_v43, %v7071_v59  ;;  %v1657_v2 = vsel %vm399_vm2, %v1655_v58, %v1656_v29 }
 0x26f   : > { %v1844_v63 = vpop.f32.mrf.mxu0  ;;  %v2144_v42 = vld [vmem:[#allocation2 + $0x79] sm:$0xff] }
 0x270   : > { %2062 = vst.msk [vmem:[#allocation2 + $0x81] sm:$0xff] %vm530_vm1, %v1974_v21  ;;  %v1770_v18 = vadd.f32 %v1705_v27, %v1630_v36  ;;  %v1658_v27 = vrot.slane %v333_v45, 1  ;;  %v1793_v36 = vrot.slane %v332_v19, 2 }
 0x272   : > { %v1907_v46 = vadd.f32 %v1842_v49, %v1770_v18  ;;  %v1659_v41 = vsel %vm399_vm2, %v1656_v29, %v1658_v27  ;;  %v2465_v27 = vld [vmem:[#allocation2 + $0xa] sm:$0xff] }
 0x273   : > { %4347 = vmatmul.msk.bf16.gmra.mxu3 %vm530_vm1, %v5541_v26  ;;  %v1662_v43 = vpack.c.bf16 %v1659_v41, %v1657_v2 }
 0x274   : > { %v1943_v25 = vadd.f32 %v5774_v52, %v1907_v46 }
 0x275   : > { %v1567_v39 = vpop.f32.mrf.mxu2 }
 0x276   : > { %v1710_v31 = vpop.f32.mrf.mxu3  ;;  %v1975_v14 = vmax.f32 %v1943_v25, 0.0  ;;  %v1631_v23 = vadd.f32 %v1567_v39, %v1501_v50  ;;  %v1503_v50 = vadd.f32 %v7073_v4, %v5550_v35  ;;  %v2464_v35 = vld [vmem:[#allocation2 + $0x2] sm:$0xff] }
 0x277   : > { %v1847_v37 = vpop.f32.mrf.mxu0  ;;  %v2145_v49 = vld [vmem:[#allocation2 + $0x81] sm:$0xff]  ;;  %v2496_v41 = vpack.c.bf16 %v2465_v27, %v2464_v35  ;;  %v1507_v27 = vadd.f32 %v5558_v7, %v5578_v9 }
 0x278   : > { %2063 = vst.msk [vmem:[#allocation2 + $0x91] sm:$0xff] %vm530_vm1, %v1975_v14  ;;  %v1771_v26 = vadd.f32 %v1707_v56, %v1631_v23  ;;  %v2171_v8 = vpack.c.bf16 %v2145_v49, %v2144_v42  ;;  %v1792_v56 = vrot.slane %v331_v34, 2 }
 0x27a   : > { %4364 = vmatmul.msk.bf16.gmra.mxu0 %vm530_vm1, %v5525_v17  ;;  %v1908_v57 = vadd.f32 %v1844_v63, %v1771_v26  ;;  %4330 = vmatmul.msk.bf16.gmra.mxu2 %vm530_vm1, %v5504_v30  ;;  %v1795_v63 = vrot.slane %v333_v45, 2  ;;  %v1794_v18 = vsel %vm812_vm3, %v1792_v56, %v1793_v36 }
 0x27b   : > { %4372 = vmatmul.msk.bf16.gmra.mxu1 %vm530_vm1, %v2171_v8 }
 0x27c   : > { %v1944_v13 = vadd.f32 %v5774_v52, %v1908_v57  ;;  %v1796_v46 = vsel %vm812_vm3, %v1793_v36, %v1795_v63 }
 0x27d   : > { %v1570_v32 = vpop.f32.mrf.mxu2  ;;  %v1799_v39 = vpack.c.bf16 %v1796_v46, %v1794_v18 }
 0x27e   : > { %v1712_v0 = vpop.f32.mrf.mxu3  ;;  %v1976_v21 = vmax.f32 %v1944_v13, 0.0  ;;  %v1632_v59 = vadd.f32 %v1570_v32, %v5537_v60 }
 0x27f   : > { %v1849_v17 = vpop.f32.mrf.mxu0  ;;  %v2146_v14 = vld [vmem:[#allocation2 + $0x91] sm:$0xff] }
 0x280   : > { %2064 = vst.msk [vmem:[#allocation2 + $0x99] sm:$0xff] %vm530_vm1, %v1976_v21  ;;  %v1772_v30 = vadd.f32 %v1710_v31, %v1632_v59  ;;  %v2687_v21 = vld [vmem:[#allocation2 + $0x20] sm:$0xff] }
 0x282   : > { %v1909_v62 = vadd.f32 %v1847_v37, %v1772_v30 }
 0x283   : > { %4348 = vmatmul.msk.bf16.gmra.mxu3 %vm530_vm1, %v1662_v43  ;;  %v1505_v43 = vadd.f32 %v5544_v47, %v5564_v15  ;;  %v5924_v15 = vpop.f32.mrf.mxu1 }
 0x284   : > { %v1945_v34 = vadd.f32 %v5774_v52, %v1909_v62  ;;  %v2686_v62 = vld [vmem:[#allocation2 + $0x18] sm:$0xff] }
 0x285   : > { %v1572_v25 = vpop.f32.mrf.mxu2  ;;  %v2718_v4 = vpack.c.bf16 %v2687_v21, %v2686_v62 }
 0x286   : > { %v1715_v60 = vpop.f32.mrf.mxu3  ;;  %v1977_v19 = vmax.f32 %v1945_v34, 0.0  ;;  %v1633_v45 = vadd.f32 %v1572_v25, %v1503_v50 }
 0x287   : > { %v1852_v58 = vpop.f32.mrf.mxu0  ;;  %v2147_v31 = vld [vmem:[#allocation2 + $0x99] sm:$0xff] }
 0x288   : > { %2065 = vst.msk [vmem:[#allocation2 + $0xa9] sm:$0xff] %vm530_vm1, %v1977_v19  ;;  %v1773_v23 = vadd.f32 %v1712_v0, %v1633_v45  ;;  %v5904_v37 = vpack.c.bf16 %v2147_v31, %v2146_v14  ;;  %v2086_v0 = vld [vmem:[#allocation2 + $0x8] sm:$0xff]  ;;  %v2466_v19 = vld [vmem:[#allocation2 + $0x1a] sm:$0xff] }
 0x289   : > { %v2467_v45 = vld [vmem:[#allocation2 + $0x22] sm:$0xff] }
 0x28a   : > { %4365 = vmatmul.msk.bf16.gmra.mxu0 %vm530_vm1, %v1799_v39  ;;  %v1910_v29 = vadd.f32 %v1849_v17, %v1773_v23  ;;  %4331 = vmatmul.msk.bf16.gmra.mxu2 %vm530_vm1, %v277_v24  ;;  %v2085_v24 = vld [vmem:[#allocation2] sm:$0xff] }
 0x28b   : > { %4373 = vmatmul.msk.bf16.gmra.mxu1 %vm530_vm1, %v5904_v37  ;;  %v2117_v30 = vpack.c.bf16 %v2086_v0, %v2085_v24 }
 0x28c   : > { %v1946_v42 = vadd.f32 %v5774_v52, %v1910_v29  ;;  %v5929_v29 = vpack.c.bf16 %v2467_v45, %v2466_v19 }
 0x28d   : > { %v1575_v49 = vpop.f32.mrf.mxu2 }
 0x28e   : > { %v1717_v26 = vpop.f32.mrf.mxu3  ;;  %v1978_v8 = vmax.f32 %v1946_v42, 0.0  ;;  %v1634_v57 = vadd.f32 %v1575_v49, %v5555_v38 }
 0x28f   : > { %v1854_v2 = vpop.f32.mrf.mxu0  ;;  %v2148_v18 = vld [vmem:[#allocation2 + $0xa9] sm:$0xff] }
 0x290   : > { %2066 = vst.msk [vmem:[#allocation2 + $0xb1] sm:$0xff] %vm530_vm1, %v1978_v8  ;;  %v1774_v13 = vadd.f32 %v1715_v60, %v1634_v57 }
 0x292   : > { %v1911_v32 = vadd.f32 %v1852_v58, %v1774_v13  ;;  %v2688_v13 = vld [vmem:[#allocation2 + $0x30] sm:$0xff] }
 0x293   : > { %4400 = vmatmul.msk.bf16.vlgmr.msrb.gmra.mxu3 %vm530_vm1, %v2496_v41 }
 0x294   : > { %v1947_v56 = vadd.f32 %v5774_v52, %v1911_v32 }
 0x295   : > { %v1577_v59 = vpop.f32.mrf.mxu2 }
 0x296   : > { %v1720_v17 = vpop.f32.mrf.mxu3  ;;  %v1979_v36 = vmax.f32 %v1947_v56, 0.0  ;;  %v1635_v38 = vadd.f32 %v1577_v59, %v1505_v43 }
 0x297   : > { %v1857_v63 = vpop.f32.mrf.mxu0  ;;  %v2149_v46 = vld [vmem:[#allocation2 + $0xb1] sm:$0xff] }
 0x298   : > { %2067 = vst.msk [vmem:[#allocation2 + $0xc1] sm:$0xff] %vm530_vm1, %v1979_v36  ;;  %v1775_v50 = vadd.f32 %v1717_v26, %v1635_v38  ;;  %v5918_v34 = vpack.c.bf16 %v2149_v46, %v2148_v18  ;;  %v2689_v26 = vld [vmem:[#allocation2 + $0x38] sm:$0xff] }
 0x299   : > { %v5938_v0 = vpack.c.bf16 %v2689_v26, %v2688_v13  ;;  %v2469_v36 = vld [vmem:[#allocation2 + $0x3a] sm:$0xff] }
 0x29a   : > { %4417 = vmatmul.msk.bf16.vlgmr.msrb.gmra.mxu0 %vm530_vm1, %v2718_v4  ;;  %v1912_v47 = vadd.f32 %v1854_v2, %v1775_v50  ;;  %4383 = vmatmul.msk.bf16.vlgmr.msrb.gmra.mxu2 %vm530_vm1, %v2117_v30 }
 0x29b   : > { %4374 = vmatmul.msk.bf16.gmra.mxu1 %vm530_vm1, %v5918_v34 }
 0x29c   : > { %v1948_v25 = vadd.f32 %v5774_v52, %v1912_v47 }
 0x29d   : > { %v1580_v60 = vpop.f32.mrf.mxu2 }
 0x29e   : > { %v1722_v39 = vpop.f32.mrf.mxu3  ;;  %v1980_v58 = vmax.f32 %v1948_v25, 0.0  ;;  %v1636_v14 = vadd.f32 %v1580_v60, %v5569_v11  ;;  %v2691_v25 = vld [vmem:[#allocation2 + $0x50] sm:$0xff] }
 0x29f   : > { %v1859_v31 = vpop.f32.mrf.mxu0  ;;  %v2150_v32 = vld [vmem:[#allocation2 + $0xc1] sm:$0xff] }
 0x2a0   : > { %2068 = vst.msk [vmem:[#allocation2 + $0xc9] sm:$0xff] %vm530_vm1, %v1980_v58  ;;  %v1776_v23 = vadd.f32 %v1720_v17, %v1636_v14  ;;  %v5936_v49 = vpop.f32.mrf.mxu1  ;;  %v2468_v17 = vld [vmem:[#allocation2 + $0x32] sm:$0xff]  ;;  %v2690_v58 = vld [vmem:[#allocation2 + $0x48] sm:$0xff] }
 0x2a1   : > { %v5953_v46 = vpack.c.bf16 %v2469_v36, %v2468_v17 }
 0x2a2   : > { %v1913_v35 = vadd.f32 %v1857_v63, %v1776_v23 }
 0x2a3   : > { %4401 = vmatmul.msk.bf16.gmra.mxu3 %vm530_vm1, %v5929_v29 }
 0x2a4   : > { %v1949_v42 = vadd.f32 %v5774_v52, %v1913_v35  ;;  %v5962_v35 = vpack.c.bf16 %v2691_v25, %v2690_v58 }
 0x2a5   : > { %v1582_v8 = vpop.f32.mrf.mxu2 }
 0x2a6   : > { %v1725_v11 = vpop.f32.mrf.mxu3  ;;  %v1981_v57 = vmax.f32 %v1949_v42, 0.0  ;;  %v1637_v2 = vadd.f32 %v1582_v8, %v1507_v27 }
 0x2a7   : > { %v1862_v41 = vpop.f32.mrf.mxu0  ;;  %v2151_v24 = vld [vmem:[#allocation2 + $0xc9] sm:$0xff] }
 0x2a8   : > { %2069 = vst.msk [vmem:[#allocation2 + $0xd9] sm:$0xff] %vm530_vm1, %v1981_v57  ;;  %v1777_v43 = vadd.f32 %v1722_v39, %v1637_v2  ;;  %v5941_v56 = vpack.c.bf16 %v2151_v24, %v2150_v32  ;;  %v5950_v62 = vpop.f32.mrf.mxu1  ;;  %v2471_v57 = vld [vmem:[#allocation2 + $0x52] sm:$0xff] }
 0x2aa   : > { %4418 = vmatmul.msk.bf16.gmra.mxu0 %vm530_vm1, %v5938_v0  ;;  %v1914_v7 = vadd.f32 %v1859_v31, %v1777_v43  ;;  %4384 = vmatmul.msk.bf16.gmra.mxu2 %vm530_vm1, %v2718_v4  ;;  %v1509_v4 = vadd.f32 %v5572_v54, %v5592_v1 }
 0x2ab   : > { %4375 = vmatmul.msk.bf16.gmra.mxu1 %vm530_vm1, %v5941_v56 }
 0x2ac   : > { %v1950_v9 = vadd.f32 %v5774_v52, %v1914_v7 }
 0x2ad   : > { %v1585_v21 = vpop.f32.mrf.mxu2 }
 0x2ae   : > { %v1727_v59 = vpop.f32.mrf.mxu3  ;;  %v1982_v38 = vmax.f32 %v1950_v9, 0.0  ;;  %v1638_v63 = vadd.f32 %v1585_v21, %v5583_v20  ;;  %v1511_v9 = vadd.f32 %v5586_v61, %v5604_v40 }
 0x2af   : > { %v1864_v30 = vpop.f32.mrf.mxu0  ;;  %v2152_v31 = vld [vmem:[#allocation2 + $0xd9] sm:$0xff] }
 0x2b0   : > { %2070 = vst.msk [vmem:[#allocation2 + $0xe1] sm:$0xff] %vm530_vm1, %v1982_v38  ;;  %v1778_v18 = vadd.f32 %v1725_v11, %v1638_v63  ;;  %v2470_v11 = vld [vmem:[#allocation2 + $0x4a] sm:$0xff] }
 0x2b1   : > { %v5978_v43 = vpack.c.bf16 %v2471_v57, %v2470_v11  ;;  %v7075_v11 = vld [vmem:[#allocation24_spill] sm:$0xff] }
 0x2b2   : > { %v1915_v50 = vadd.f32 %v1862_v41, %v1778_v18 }
 0x2b3   : > { %4402 = vmatmul.msk.bf16.gmra.mxu3 %vm530_vm1, %v5953_v46 }
 0x2b4   : > { %v1951_v47 = vadd.f32 %v5774_v52, %v1915_v50 }
 0x2b5   : > { %v1587_v60 = vpop.f32.mrf.mxu2 }
 0x2b6   : > { %v1730_v20 = vpop.f32.mrf.mxu3  ;;  %v1983_v39 = vmax.f32 %v1951_v47, 0.0  ;;  %v1639_v19 = vadd.f32 %v1587_v60, %v1509_v4 }
 0x2b7   : > { %v1867_v45 = vpop.f32.mrf.mxu0  ;;  %v2153_v23 = vld [vmem:[#allocation2 + $0xe1] sm:$0xff] }
 0x2b8   : > { %v5960_v14 = vpop.f32.mrf.mxu1  ;;  %2071 = vst.msk [vmem:[#allocation2 + $0xf1] sm:$0xff] %vm530_vm1, %v1983_v39  ;;  %v1779_v27 = vadd.f32 %v1727_v59, %v1639_v19  ;;  %v5965_v42 = vpack.c.bf16 %v2153_v23, %v2152_v31  ;;  %v2693_v59 = vld [vmem:[#allocation2 + $0x68] sm:$0xff] }
 0x2b9   : > { %v2472_v19 = vld [vmem:[#allocation2 + $0x62] sm:$0xff] }
 0x2ba   : > { %4419 = vmatmul.msk.bf16.gmra.mxu0 %vm530_vm1, %v5962_v35  ;;  %v1916_v54 = vadd.f32 %v1864_v30, %v1779_v27  ;;  %4385 = vmatmul.msk.bf16.gmra.mxu2 %vm530_vm1, %v5938_v0  ;;  %v2692_v30 = vld [vmem:[#allocation2 + $0x60] sm:$0xff] }
 0x2bb   : > { %4376 = vmatmul.msk.bf16.gmra.mxu1 %vm530_vm1, %v5965_v42  ;;  %v5987_v47 = vpack.c.bf16 %v2693_v59, %v2692_v30 }
 0x2bc   : > { %v1952_v1 = vadd.f32 %v5774_v52, %v1916_v54 }
 0x2bd   : > { %v1590_v26 = vpop.f32.mrf.mxu2 }
 0x2be   : > { %v1732_v8 = vpop.f32.mrf.mxu3  ;;  %v1984_v2 = vmax.f32 %v1952_v1, 0.0  ;;  %v1640_v41 = vadd.f32 %v1590_v26, %v5597_v44 }
 0x2bf   : > { %v1869_v13 = vpop.f32.mrf.mxu0  ;;  %v2154_v50 = vld [vmem:[#allocation2 + $0xf1] sm:$0xff] }
 0x2c0   : > { %v5975_v32 = vpop.f32.mrf.mxu1  ;;  %2072 = vst.msk [vmem:[#allocation2 + $0xf9] sm:$0xff] %vm530_vm1, %v1984_v2  ;;  %v1780_v24 = vadd.f32 %v1730_v20, %v1640_v41  ;;  %v2695_v41 = vld [vmem:[#allocation2 + $0x80] sm:$0xff] }
 0x2c2   : > { %v1917_v7 = vadd.f32 %v1867_v45, %v1780_v24  ;;  %v2473_v45 = vld [vmem:[#allocation2 + $0x6a] sm:$0xff] }
 0x2c3   : > { %4403 = vmatmul.msk.bf16.gmra.mxu3 %vm530_vm1, %v5978_v43  ;;  %v6003_v1 = vpack.c.bf16 %v2473_v45, %v2472_v19 }
 0x2c4   : > { %v1953_v21 = vadd.f32 %v5774_v52, %v1917_v7 }
 0x2c5   : > { %v1592_v17 = vpop.f32.mrf.mxu2 }
 0x2c6   : > { %v1735_v44 = vpop.f32.mrf.mxu3  ;;  %v1985_v36 = vmax.f32 %v1953_v21, 0.0  ;;  %v1641_v38 = vadd.f32 %v1592_v17, %v1511_v9  ;;  %v2694_v21 = vld [vmem:[#allocation2 + $0x78] sm:$0xff] }
 0x2c7   : > { %v1872_v63 = vpop.f32.mrf.mxu0  ;;  %v2155_v4 = vld [vmem:[#allocation2 + $0xf9] sm:$0xff] }
 0x2c8   : > { %v5985_v18 = vpop.f32.mrf.mxu1  ;;  %2073 = vst.msk [vmem:[#allocation2 + $0x109] sm:$0xff] %vm530_vm1, %v1985_v36  ;;  %v1781_v25 = vadd.f32 %v1732_v8, %v1641_v38  ;;  %v5990_v60 = vpack.c.bf16 %v2155_v4, %v2154_v50  ;;  %v7074_v8 = vld [vmem:[#allocation43_spill] sm:$0xff]  ;;  %v6012_v36 = vpack.c.bf16 %v2695_v41, %v2694_v21 }
 0x2c9   : > { %v1513_v57 = vadd.f32 %v7075_v11, %v7074_v8 }
 0x2ca   : > { %4420 = vmatmul.msk.bf16.gmra.mxu0 %vm530_vm1, %v5987_v47  ;;  %v1918_v61 = vadd.f32 %v1869_v13, %v1781_v25  ;;  %4386 = vmatmul.msk.bf16.gmra.mxu2 %vm530_vm1, %v5962_v35 }
 0x2cb   : > { %4377 = vmatmul.msk.bf16.gmra.mxu1 %vm530_vm1, %v5990_v60 }
 0x2cc   : > { %v1954_v40 = vadd.f32 %v5774_v52, %v1918_v61  ;;  %v2474_v61 = vld [vmem:[#allocation2 + $0x7a] sm:$0xff] }
 0x2cd   : > { %v1595_v20 = vpop.f32.mrf.mxu2 }
 0x2ce   : > { %v1737_v39 = vpop.f32.mrf.mxu3  ;;  %v1986_v58 = vmax.f32 %v1954_v40, 0.0  ;;  %v1642_v31 = vadd.f32 %v1595_v20, %v5611_v53  ;;  %v2475_v40 = vld [vmem:[#allocation2 + $0x82] sm:$0xff] }
 0x2cf   : > { %v1874_v23 = vpop.f32.mrf.mxu0  ;;  %v2156_v17 = vld [vmem:[#allocation2 + $0x109] sm:$0xff] }
 0x2d0   : > { %v6000_v27 = vpop.f32.mrf.mxu1  ;;  %2074 = vst.msk [vmem:[#allocation2 + $0x111] sm:$0xff] %vm530_vm1, %v1986_v58  ;;  %v1782_v54 = vadd.f32 %v1735_v44, %v1642_v31  ;;  %v6028_v31 = vpack.c.bf16 %v2475_v40, %v2474_v61  ;;  %v2476_v40 = vld [vmem:[#allocation2 + $0x92] sm:$0xff] }
 0x2d2   : > { %v1919_v26 = vadd.f32 %v1872_v63, %v1782_v54  ;;  %v7076_v54 = vld [vmem:[#allocation30_spill] sm:$0xff] }
 0x2d3   : > { %4404 = vmatmul.msk.bf16.gmra.mxu3 %vm530_vm1, %v6003_v1 }
 0x2d4   : > { %v1955_v2 = vadd.f32 %v5774_v52, %v1919_v26  ;;  %v7077_v26 = vld [vmem:[#allocation44_spill] sm:$0xff] }
 0x2d5   : > { %v1597_v13 = vpop.f32.mrf.mxu2  ;;  %v1515_v8 = vadd.f32 %v7077_v26, %v7076_v54 }
 0x2d6   : > { %v1740_v53 = vpop.f32.mrf.mxu3  ;;  %v1987_v24 = vmax.f32 %v1955_v2, 0.0  ;;  %v1643_v7 = vadd.f32 %v1597_v13, %v1513_v57  ;;  %v2697_v57 = vld [vmem:[#allocation2 + $0x98] sm:$0xff] }
 0x2d7   : > { %v1877_v9 = vpop.f32.mrf.mxu0  ;;  %v2157_v44 = vld [vmem:[#allocation2 + $0x111] sm:$0xff] }
 0x2d8   : > { %v6010_v59 = vpop.f32.mrf.mxu1  ;;  %2075 = vst.msk [vmem:[#allocation2 + $0x121] sm:$0xff] %vm530_vm1, %v1987_v24  ;;  %v1783_v38 = vadd.f32 %v1737_v39, %v1643_v7  ;;  %v6015_v63 = vpack.c.bf16 %v2157_v44, %v2156_v17  ;;  %v2696_v7 = vld [vmem:[#allocation2 + $0x90] sm:$0xff] }
 0x2da   : > { %4421 = vmatmul.msk.bf16.gmra.mxu0 %vm530_vm1, %v6012_v36  ;;  %v1920_v30 = vadd.f32 %v1874_v23, %v1783_v38  ;;  %4387 = vmatmul.msk.bf16.gmra.mxu2 %vm530_vm1, %v5987_v47 }
 0x2db   : > { %4378 = vmatmul.msk.bf16.gmra.mxu1 %vm530_vm1, %v6015_v63 }
 0x2dc   : > { %v1956_v50 = vadd.f32 %v5774_v52, %v1920_v30 }
 0x2dd   : > { %v1600_v4 = vpop.f32.mrf.mxu2 }
 0x2de   : > { %v1742_v25 = vpop.f32.mrf.mxu3  ;;  %v1988_v20 = vmax.f32 %v1956_v50, 0.0  ;;  %v1644_v39 = vadd.f32 %v1600_v4, %v5625_v51 }
 0x2df   : > { %v1879_v19 = vpop.f32.mrf.mxu0 }
 0x2e0   : > { %v6025_v45 = vpop.f32.mrf.mxu1  ;;  %2076 = vst.msk [vmem:[#allocation2 + $0x129] sm:$0xff] %vm530_vm1, %v1988_v20  ;;  %v1784_v58 = vadd.f32 %v1740_v53, %v1644_v39  ;;  %v2158_v53 = vld [vmem:[#allocation2 + $0x121] sm:$0xff] }
 0x2e1   : > { %v2477_v20 = vld [vmem:[#allocation2 + $0x9a] sm:$0xff] }
 0x2e2   : > { %v1921_v23 = vadd.f32 %v1877_v9, %v1784_v58  ;;  %v6037_v9 = vpack.c.bf16 %v2697_v57, %v2696_v7  ;;  %v6053_v54 = vpack.c.bf16 %v2477_v20, %v2476_v40  ;;  %v2699_v57 = vld [vmem:[#allocation2 + $0xb0] sm:$0xff] }
 0x2e3   : > { %4405 = vmatmul.msk.bf16.gmra.mxu3 %vm530_vm1, %v6028_v31  ;;  %v2478_v20 = vld [vmem:[#allocation2 + $0xaa] sm:$0xff] }
 0x2e4   : > { %v1957_v11 = vadd.f32 %v5774_v52, %v1921_v23  ;;  %7078 = vst [vmem:[#allocation45_spill] sm:$0xff] %v6053_v54 }
 0x2e5   : > { %v1602_v2 = vpop.f32.mrf.mxu2 }
 0x2e6   : > { %v1745_v51 = vpop.f32.mrf.mxu3  ;;  %v1989_v41 = vmax.f32 %v1957_v11, 0.0  ;;  %v1645_v13 = vadd.f32 %v1602_v2, %v1515_v8  ;;  %v1517_v8 = vadd.f32 %v5637_v33, %v5650_v10 }
 0x2e7   : > { %v1882_v24 = vpop.f32.mrf.mxu0  ;;  %v2159_v17 = vld [vmem:[#allocation2 + $0x129] sm:$0xff] }
 0x2e8   : > { %v6035_v21 = vpop.f32.mrf.mxu1  ;;  %2077 = vst.msk [vmem:[#allocation2 + $0x139] sm:$0xff] %vm530_vm1, %v1989_v41  ;;  %v1785_v44 = vadd.f32 %v1742_v25, %v1645_v13  ;;  %v6040_v38 = vpack.c.bf16 %v2159_v17, %v2158_v53  ;;  %v2698_v53 = vld [vmem:[#allocation2 + $0xa8] sm:$0xff] }
 0x2ea   : > { %4422 = vmatmul.msk.bf16.gmra.mxu0 %vm530_vm1, %v6037_v9  ;;  %v1922_v30 = vadd.f32 %v1879_v19, %v1785_v44  ;;  %4388 = vmatmul.msk.bf16.gmra.mxu2 %vm530_vm1, %v6012_v36 }
 0x2eb   : > { %4379 = vmatmul.msk.bf16.gmra.mxu1 %vm530_vm1, %v6040_v38 }
 0x2ec   : > { %v1958_v50 = vadd.f32 %v5774_v52, %v1922_v30 }
 0x2ed   : > { %v1605_v4 = vpop.f32.mrf.mxu2 }
 0x2ee   : > { %v1747_v61 = vpop.f32.mrf.mxu3  ;;  %v1990_v39 = vmax.f32 %v1958_v50, 0.0  ;;  %v1646_v25 = vadd.f32 %v1605_v4, %v5639_v5 }
 0x2ef   : > { %v1884_v58 = vpop.f32.mrf.mxu0 }
 0x2f0   : > { %v6050_v23 = vpop.f32.mrf.mxu1  ;;  %2078 = vst.msk [vmem:[#allocation2 + $0x141] sm:$0xff] %vm530_vm1, %v1990_v39  ;;  %v1786_v19 = vadd.f32 %v1745_v51, %v1646_v25  ;;  %v2160_v51 = vld [vmem:[#allocation2 + $0x139] sm:$0xff] }
 0x2f1   : > { %v2479_v39 = vld [vmem:[#allocation2 + $0xb2] sm:$0xff] }
 0x2f2   : > { %v1923_v26 = vadd.f32 %v1882_v24, %v1786_v19  ;;  %v6062_v24 = vpack.c.bf16 %v2699_v57, %v2698_v53  ;;  %v4467_v57 = vld [vmem:[%s6815_s3 + $0xc] sm:$0x3] }
 0x2f3   : > { %4406 = vmatmul.msk.bf16.gmra.mxu3 %vm530_vm1, %v6053_v54  ;;  %v2701_v53 = vld [vmem:[#allocation2 + $0xc8] sm:$0xff] }
 0x2f4   : > { %v1959_v11 = vadd.f32 %v5774_v52, %v1923_v26 }
 0x2f5   : > { %v1607_v2 = vpop.f32.mrf.mxu2 }
 0x2f6   : > { %v1750_v5 = vpop.f32.mrf.mxu3  ;;  %v1991_v41 = vmax.f32 %v1959_v11, 0.0  ;;  %v1647_v13 = vadd.f32 %v1607_v2, %v1517_v8  ;;  %v6078_v8 = vpack.c.bf16 %v2479_v39, %v2478_v20  ;;  %v4450_v11 = vld [vmem:[%s6815_s3 + $0xa] sm:$0x3] }
 0x2f7   : > { %v1887_v7 = vpop.f32.mrf.mxu0  ;;  %v2161_v44 = vld [vmem:[#allocation2 + $0x141] sm:$0xff]  ;;  %v3229_v2 = vsel %vm579_vm0, %v4450_v11, 0 }
 0x2f8   : > { %v6060_v17 = vpop.f32.mrf.mxu1  ;;  %2079 = vst.msk [vmem:[#allocation2 + $0x151] sm:$0xff] %vm530_vm1, %v1991_v41  ;;  %v1787_v30 = vadd.f32 %v1747_v61, %v1647_v13  ;;  %v6065_v50 = vpack.c.bf16 %v2161_v44, %v2160_v51  ;;  %3238 = vmatpush.bf16.msra.mxu2 %v3229_v2 }
 0x2f9   : > { %7080 = vst [vmem:[#allocation46_spill] sm:$0xff] %v6078_v8 }
 0x2fa   : > { %7079 = vst [vmem:[#allocation25_spill] sm:$0xff] %v6065_v50  ;;  %4423 = vmatmul.msk.bf16.gmra.mxu0 %vm530_vm1, %v6062_v24  ;;  %v1924_v33 = vadd.f32 %v1884_v58, %v1787_v30  ;;  %4389 = vmatmul.msk.bf16.gmra.mxu2 %vm530_vm1, %v6037_v9 }
 0x2fb   : > { %4380 = vmatmul.msk.bf16.gmra.mxu1 %vm530_vm1, %v6065_v50 }
 0x2fc   : > { %v1960_v10 = vadd.f32 %v5774_v52, %v1924_v33 }
 0x2fd   : > { %v1610_v4 = vpop.f32.mrf.mxu2 }
 0x2fe   : > { %v1752_v40 = vpop.f32.mrf.mxu3  ;;  %v1992_v25 = vmax.f32 %v1960_v10, 0.0  ;;  %v1648_v61 = vadd.f32 %v1610_v4, %v5675_v48  ;;  %v3452_v48 = vsel %vm579_vm0, %v4467_v57, 0  ;;  %v2700_v4 = vld [vmem:[#allocation2 + $0xc0] sm:$0xff] }
 0x2ff   : > { %v1889_v19 = vpop.f32.mrf.mxu0  ;;  %3461 = vmatpush.bf16.msra.mxu3 %v3452_v48 }
 0x300   : > { %v6075_v26 = vpop.f32.mrf.mxu1  ;;  %2080 = vst.msk [vmem:[#allocation2 + $0x159] sm:$0xff] %vm530_vm1, %v1992_v25  ;;  %v1788_v58 = vadd.f32 %v1750_v5, %v1648_v61  ;;  %v1519_v5 = vadd.f32 %v5684_v12, %v5704_v3  ;;  %v6095_v25 = vpack.c.bf16 %v2701_v53, %v2700_v4  ;;  %v4484_v12 = vld [vmem:[%s6815_s3 + $0xe] sm:$0x3] }
 0x301   : > { %v3674_v3 = vsel %vm579_vm0, %v4484_v12, 0  ;;  %v2703_v12 = vld [vmem:[#allocation2 + $0xe0] sm:$0xff] }
 0x302   : > { %v1925_v41 = vadd.f32 %v1887_v7, %v1788_v58  ;;  %v2162_v7 = vld [vmem:[#allocation2 + $0x151] sm:$0xff]  ;;  %7081 = vst [vmem:[#allocation35_spill] sm:$0xff] %v6095_v25  ;;  %3683 = vmatpush.bf16.msra.mxu0 %v3674_v3 }
 0x303   : > { %4407 = vmatmul.msk.bf16.gmra.mxu3 %vm530_vm1, %v6078_v8 }
 0x304   : > { %v1961_v13 = vadd.f32 %v5774_v52, %v1925_v41 }
 0x305   : > { %v1612_v51 = vpop.f32.mrf.mxu2 }
 0x306   : > { %v1755_v44 = vpop.f32.mrf.mxu3  ;;  %v1993_v30 = vmax.f32 %v1961_v13, 0.0  ;;  %v1649_v33 = vadd.f32 %v1612_v51, %v1519_v5  ;;  %v2480_v5 = vld [vmem:[#allocation2 + $0xc2] sm:$0xff] }
 0x307   : > { %v1892_v10 = vpop.f32.mrf.mxu0  ;;  %v2163_v39 = vld [vmem:[#allocation2 + $0x159] sm:$0xff] }
 0x308   : > { %v6093_v20 = vpop.f32.mrf.mxu1  ;;  %2081 = vst.msk [vmem:[#allocation2 + $0x169] sm:$0xff] %vm530_vm1, %v1993_v30  ;;  %v1789_v61 = vadd.f32 %v1752_v40, %v1649_v33  ;;  %v6098_v58 = vpack.c.bf16 %v2163_v39, %v2162_v7  ;;  %v4501_v40 = vld [vmem:[%s6815_s3 + $0x10] sm:$0x3]  ;;  %v1521_v39 = vadd.f32 %v5924_v15, %v5756_v16 }
 0x309   : > { %v3896_v57 = vsel %vm579_vm0, %v4501_v40, 0 }
 0x30a   : > { %7082 = vst [vmem:[#allocation47_spill] sm:$0xff] %v6098_v58  ;;  %4424 = vmatmul.msk.bf16.gmra.mxu0 %vm530_vm1, %v6095_v25  ;;  %v1926_v11 = vadd.f32 %v1889_v19, %v1789_v61  ;;  %4390 = vmatmul.msk.bf16.gmra.mxu2 %vm530_vm1, %v6062_v24  ;;  %v2481_v19 = vld [vmem:[#allocation2 + $0xca] sm:$0xff] }
 0x30b   : > { %4381 = vmatmul.msk.bf16.gmra.mxu1 %vm530_vm1, %v6098_v58  ;;  %v6119_v4 = vpack.c.bf16 %v2481_v19, %v2480_v5 }
 0x30c   : > { %v1962_v2 = vadd.f32 %v5774_v52, %v1926_v11  ;;  %3905 = vmatpush.bf16.msra.mxu1 %v3896_v57 }
 0x30d   : > { %v1615_v48 = vpop.f32.mrf.mxu2  ;;  %7083 = vst [vmem:[#allocation48_spill] sm:$0xff] %v6119_v4 }
 0x30e   : > { %v1757_v41 = vpop.f32.mrf.mxu3  ;;  %v1994_v13 = vmax.f32 %v1962_v2, 0.0  ;;  %v1650_v53 = vadd.f32 %v1615_v48, %v5737_v55  ;;  %v2702_v2 = vld [vmem:[#allocation2 + $0xd8] sm:$0xff] }
 0x30f   : > { %v1894_v51 = vpop.f32.mrf.mxu0  ;;  %v2714_v54 = vld [vmem:[#allocation2 + $0x168] sm:$0xff] }
 0x310   : > { %v6116_v30 = vpop.f32.mrf.mxu1  ;;  %2082 = vst.msk [vmem:[#allocation2 + $0x171] sm:$0xff] %vm530_vm1, %v1994_v13  ;;  %v1790_v33 = vadd.f32 %v1755_v44, %v1650_v53  ;;  %v2164_v44 = vld [vmem:[#allocation2 + $0x169] sm:$0xff] }
 0x312   : > { %v1927_v7 = vadd.f32 %v1892_v10, %v1790_v33  ;;  %v6128_v10 = vpack.c.bf16 %v2703_v12, %v2702_v2  ;;  %v2705_v2 = vld [vmem:[#allocation2 + $0xf8] sm:$0xff] }
 0x313   : > { %4408 = vmatmul.msk.bf16.gmra.mxu3 %vm530_vm1, %v6119_v4 }
 0x314   : > { %v1963_v61 = vadd.f32 %v5774_v52, %v1927_v7  ;;  %7084 = vst [vmem:[#allocation42_spill] sm:$0xff] %v6128_v10  ;;  %v4586_v52 = vld [vmem:[%s6814_s2] ss:$0 sm:$0xff]  ;;  %v2483_v7 = vld [vmem:[#allocation2 + $0xe2] sm:$0xff] }
 0x315   : > { %v1617_v3 = vpop.f32.mrf.mxu2 }
 0x316   : > { %v2574_v55 = vpop.f32.mrf.mxu3  ;;  %v1995_v11 = vmax.f32 %v1963_v61, 0.0  ;;  %v1651_v40 = vadd.f32 %v1617_v3, %v1521_v39 }
 0x317   : > { %v2796_v57 = vpop.f32.mrf.mxu0  ;;  %v2165_v5 = vld [vmem:[#allocation2 + $0x171] sm:$0xff] }
 0x318   : > { %v6126_v48 = vpop.f32.mrf.mxu1  ;;  %2083 = vst.msk [vmem:[#allocation2 + $0x181] sm:$0xff] %vm530_vm1, %v1995_v11  ;;  %v1791_v19 = vadd.f32 %v1757_v41, %v1651_v40  ;;  %v6131_v13 = vpack.c.bf16 %v2165_v5, %v2164_v44  ;;  %v2482_v41 = vld [vmem:[#allocation2 + $0xda] sm:$0xff] }
 0x319   : > { %v6146_v11 = vpack.c.bf16 %v2483_v7, %v2482_v41  ;;  %v2484_v41 = vld [vmem:[#allocation2 + $0xf2] sm:$0xff]  ;;  %v2485_v7 = vld [vmem:[#allocation2 + $0xfa] sm:$0xff] }
 0x31a   : > { %7085 = vst [vmem:[#allocation49_spill] sm:$0xff] %v6131_v13  ;;  %4425 = vmatmul.msk.bf16.gmra.mxu0 %vm530_vm1, %v6128_v10  ;;  %v1928_v16 = vadd.f32 %v1894_v51, %v1791_v19  ;;  %4391 = vmatmul.msk.bf16.gmra.mxu2 %vm530_vm1, %v6095_v25  ;;  %v2712_v25 = vld [vmem:[#allocation2 + $0x150] sm:$0xff] }
 0x31b   : > { %4382 = vmatmul.msk.bf16.gmra.mxu1 %vm530_vm1, %v6131_v13  ;;  %7086 = vst [vmem:[#allocation51_spill] sm:$0xff] %v6146_v11 }
 0x31c   : > { %v1964_v15 = vadd.f32 %v4586_v52, %v1928_v16 }
 0x31d   : > { %v2384_v53 = vpop.f32.mrf.mxu2 }
 0x31e   : > { %v2576_v33 = vpop.f32.mrf.mxu3  ;;  %v1996_v39 = vmax.f32 %v1964_v15, 0.0  ;;  %v2385_v61 = vadd.f32 %v2384_v53, %v5936_v49  ;;  %v2704_v49 = vld [vmem:[#allocation2 + $0xf0] sm:$0xff] }
 0x31f   : > { %v2798_v12 = vpop.f32.mrf.mxu0  ;;  %v6155_v15 = vpack.c.bf16 %v2705_v2, %v2704_v49  ;;  %v6168_v2 = vpack.c.bf16 %v2485_v7, %v2484_v41  ;;  %v2486_v41 = vld [vmem:[#allocation2 + $0x10a] sm:$0xff]  ;;  %v2487_v7 = vld [vmem:[#allocation2 + $0x112] sm:$0xff] }
 0x320   : > { %v6143_v51 = vpop.f32.mrf.mxu1  ;;  %2084 = vst.msk [vmem:[#allocation2 + $0x189] sm:$0xff] %vm530_vm1, %v1996_v39  ;;  %v2654_v3 = vadd.f32 %v2574_v55, %v2385_v61 }
 0x321   : > { %7087 = vst [vmem:[#allocation37_spill] sm:$0xff] %v6155_v15 }
 0x322   : > { %v6150_v40 = vadd.f32 %v2796_v57, %v2654_v3  ;;  %7088 = vst [vmem:[#allocation50_spill] sm:$0xff] %v6168_v2 }
 0x323   : > { %4409 = vmatmul.msk.bf16.gmra.mxu3 %vm530_vm1, %v6146_v11  ;;  %v2706_v11 = vld [vmem:[#allocation2 + $0x108] sm:$0xff] }
 0x325   : > { %v2386_v44 = vpop.f32.mrf.mxu2 }
 0x326   : > { %v2579_v5 = vpop.f32.mrf.mxu3  ;;  %v2387_v19 = vadd.f32 %v2386_v44, %v5950_v62 }
 0x327   : > { %v2801_v16 = vpop.f32.mrf.mxu0 }
 0x328   : > { %v6153_v52 = vpop.f32.mrf.mxu1  ;;  %v2655_v53 = vadd.f32 %v2576_v33, %v2387_v19 }
 0x32a   : > { %4426 = vmatmul.msk.bf16.gmra.mxu0 %vm530_vm1, %v6155_v15  ;;  %4392 = vmatmul.msk.bf16.gmra.mxu2 %vm530_vm1, %v6128_v10  ;;  %v6163_v55 = vadd.f32 %v2798_v12, %v2655_v53  ;;  %v2710_v10 = vld [vmem:[#allocation2 + $0x138] sm:$0xff] }
 0x32b   : > { %4434 = vmatmul.msk.bf16.vlgmr.msrb.gmra.mxu1 %vm530_vm1, %v5822_v6  ;;  %v2707_v6 = vld [vmem:[#allocation2 + $0x110] sm:$0xff] }
 0x32d   : > { %v2389_v57 = vpop.f32.mrf.mxu2 }
 0x32e   : > { %v2581_v62 = vpop.f32.mrf.mxu3  ;;  %v2390_v39 = vadd.f32 %v2389_v57, %v5960_v14  ;;  %v6177_v14 = vpack.c.bf16 %v2707_v6, %v2706_v11  ;;  %v6190_v6 = vpack.c.bf16 %v2487_v7, %v2486_v41  ;;  %v2488_v41 = vld [vmem:[#allocation2 + $0x122] sm:$0xff]  ;;  %v2489_v7 = vld [vmem:[#allocation2 + $0x12a] sm:$0xff] }
 0x32f   : > { %v2803_v61 = vpop.f32.mrf.mxu0 }
 0x330   : > { %v6166_v3 = vpop.f32.mrf.mxu1  ;;  %v2656_v33 = vadd.f32 %v2579_v5, %v2390_v39  ;;  %7089 = vst [vmem:[#allocation6_spill] sm:$0xff] %v6177_v14 }
 0x331   : > { %7090 = vst [vmem:[#allocation52_spill] sm:$0xff] %v6190_v6 }
 0x332   : > { %v6172_v44 = vadd.f32 %v2801_v16, %v2656_v33 }
 0x333   : > { %4410 = vmatmul.msk.bf16.gmra.mxu3 %vm530_vm1, %v6168_v2 }
 0x335   : > { %v2391_v12 = vpop.f32.mrf.mxu2 }
 0x336   : > { %v2584_v19 = vpop.f32.mrf.mxu3  ;;  %v2392_v49 = vadd.f32 %v2391_v12, %v5975_v32 }
 0x337   : > { %v2806_v53 = vpop.f32.mrf.mxu0 }
 0x338   : > { %v6175_v4 = vpop.f32.mrf.mxu1  ;;  %v2657_v57 = vadd.f32 %v2581_v62, %v2392_v49 }
 0x33a   : > { %4427 = vmatmul.msk.bf16.gmra.mxu0 %vm530_vm1, %v6177_v14  ;;  %4393 = vmatmul.msk.bf16.gmra.mxu2 %vm530_vm1, %v6155_v15  ;;  %v6185_v5 = vadd.f32 %v2803_v61, %v2657_v57  ;;  %v2708_v15 = vld [vmem:[#allocation2 + $0x120] sm:$0xff] }
 0x33b   : > { %4435 = vmatmul.msk.bf16.gmra.mxu1 %vm530_vm1, %v5838_v28  ;;  %v2709_v28 = vld [vmem:[#allocation2 + $0x128] sm:$0xff] }
 0x33d   : > { %v2394_v16 = vpop.f32.mrf.mxu2 }
 0x33e   : > { %v2586_v32 = vpop.f32.mrf.mxu3  ;;  %v2395_v39 = vadd.f32 %v2394_v16, %v5985_v18  ;;  %v6199_v18 = vpack.c.bf16 %v2709_v28, %v2708_v15  ;;  %v6212_v28 = vpack.c.bf16 %v2489_v7, %v2488_v41 }
 0x33f   : > { %v2808_v11 = vpop.f32.mrf.mxu0 }
 0x340   : > { %v6188_v33 = vpop.f32.mrf.mxu1  ;;  %v2658_v62 = vadd.f32 %v2584_v19, %v2395_v39  ;;  %7091 = vst [vmem:[#allocation54_spill] sm:$0xff] %v6199_v18 }
 0x341   : > { %7092 = vst [vmem:[#allocation53_spill] sm:$0xff] %v6212_v28 }
 0x342   : > { %v6194_v12 = vadd.f32 %v2806_v53, %v2658_v62 }
 0x343   : > { %4411 = vmatmul.msk.bf16.gmra.mxu3 %vm530_vm1, %v6190_v6 }
 0x345   : > { %v2396_v61 = vpop.f32.mrf.mxu2 }
 0x346   : > { %v2589_v49 = vpop.f32.mrf.mxu3  ;;  %v2397_v57 = vadd.f32 %v2396_v61, %v6000_v27 }
 0x347   : > { %v2811_v2 = vpop.f32.mrf.mxu0 }
 0x348   : > { %v6197_v13 = vpop.f32.mrf.mxu1  ;;  %v2659_v16 = vadd.f32 %v2586_v32, %v2397_v57 }
 0x34a   : > { %4428 = vmatmul.msk.bf16.gmra.mxu0 %vm530_vm1, %v6199_v18  ;;  %4394 = vmatmul.msk.bf16.gmra.mxu2 %vm530_vm1, %v6177_v14  ;;  %v6207_v19 = vadd.f32 %v2808_v11, %v2659_v16  ;;  %v2915_v16 = vld [vmem:[#allocation2 + $0x69] sm:$0xff] }
 0x34b   : > { %4436 = vmatmul.msk.bf16.gmra.mxu1 %vm530_vm1, %v5854_v22  ;;  %v2711_v22 = vld [vmem:[#allocation2 + $0x140] sm:$0xff] }
 0x34d   : > { %v2399_v53 = vpop.f32.mrf.mxu2 }
 0x34e   : > { %v2591_v27 = vpop.f32.mrf.mxu3  ;;  %v2400_v39 = vadd.f32 %v2399_v53, %v6010_v59  ;;  %v6221_v53 = vpack.c.bf16 %v2711_v22, %v2710_v10  ;;  %v2491_v10 = vld [vmem:[#allocation2 + $0x142] sm:$0xff] }
 0x34f   : > { %v2813_v15 = vpop.f32.mrf.mxu0 }
 0x350   : > { %v6210_v62 = vpop.f32.mrf.mxu1  ;;  %v2660_v32 = vadd.f32 %v2589_v49, %v2400_v39  ;;  %7093 = vst [vmem:[#allocation11_spill] sm:$0xff] %v6221_v53  ;;  %v2914_v49 = vld [vmem:[#allocation2 + $0x61] sm:$0xff] }
 0x351   : > { %v6223_v7 = vpack.c.bf16 %v2915_v16, %v2914_v49 }
 0x352   : > { %v6216_v61 = vadd.f32 %v2811_v2, %v2660_v32  ;;  %v2490_v32 = vld [vmem:[#allocation2 + $0x13a] sm:$0xff] }
 0x353   : > { %4412 = vmatmul.msk.bf16.gmra.mxu3 %vm530_vm1, %v6212_v28  ;;  %v6236_v16 = vpack.c.bf16 %v2491_v10, %v2490_v32  ;;  %v2713_v28 = vld [vmem:[#allocation2 + $0x158] sm:$0xff] }
 0x355   : > { %v2401_v11 = vpop.f32.mrf.mxu2  ;;  %7094 = vst [vmem:[#allocation55_spill] sm:$0xff] %v6236_v16 }
 0x356   : > { %v2594_v57 = vpop.f32.mrf.mxu3  ;;  %v2402_v6 = vadd.f32 %v2401_v11, %v6025_v45 }
 0x357   : > { %v2816_v14 = vpop.f32.mrf.mxu0 }
 0x358   : > { %v6219_v59 = vpop.f32.mrf.mxu1  ;;  %v2661_v41 = vadd.f32 %v2591_v27, %v2402_v6 }
 0x35a   : > { %4429 = vmatmul.msk.bf16.gmra.mxu0 %vm530_vm1, %v6221_v53  ;;  %4395 = vmatmul.msk.bf16.gmra.mxu2 %vm530_vm1, %v6199_v18  ;;  %v6231_v45 = vadd.f32 %v2813_v15, %v2661_v41  ;;  %v2917_v18 = vld [vmem:[#allocation2 + $0x81] sm:$0xff] }
 0x35b   : > { %4437 = vmatmul.msk.bf16.gmra.mxu1 %vm530_vm1, %v6223_v7 }
 0x35d   : > { %v2404_v2 = vpop.f32.mrf.mxu2 }
 0x35e   : > { %v2596_v39 = vpop.f32.mrf.mxu3  ;;  %v2405_v22 = vadd.f32 %v2404_v2, %v6035_v21  ;;  %v6245_v2 = vpack.c.bf16 %v2713_v28, %v2712_v25  ;;  %v2493_v25 = vld [vmem:[#allocation2 + $0x15a] sm:$0xff] }
 0x35f   : > { %v2818_v6 = vpop.f32.mrf.mxu0 }
 0x360   : > { %v6234_v27 = vpop.f32.mrf.mxu1  ;;  %v2662_v11 = vadd.f32 %v2594_v57, %v2405_v22  ;;  %7095 = vst [vmem:[#allocation3_spill] sm:$0xff] %v6245_v2  ;;  %v2916_v57 = vld [vmem:[#allocation2 + $0x79] sm:$0xff] }
 0x361   : > { %v6247_v10 = vpack.c.bf16 %v2917_v18, %v2916_v57 }
 0x362   : > { %v6240_v49 = vadd.f32 %v2816_v14, %v2662_v11  ;;  %v2492_v11 = vld [vmem:[#allocation2 + $0x152] sm:$0xff] }
 0x363   : > { %4413 = vmatmul.msk.bf16.gmra.mxu3 %vm530_vm1, %v6236_v16  ;;  %v2715_v16 = vld [vmem:[#allocation2 + $0x170] sm:$0xff] }
 0x365   : > { %v2406_v15 = vpop.f32.mrf.mxu2 }
 0x366   : > { %v2599_v41 = vpop.f32.mrf.mxu3  ;;  %v2407_v8 = vadd.f32 %v2406_v15, %v6050_v23  ;;  %v6260_v15 = vpack.c.bf16 %v2493_v25, %v2492_v11  ;;  %v2494_v11 = vld [vmem:[#allocation2 + $0x16a] sm:$0xff]  ;;  %v2495_v25 = vld [vmem:[#allocation2 + $0x172] sm:$0xff] }
 0x367   : > { %v2821_v58 = vpop.f32.mrf.mxu0 }
 0x368   : > { %v6243_v21 = vpop.f32.mrf.mxu1  ;;  %v2663_v32 = vadd.f32 %v2596_v39, %v2407_v8  ;;  %7097 = vst [vmem:[#allocation57_spill] sm:$0xff] %v6260_v15 }
 0x36a   : > { %4430 = vmatmul.msk.bf16.gmra.mxu0 %vm530_vm1, %v6245_v2  ;;  %4396 = vmatmul.msk.bf16.gmra.mxu2 %vm530_vm1, %v6221_v53  ;;  %v6255_v23 = vadd.f32 %v2818_v6, %v2663_v32 }
 0x36b   : > { %4438 = vmatmul.msk.bf16.gmra.mxu1 %vm530_vm1, %v6247_v10 }
 0x36c   : > { %7096 = vst [vmem:[#allocation56_spill] sm:$0xff] %v6255_v23 }
 0x36d   : > { %v2409_v14 = vpop.f32.mrf.mxu2 }
 0x36e   : > { %v2601_v22 = vpop.f32.mrf.mxu3  ;;  %v2410_v28 = vadd.f32 %v2409_v14, %v6060_v17  ;;  %v6269_v17 = vpack.c.bf16 %v2715_v16, %v2714_v54 }
 0x36f   : > { %v2823_v8 = vpop.f32.mrf.mxu0 }
 0x370   : > { %v6258_v18 = vpop.f32.mrf.mxu1  ;;  %v2664_v39 = vadd.f32 %v2599_v41, %v2410_v28 }
 0x372   : > { %v6264_v57 = vadd.f32 %v2821_v58, %v2664_v39 }
 0x373   : > { %4414 = vmatmul.msk.bf16.gmra.mxu3 %vm530_vm1, %v6260_v15 }
 0x375   : > { %v2411_v6 = vpop.f32.mrf.mxu2 }
 0x376   : > { %v2604_v32 = vpop.f32.mrf.mxu3  ;;  %v2412_v53 = vadd.f32 %v2411_v6, %v6075_v26 }
 0x377   : > { %v2826_v23 = vpop.f32.mrf.mxu0 }
 0x378   : > { %v6267_v50 = vpop.f32.mrf.mxu1  ;;  %v2665_v14 = vadd.f32 %v2601_v22, %v2412_v53  ;;  %v6282_v22 = vpack.c.bf16 %v2495_v25, %v2494_v11 }
 0x37a   : > { %4431 = vmatmul.msk.bf16.gmra.mxu0 %vm530_vm1, %v6269_v17  ;;  %4397 = vmatmul.msk.bf16.gmra.mxu2 %vm530_vm1, %v6245_v2  ;;  %v6277_v58 = vadd.f32 %v2823_v8, %v2665_v14  ;;  %7099 = vst [vmem:[#allocation59_spill] sm:$0xff] %v6282_v22  ;;  %v2716_v2 = vld [vmem:[#allocation2 + $0x180] sm:$0xff] }
 0x37b   : > { %4439 = vmatmul.msk.bf16.gmra.mxu1 %vm530_vm1, %v5904_v37  ;;  %v2717_v37 = vld [vmem:[#allocation2 + $0x188] sm:$0xff] }
 0x37c   : > { %7098 = vst [vmem:[#allocation58_spill] sm:$0xff] %v6277_v58 }
 0x37d   : > { %v2414_v41 = vpop.f32.mrf.mxu2 }
 0x37e   : > { %v2606_v26 = vpop.f32.mrf.mxu3  ;;  %v2415_v28 = vadd.f32 %v2414_v41, %v6093_v20  ;;  %v6291_v20 = vpack.c.bf16 %v2717_v37, %v2716_v2 }
 0x37f   : > { %v2828_v54 = vpop.f32.mrf.mxu0 }
 0x380   : > { %v6280_v16 = vpop.f32.mrf.mxu1  ;;  %v2666_v53 = vadd.f32 %v2604_v32, %v2415_v28 }
 0x382   : > { %v6286_v39 = vadd.f32 %v2826_v23, %v2666_v53  ;;  %v3576_v53 = vld [vmem:[#allocation2 + $0x39] sm:$0xff] }
 0x383   : > { %4415 = vmatmul.msk.bf16.gmra.mxu3 %vm530_vm1, %v6282_v22 }
 0x385   : > { %v2416_v8 = vpop.f32.mrf.mxu2 }
 0x386   : > { %v2609_v6 = vpop.f32.mrf.mxu3  ;;  %v2417_v14 = vadd.f32 %v2416_v8, %v6116_v30 }
 0x387   : > { %v2831_v15 = vpop.f32.mrf.mxu0 }
 0x388   : > { %v6289_v58 = vpop.f32.mrf.mxu1  ;;  %v2667_v41 = vadd.f32 %v2606_v26, %v2417_v14  ;;  %v3575_v14 = vld [vmem:[#allocation2 + $0x31] sm:$0xff] }
 0x389   : > { %v3607_v22 = vpack.c.bf16 %v3576_v53, %v3575_v14 }
 0x38a   : > { %4432 = vmatmul.msk.bf16.gmra.mxu0 %vm530_vm1, %v6291_v20  ;;  %4398 = vmatmul.msk.bf16.gmra.mxu2 %vm530_vm1, %v6269_v17  ;;  %v6299_v23 = vadd.f32 %v2828_v54, %v2667_v41 }
 0x38b   : > { %4440 = vmatmul.msk.bf16.gmra.mxu1 %vm530_vm1, %v5918_v34 }
 0x38d   : > { %v2419_v32 = vpop.f32.mrf.mxu2 }
 0x38e   : > { %v2611_v30 = vpop.f32.mrf.mxu3  ;;  %v2420_v11 = vadd.f32 %v2419_v32, %v6126_v48 }
 0x38f   : > { %v2833_v25 = vpop.f32.mrf.mxu0 }
 0x390   : > { %v6302_v28 = vpop.f32.mrf.mxu1  ;;  %v2668_v2 = vadd.f32 %v2609_v6, %v2420_v11 }
 0x392   : > { %v6306_v26 = vadd.f32 %v2831_v15, %v2668_v2 }
 0x393   : > { %4468 = vmatmul.msk.bf16.vlgmr.msra.gmra.mxu3 %vm530_vm1, %v5938_v0 }
 0x395   : > { %v2421_v37 = vpop.f32.mrf.mxu2 }
 0x396   : > { %v2614_v8 = vpop.f32.mrf.mxu3  ;;  %v2422_v34 = vadd.f32 %v2421_v37, %v6143_v51  ;;  %v3577_v37 = vld [vmem:[#allocation2 + $0x49] sm:$0xff] }
 0x397   : > { %v2836_v54 = vpop.f32.mrf.mxu0 }
 0x398   : > { %v6309_v41 = vpop.f32.mrf.mxu1  ;;  %v2669_v48 = vadd.f32 %v2611_v30, %v2422_v34  ;;  %v3578_v30 = vld [vmem:[#allocation2 + $0x51] sm:$0xff] }
 0x399   : > { %v3608_v14 = vpack.c.bf16 %v3578_v30, %v3577_v37 }
 0x39a   : > { %4485 = vmatmul.msk.bf16.vlgmr.msra.gmra.mxu0 %vm530_vm1, %v3607_v22  ;;  %4451 = vmatmul.msk.bf16.vlgmr.msra.gmra.mxu2 %vm530_vm1, %v5929_v29  ;;  %v6316_v0 = vadd.f32 %v2833_v25, %v2669_v48 }
 0x39b   : > { %4441 = vmatmul.msk.bf16.gmra.mxu1 %vm530_vm1, %v5941_v56 }
 0x39d   : > { %v2424_v15 = vpop.f32.mrf.mxu2 }
 0x39e   : > { %v2616_v6 = vpop.f32.mrf.mxu3  ;;  %v2425_v51 = vadd.f32 %v2424_v15, %v6153_v52 }
 0x39f   : > { %v2838_v32 = vpop.f32.mrf.mxu0 }
 0x3a0   : > { %v6319_v11 = vpop.f32.mrf.mxu1  ;;  %v2670_v2 = vadd.f32 %v2614_v8, %v2425_v51 }
 0x3a2   : > { %v6323_v22 = vadd.f32 %v2836_v54, %v2670_v2 }
 0x3a3   : > { %4469 = vmatmul.msk.bf16.gmra.mxu3 %vm530_vm1, %v5962_v35 }
 0x3a5   : > { %v2426_v56 = vpop.f32.mrf.mxu2 }
 0x3a6   : > { %v2619_v53 = vpop.f32.mrf.mxu3  ;;  %v2427_v29 = vadd.f32 %v2426_v56, %v6166_v3 }
 0x3a7   : > { %v2841_v25 = vpop.f32.mrf.mxu0 }
 0x3a8   : > { %v3018_v34 = vpop.f32.mrf.mxu1  ;;  %v2671_v48 = vadd.f32 %v2616_v6, %v2427_v29 }
 0x3a9   : > { %v6327_v52 = vadd.f32 %v3018_v34, %v6150_v40 }
 0x3aa   : > { %4486 = vmatmul.msk.bf16.gmra.mxu0 %vm530_vm1, %v3608_v14  ;;  %4452 = vmatmul.msk.bf16.gmra.mxu2 %vm530_vm1, %v5953_v46  ;;  %v6334_v35 = vadd.f32 %v2838_v32, %v2671_v48 }
 0x3ab   : > { %4442 = vmatmul.msk.bf16.gmra.mxu1 %vm530_vm1, %v5965_v42 }
 0x3ad   : > { %v2429_v8 = vpop.f32.mrf.mxu2 }
 0x3ae   : > { %v2621_v3 = vpop.f32.mrf.mxu3  ;;  %v2430_v54 = vadd.f32 %v2429_v8, %v6175_v4 }
 0x3af   : > { %v2843_v15 = vpop.f32.mrf.mxu0 }
 0x3b0   : > { %v3020_v51 = vpop.f32.mrf.mxu1  ;;  %v2672_v6 = vadd.f32 %v2619_v53, %v2430_v54 }
 0x3b1   : > { %v6338_v40 = vadd.f32 %v3020_v51, %v6163_v55 }
 0x3b2   : > { %v6342_v2 = vadd.f32 %v2841_v25, %v2672_v6 }
 0x3b3   : > { %4470 = vmatmul.msk.bf16.gmra.mxu3 %vm530_vm1, %v5987_v47 }
 0x3b5   : > { %v2431_v42 = vpop.f32.mrf.mxu2 }
 0x3b6   : > { %v2624_v30 = vpop.f32.mrf.mxu3  ;;  %v2432_v46 = vadd.f32 %v2431_v42, %v6188_v33 }
 0x3b7   : > { %v2846_v32 = vpop.f32.mrf.mxu0 }
 0x3b8   : > { %v3023_v56 = vpop.f32.mrf.mxu1  ;;  %v2673_v29 = vadd.f32 %v2621_v3, %v2432_v46 }
 0x3b9   : > { %v6346_v4 = vadd.f32 %v3023_v56, %v6172_v44 }
 0x3ba   : > { %4487 = vmatmul.msk.bf16.gmra.mxu0 %vm530_vm1, %v6223_v7  ;;  %4453 = vmatmul.msk.bf16.gmra.mxu2 %vm530_vm1, %v5978_v43  ;;  %v6354_v47 = vadd.f32 %v2843_v15, %v2673_v29 }
 0x3bb   : > { %4443 = vmatmul.msk.bf16.gmra.mxu1 %vm530_vm1, %v5990_v60 }
 0x3bd   : > { %v2434_v55 = vpop.f32.mrf.mxu2 }
 0x3be   : > { %v2626_v53 = vpop.f32.mrf.mxu3  ;;  %v2435_v33 = vadd.f32 %v2434_v55, %v6197_v13 }
 0x3bf   : > { %v2848_v25 = vpop.f32.mrf.mxu0 }
 0x3c0   : > { %v3025_v37 = vpop.f32.mrf.mxu1  ;;  %v2674_v34 = vadd.f32 %v2624_v30, %v2435_v33 }
 0x3c1   : > { %v6358_v44 = vadd.f32 %v3025_v37, %v6185_v5 }
 0x3c2   : > { %v6362_v7 = vadd.f32 %v2846_v32, %v2674_v34  ;;  %v3583_v32 = vld [vmem:[#allocation2 + $0x91] sm:$0xff] }
 0x3c3   : > { %4471 = vmatmul.msk.bf16.gmra.mxu3 %vm530_vm1, %v6012_v36 }
 0x3c5   : > { %v2436_v60 = vpop.f32.mrf.mxu2 }
 0x3c6   : > { %v2629_v14 = vpop.f32.mrf.mxu3  ;;  %v2437_v43 = vadd.f32 %v2436_v60, %v6210_v62 }
 0x3c7   : > { %v2851_v48 = vpop.f32.mrf.mxu0 }
 0x3c8   : > { %v3028_v8 = vpop.f32.mrf.mxu1  ;;  %v2675_v3 = vadd.f32 %v2626_v53, %v2437_v43 }
 0x3c9   : > { %v6366_v13 = vadd.f32 %v3028_v8, %v6194_v12 }
 0x3ca   : > { %4488 = vmatmul.msk.bf16.gmra.mxu0 %vm530_vm1, %v6247_v10  ;;  %4454 = vmatmul.msk.bf16.gmra.mxu2 %vm530_vm1, %v6003_v1  ;;  %v6374_v36 = vadd.f32 %v2848_v25, %v2675_v3 }
 0x3cb   : > { %4444 = vmatmul.msk.bf16.gmra.mxu1 %vm530_vm1, %v6015_v63  ;;  %v3584_v63 = vld [vmem:[#allocation2 + $0x99] sm:$0xff] }
 0x3cd   : > { %v2439_v5 = vpop.f32.mrf.mxu2 }
 0x3ce   : > { %v2631_v54 = vpop.f32.mrf.mxu3  ;;  %v2440_v62 = vadd.f32 %v2439_v5, %v6219_v59  ;;  %v3611_v59 = vpack.c.bf16 %v3584_v63, %v3583_v32 }
 0x3cf   : > { %v2853_v15 = vpop.f32.mrf.mxu0 }
 0x3d0   : > { %v3030_v51 = vpop.f32.mrf.mxu1  ;;  %v2676_v6 = vadd.f32 %v2629_v14, %v2440_v62 }
 0x3d1   : > { %v6378_v12 = vadd.f32 %v3030_v51, %v6207_v19 }
 0x3d2   : > { %v6382_v10 = vadd.f32 %v2851_v48, %v2676_v6  ;;  %v3585_v48 = vld [vmem:[#allocation2 + $0xa9] sm:$0xff] }
 0x3d3   : > { %4472 = vmatmul.msk.bf16.gmra.mxu3 %vm530_vm1, %v6037_v9 }
 0x3d5   : > { %v2441_v42 = vpop.f32.mrf.mxu2 }
 0x3d6   : > { %v2634_v1 = vpop.f32.mrf.mxu3  ;;  %v2442_v30 = vadd.f32 %v2441_v42, %v6234_v27  ;;  %v7102_v42 = vld [vmem:[#allocation56_spill] sm:$0xff] }
 0x3d7   : > { %v2856_v46 = vpop.f32.mrf.mxu0 }
 0x3d8   : > { %v3033_v56 = vpop.f32.mrf.mxu1  ;;  %v2677_v29 = vadd.f32 %v2631_v54, %v2442_v30 }
 0x3d9   : > { %v6386_v55 = vadd.f32 %v3033_v56, %v6216_v61 }
 0x3da   : > { %4489 = vmatmul.msk.bf16.gmra.mxu0 %vm530_vm1, %v3611_v59  ;;  %4455 = vmatmul.msk.bf16.gmra.mxu2 %vm530_vm1, %v6028_v31  ;;  %v6393_v9 = vadd.f32 %v2853_v15, %v2677_v29 }
 0x3db   : > { %4445 = vmatmul.msk.bf16.gmra.mxu1 %vm530_vm1, %v6040_v38  ;;  %v3586_v38 = vld [vmem:[#allocation2 + $0xb1] sm:$0xff] }
 0x3dd   : > { %v2444_v19 = vpop.f32.mrf.mxu2 }
 0x3de   : > { %v2636_v27 = vpop.f32.mrf.mxu3  ;;  %v2445_v53 = vadd.f32 %v2444_v19, %v6243_v21  ;;  %v3612_v21 = vpack.c.bf16 %v3586_v38, %v3585_v48  ;;  %v3587_v19 = vld [vmem:[#allocation2 + $0xc1] sm:$0xff] }
 0x3df   : > { %v2858_v33 = vpop.f32.mrf.mxu0 }
 0x3e0   : > { %v3035_v25 = vpop.f32.mrf.mxu1  ;;  %v2678_v37 = vadd.f32 %v2634_v1, %v2445_v53  ;;  %v7103_v1 = vld [vmem:[#allocation35_spill] sm:$0xff] }
 0x3e1   : > { %v6397_v61 = vadd.f32 %v3035_v25, %v6231_v45  ;;  %v7100_v45 = vld [vmem:[#allocation25_spill] sm:$0xff]  ;;  %v7104_v25 = vld [vmem:[#allocation47_spill] sm:$0xff] }
 0x3e2   : > { %v6401_v34 = vadd.f32 %v2856_v46, %v2678_v37  ;;  %v3588_v46 = vld [vmem:[#allocation2 + $0xc9] sm:$0xff] }
 0x3e3   : > { %4473 = vmatmul.msk.bf16.gmra.mxu3 %vm530_vm1, %v6062_v24  ;;  %v7101_v24 = vld [vmem:[#allocation45_spill] sm:$0xff]  ;;  %v7105_v37 = vld [vmem:[#allocation46_spill] sm:$0xff] }
 0x3e5   : > { %v2446_v60 = vpop.f32.mrf.mxu2 }
 0x3e6   : > { %v2639_v31 = vpop.f32.mrf.mxu3  ;;  %v2447_v14 = vadd.f32 %v2446_v60, %v6258_v18 }
 0x3e7   : > { %v2861_v43 = vpop.f32.mrf.mxu0 }
 0x3e8   : > { %v3038_v8 = vpop.f32.mrf.mxu1  ;;  %v2679_v3 = vadd.f32 %v2636_v27, %v2447_v14 }
 0x3e9   : > { %v6405_v5 = vadd.f32 %v3038_v8, %v6240_v49  ;;  %v7106_v8 = vld [vmem:[#allocation58_spill] sm:$0xff] }
 0x3ea   : > { %4490 = vmatmul.msk.bf16.gmra.mxu0 %vm530_vm1, %v3612_v21  ;;  %4456 = vmatmul.msk.bf16.gmra.mxu2 %vm530_vm1, %v7101_v24  ;;  %v6412_v54 = vadd.f32 %v2858_v33, %v2679_v3  ;;  %v7107_v21 = vld [vmem:[#allocation42_spill] sm:$0xff] }
 0x3eb   : > { %4446 = vmatmul.msk.bf16.gmra.mxu1 %vm530_vm1, %v7100_v45  ;;  %v3590_v45 = vld [vmem:[#allocation2 + $0xe1] sm:$0xff] }
 0x3ed   : > { %v2449_v62 = vpop.f32.mrf.mxu2 }
 0x3ee   : > { %v2641_v18 = vpop.f32.mrf.mxu3  ;;  %v2450_v15 = vadd.f32 %v2449_v62, %v6267_v50  ;;  %v3613_v50 = vpack.c.bf16 %v3588_v46, %v3587_v19  ;;  %v7109_v46 = vld [vmem:[#allocation48_spill] sm:$0xff] }
 0x3ef   : > { %v2863_v51 = vpop.f32.mrf.mxu0 }
 0x3f0   : > { %v3040_v6 = vpop.f32.mrf.mxu1  ;;  %v2680_v63 = vadd.f32 %v2639_v31, %v2450_v15 }
 0x3f1   : > { %v6416_v49 = vadd.f32 %v3040_v6, %v7102_v42 }
 0x3f2   : > { %v6420_v30 = vadd.f32 %v2861_v43, %v2680_v63 }
 0x3f3   : > { %4474 = vmatmul.msk.bf16.gmra.mxu3 %vm530_vm1, %v7103_v1  ;;  %v7108_v1 = vld [vmem:[#allocation49_spill] sm:$0xff] }
 0x3f5   : > { %v2451_v32 = vpop.f32.mrf.mxu2 }
 0x3f6   : > { %v2644_v56 = vpop.f32.mrf.mxu3  ;;  %v2452_v59 = vadd.f32 %v2451_v32, %v6280_v16 }
 0x3f7   : > { %v2866_v29 = vpop.f32.mrf.mxu0 }
 0x3f8   : > { %v3043_v27 = vpop.f32.mrf.mxu1  ;;  %v2681_v53 = vadd.f32 %v2641_v18, %v2452_v59 }
 0x3f9   : > { %v6424_v33 = vadd.f32 %v3043_v27, %v6264_v57 }
 0x3fa   : > { %4491 = vmatmul.msk.bf16.gmra.mxu0 %vm530_vm1, %v3613_v50  ;;  %4457 = vmatmul.msk.bf16.gmra.mxu2 %vm530_vm1, %v7105_v37  ;;  %v6431_v38 = vadd.f32 %v2863_v51, %v2681_v53  ;;  %v3589_v51 = vld [vmem:[#allocation2 + $0xd9] sm:$0xff] }
 0x3fb   : > { %4447 = vmatmul.msk.bf16.gmra.mxu1 %vm530_vm1, %v7104_v25  ;;  %v7110_v50 = vld [vmem:[#allocation37_spill] sm:$0xff] }
 0x3fc   : > { %v3592_v25 = vld [vmem:[#allocation2 + $0xf9] sm:$0xff] }
 0x3fd   : > { %v2454_v60 = vpop.f32.mrf.mxu2 }
 0x3fe   : > { %v2646_v16 = vpop.f32.mrf.mxu3  ;;  %v2455_v31 = vadd.f32 %v2454_v60, %v6289_v58  ;;  %v3614_v58 = vpack.c.bf16 %v3590_v45, %v3589_v51 }
 0x3ff   : > { %v2868_v14 = vpop.f32.mrf.mxu0 }
 0x400   : > { %v3045_v43 = vpop.f32.mrf.mxu1  ;;  %v2682_v48 = vadd.f32 %v2644_v56, %v2455_v31 }
 0x401   : > { %v6435_v57 = vadd.f32 %v3045_v43, %v7106_v8  ;;  %v3591_v43 = vld [vmem:[#allocation2 + $0xf1] sm:$0xff] }
 0x402   : > { %v6439_v3 = vadd.f32 %v2866_v29, %v2682_v48  ;;  %v2938_v48 = vld [vmem:[#allocation2 + $0x181] sm:$0xff]  ;;  %v3615_v8 = vpack.c.bf16 %v3592_v25, %v3591_v43 }
 0x403   : > { %4475 = vmatmul.msk.bf16.gmra.mxu3 %vm530_vm1, %v7107_v21 }
 0x405   : > { %v2456_v24 = vpop.f32.mrf.mxu2 }
 0x406   : > { %v2649_v62 = vpop.f32.mrf.mxu3  ;;  %v2457_v18 = vadd.f32 %v2456_v24, %v6302_v28  ;;  %v7111_v24 = vld [vmem:[#allocation51_spill] sm:$0xff] }
 0x407   : > { %v2871_v15 = vpop.f32.mrf.mxu0 }
 0x408   : > { %v3048_v6 = vpop.f32.mrf.mxu1  ;;  %v2683_v63 = vadd.f32 %v2646_v16, %v2457_v18  ;;  %v2939_v16 = vld [vmem:[#allocation2 + $0x189] sm:$0xff] }
 0x409   : > { %v6443_v42 = vadd.f32 %v3048_v6, %v6286_v39  ;;  %v6464_v45 = vpack.c.bf16 %v2939_v16, %v2938_v48  ;;  %v7113_v16 = vld [vmem:[#allocation50_spill] sm:$0xff] }
 0x40a   : > { %4492 = vmatmul.msk.bf16.gmra.mxu0 %vm530_vm1, %v3614_v58  ;;  %4458 = vmatmul.msk.bf16.gmra.mxu2 %vm530_vm1, %v7109_v46  ;;  %v6450_v32 = vadd.f32 %v2868_v14, %v2683_v63  ;;  %v7112_v63 = vld [vmem:[#allocation6_spill] sm:$0xff]  ;;  %v3594_v46 = vld [vmem:[#allocation2 + $0x111] sm:$0xff] }
 0x40b   : > { %4448 = vmatmul.msk.bf16.gmra.mxu1 %vm530_vm1, %v7108_v1 }
 0x40d   : > { %v2459_v56 = vpop.f32.mrf.mxu2 }
 0x40e   : > { %v2651_v28 = vpop.f32.mrf.mxu3  ;;  %v2460_v59 = vadd.f32 %v2459_v56, %v6309_v41 }
 0x40f   : > { %v2873_v29 = vpop.f32.mrf.mxu0 }
 0x410   : > { %v3050_v19 = vpop.f32.mrf.mxu1  ;;  %v2684_v27 = vadd.f32 %v2649_v62, %v2460_v59  ;;  %v3797_v59 = vld [vmem:[#allocation2 + $0x32] sm:$0xff] }
 0x411   : > { %v6454_v39 = vadd.f32 %v3050_v19, %v6299_v23 }
 0x412   : > { %v6458_v53 = vadd.f32 %v2871_v15, %v2684_v27  ;;  %v3593_v27 = vld [vmem:[#allocation2 + $0x109] sm:$0xff] }
 0x413   : > { %4476 = vmatmul.msk.bf16.gmra.mxu3 %vm530_vm1, %v7110_v50  ;;  %v3616_v25 = vpack.c.bf16 %v3594_v46, %v3593_v27 }
 0x415   : > { %v2461_v37 = vpop.f32.mrf.mxu2 }
 0x416   : > { %v3463_v60 = vpop.f32.mrf.mxu3  ;;  %v2462_v31 = vadd.f32 %v2461_v37, %v6319_v11 }
 0x417   : > { %v3685_v14 = vpop.f32.mrf.mxu0 }
 0x418   : > { %v3053_v41 = vpop.f32.mrf.mxu1  ;;  %v2685_v21 = vadd.f32 %v2651_v28, %v2462_v31 }
 0x419   : > { %v6462_v23 = vadd.f32 %v3053_v41, %v6306_v26 }
 0x41a   : > { %4493 = vmatmul.msk.bf16.gmra.mxu0 %vm530_vm1, %v3615_v8  ;;  %4459 = vmatmul.msk.bf16.gmra.mxu2 %vm530_vm1, %v7111_v24  ;;  %v6471_v11 = vadd.f32 %v2873_v29, %v2685_v21  ;;  %v3798_v29 = vld [vmem:[#allocation2 + $0x3a] sm:$0xff]  ;;  %v7114_v21 = vld [vmem:[#allocation54_spill] sm:$0xff] }
 0x41b   : > { %4449 = vmatmul.msk.bf16.gmra.mxu1 %vm530_vm1, %v6464_v45 }
 0x41d   : > { %v3240_v62 = vpop.f32.mrf.mxu2 }
 0x41e   : > { %v3465_v18 = vpop.f32.mrf.mxu3  ;;  %v3320_v15 = vadd.f32 %v3240_v62, %v6327_v52  ;;  %v3596_v62 = vld [vmem:[#allocation2 + $0x129] sm:$0xff] }
 0x41f   : > { %v3687_v51 = vpop.f32.mrf.mxu0 }
 0x420   : > { %v3055_v6 = vpop.f32.mrf.mxu1  ;;  %v3543_v26 = vadd.f32 %v3463_v60, %v3320_v15  ;;  %v3829_v60 = vpack.c.bf16 %v3798_v29, %v3797_v59  ;;  %v3799_v15 = vld [vmem:[#allocation2 + $0x4a] sm:$0xff]  ;;  %v7115_v59 = vld [vmem:[#allocation52_spill] sm:$0xff] }
 0x421   : > { %v6475_v58 = vadd.f32 %v3055_v6, %v6316_v0 }
 0x422   : > { %v6479_v1 = vadd.f32 %v3685_v14, %v3543_v26  ;;  %v3595_v26 = vld [vmem:[#allocation2 + $0x121] sm:$0xff] }
 0x423   : > { %4477 = vmatmul.msk.bf16.gmra.mxu3 %vm530_vm1, %v7112_v63  ;;  %v3617_v63 = vpack.c.bf16 %v3596_v62, %v3595_v26 }
 0x425   : > { %v3242_v56 = vpop.f32.mrf.mxu2 }
 0x426   : > { %v3468_v28 = vpop.f32.mrf.mxu3  ;;  %v3321_v19 = vadd.f32 %v3242_v56, %v6338_v40 }
 0x427   : > { %v3690_v50 = vpop.f32.mrf.mxu0 }
 0x428   : > { %v3058_v52 = vpop.f32.mrf.mxu1  ;;  %v3544_v37 = vadd.f32 %v3465_v18, %v3321_v19 }
 0x429   : > { %v6483_v0 = vadd.f32 %v3058_v52, %v6323_v22 }
 0x42a   : > { %4494 = vmatmul.msk.bf16.gmra.mxu0 %vm530_vm1, %v3616_v25  ;;  %4460 = vmatmul.msk.bf16.gmra.mxu2 %vm530_vm1, %v7113_v16  ;;  %v6489_v31 = vadd.f32 %v3687_v51, %v3544_v37  ;;  %v3800_v51 = vld [vmem:[#allocation2 + $0x52] sm:$0xff]  ;;  %v3598_v16 = vld [vmem:[#allocation2 + $0x141] sm:$0xff] }
 0x42b   : > { %4502 = vmatmul.msk.bf16.vlgmr.msra.gmra.mxu1 %vm530_vm1, %v3829_v60  ;;  %v7116_v25 = vld [vmem:[#allocation11_spill] sm:$0xff] }
 0x42d   : > { %v3245_v14 = vpop.f32.mrf.mxu2 }
 0x42e   : > { %v3322_v40 = vadd.f32 %v3245_v14, %v6346_v4  ;;  %v3470_v43 = vpop.f32.mrf.mxu3 }
 0x42f   : > { %v3692_v22 = vpop.f32.mrf.mxu0 }
 0x430   : > { %v3060_v41 = vpop.f32.mrf.mxu1  ;;  %v3545_v48 = vadd.f32 %v3468_v28, %v3322_v40 }
 0x431   : > { %v6493_v8 = vadd.f32 %v3060_v41, %v6334_v35  ;;  %v3830_v35 = vpack.c.bf16 %v3800_v51, %v3799_v15  ;;  %v3802_v41 = vld [vmem:[#allocation2 + $0x6a] sm:$0xff]  ;;  %v7117_v15 = vld [vmem:[#allocation53_spill] sm:$0xff] }
 0x432   : > { %v6497_v24 = vadd.f32 %v3690_v50, %v3545_v48 }
 0x433   : > { %4478 = vmatmul.msk.bf16.gmra.mxu3 %vm530_vm1, %v7114_v21 }
 0x435   : > { %v3247_v18 = vpop.f32.mrf.mxu2 }
 0x436   : > { %v3323_v6 = vadd.f32 %v3247_v18, %v6358_v44  ;;  %v3473_v28 = vpop.f32.mrf.mxu3 }
 0x437   : > { %v3695_v19 = vpop.f32.mrf.mxu0 }
 0x438   : > { %v3063_v4 = vpop.f32.mrf.mxu1  ;;  %v3546_v46 = vadd.f32 %v3470_v43, %v3323_v6  ;;  %v3801_v43 = vld [vmem:[#allocation2 + $0x62] sm:$0xff] }
 0x439   : > { %v6501_v56 = vadd.f32 %v3063_v4, %v6342_v2  ;;  %v3831_v18 = vpack.c.bf16 %v3802_v41, %v3801_v43  ;;  %v7119_v43 = vld [vmem:[#allocation55_spill] sm:$0xff] }
 0x43a   : > { %4495 = vmatmul.msk.bf16.gmra.mxu0 %vm530_vm1, %v3617_v63  ;;  %4461 = vmatmul.msk.bf16.gmra.mxu2 %vm530_vm1, %v7115_v59  ;;  %v6507_v29 = vadd.f32 %v3692_v22, %v3546_v46  ;;  %v3597_v22 = vld [vmem:[#allocation2 + $0x139] sm:$0xff] }
 0x43b   : > { %4503 = vmatmul.msk.bf16.gmra.mxu1 %vm530_vm1, %v3830_v35  ;;  %v3618_v21 = vpack.c.bf16 %v3598_v16, %v3597_v22  ;;  %v7118_v35 = vld [vmem:[#allocation3_spill] sm:$0xff]  ;;  %v3600_v59 = vld [vmem:[#allocation2 + $0x159] sm:$0xff] }
 0x43c   : > { %v3805_v22 = vld [vmem:[#allocation2 + $0x92] sm:$0xff] }
 0x43d   : > { %v3250_v44 = vpop.f32.mrf.mxu2 }
 0x43e   : > { %v3324_v27 = vadd.f32 %v3250_v44, %v6366_v13  ;;  %v3475_v60 = vpop.f32.mrf.mxu3  ;;  %v3803_v44 = vld [vmem:[#allocation2 + $0x7a] sm:$0xff] }
 0x43f   : > { %v3697_v14 = vpop.f32.mrf.mxu0 }
 0x440   : > { %v3065_v52 = vpop.f32.mrf.mxu1  ;;  %v3547_v50 = vadd.f32 %v3473_v28, %v3324_v27  ;;  %v3804_v27 = vld [vmem:[#allocation2 + $0x82] sm:$0xff] }
 0x441   : > { %v6511_v2 = vadd.f32 %v3065_v52, %v6354_v47 }
 0x442   : > { %v6515_v37 = vadd.f32 %v3695_v19, %v3547_v50  ;;  %v3599_v50 = vld [vmem:[#allocation2 + $0x151] sm:$0xff] }
 0x443   : > { %4479 = vmatmul.msk.bf16.gmra.mxu3 %vm530_vm1, %v7116_v25 }
 0x445   : > { %v3252_v40 = vpop.f32.mrf.mxu2 }
 0x446   : > { %v3325_v48 = vadd.f32 %v3252_v40, %v6378_v12  ;;  %v3478_v6 = vpop.f32.mrf.mxu3 }
 0x447   : > { %v3700_v4 = vpop.f32.mrf.mxu0 }
 0x448   : > { %v3068_v13 = vpop.f32.mrf.mxu1  ;;  %v3548_v62 = vadd.f32 %v3475_v60, %v3325_v48  ;;  %v3619_v60 = vpack.c.bf16 %v3600_v59, %v3599_v50  ;;  %v3384_v59 = vld [vmem:[#allocation2 + $0x1a0] sm:$0xff] }
 0x449   : > { %v6519_v47 = vadd.f32 %v3068_v13, %v6362_v7  ;;  %v3806_v13 = vld [vmem:[#allocation2 + $0x9a] sm:$0xff]  ;;  %v3160_v50 = vld [vmem:[#allocation2 + $0x182] sm:$0xff] }
 0x44a   : > { %4496 = vmatmul.msk.bf16.gmra.mxu0 %vm530_vm1, %v3618_v21  ;;  %4462 = vmatmul.msk.bf16.gmra.mxu2 %vm530_vm1, %v7117_v15  ;;  %v6525_v51 = vadd.f32 %v3697_v14, %v3548_v62  ;;  %v3601_v21 = vld [vmem:[#allocation2 + $0x169] sm:$0xff] }
 0x44b   : > { %4504 = vmatmul.msk.bf16.gmra.mxu1 %vm530_vm1, %v3831_v18 }
 0x44d   : > { %v3255_v26 = vpop.f32.mrf.mxu2 }
 0x44e   : > { %v3326_v12 = vadd.f32 %v3255_v26, %v6386_v55  ;;  %v3480_v25 = vpop.f32.mrf.mxu3  ;;  %v7120_v26 = vld [vmem:[#allocation57_spill] sm:$0xff] }
 0x44f   : > { %v3702_v40 = vpop.f32.mrf.mxu0 }
 0x450   : > { %v3070_v63 = vpop.f32.mrf.mxu1  ;;  %v3549_v46 = vadd.f32 %v3478_v6, %v3326_v12  ;;  %v3833_v6 = vpack.c.bf16 %v3806_v13, %v3805_v22  ;;  %v3807_v12 = vld [vmem:[#allocation2 + $0xaa] sm:$0xff] }
 0x451   : > { %v6529_v7 = vadd.f32 %v3070_v63, %v6374_v36  ;;  %v3832_v36 = vpack.c.bf16 %v3804_v27, %v3803_v44  ;;  %v3606_v27 = vld [vmem:[#allocation2 + $0x1a1] sm:$0xff] }
 0x452   : > { %v6533_v28 = vadd.f32 %v3700_v4, %v3549_v46  ;;  %v3808_v4 = vld [vmem:[#allocation2 + $0xb2] sm:$0xff] }
 0x453   : > { %4480 = vmatmul.msk.bf16.gmra.mxu3 %vm530_vm1, %v7118_v35  ;;  %v3834_v46 = vpack.c.bf16 %v3808_v4, %v3807_v12  ;;  %v7121_v35 = vld [vmem:[#allocation59_spill] sm:$0xff] }
 0x454   : > { %v7122_v4 = vld [vmem:[#allocation7_spill] sm:$0xff] }
 0x455   : > { %v3257_v19 = vpop.f32.mrf.mxu2 }
 0x456   : > { %v3327_v52 = vadd.f32 %v3257_v19, %v6397_v61 }
 0x458   : > { %v3073_v55 = vpop.f32.mrf.mxu1  ;;  %v3550_v16 = vadd.f32 %v3480_v25, %v3327_v52  ;;  %v3809_v52 = vld [vmem:[#allocation2 + $0xc2] sm:$0xff]  ;;  %v3161_v25 = vld [vmem:[#allocation2 + $0x18a] sm:$0xff] }
 0x459   : > { %v6537_v14 = vadd.f32 %v3073_v55, %v6382_v10  ;;  %v3602_v10 = vld [vmem:[#allocation2 + $0x171] sm:$0xff] }
 0x45a   : > { %4497 = vmatmul.msk.bf16.gmra.mxu0 %vm530_vm1, %v3619_v60  ;;  %4463 = vmatmul.msk.bf16.gmra.mxu2 %vm530_vm1, %v7119_v43  ;;  %v6543_v41 = vadd.f32 %v3702_v40, %v3550_v16  ;;  %v3620_v18 = vpack.c.bf16 %v3602_v10, %v3601_v21  ;;  %v3812_v10 = vld [vmem:[#allocation2 + $0xe2] sm:$0xff] }
 0x45b   : > { %4505 = vmatmul.msk.bf16.gmra.mxu1 %vm530_vm1, %v3832_v36  ;;  %v6577_v36 = vpack.c.bf16 %v3161_v25, %v3160_v50 }
 0x460   : > { %v3075_v61 = vpop.f32.mrf.mxu1 }
 0x461   : > { %v6546_v48 = vadd.f32 %v3075_v61, %v6393_v9  ;;  %v3811_v61 = vld [vmem:[#allocation2 + $0xda] sm:$0xff] }
 0x462   : > { %v3836_v13 = vpack.c.bf16 %v3812_v10, %v3811_v61 }
 0x463   : > { %4481 = vmatmul.msk.bf16.gmra.mxu3 %vm530_vm1, %v6269_v17 }
 0x468   : > { %v3078_v62 = vpop.f32.mrf.mxu1 }
 0x469   : > { %v6551_v15 = vadd.f32 %v3078_v62, %v6401_v34 }
 0x46a   : > { %4498 = vmatmul.msk.bf16.gmra.mxu0 %vm530_vm1, %v3620_v18  ;;  %4464 = vmatmul.msk.bf16.gmra.mxu2 %vm530_vm1, %v7120_v26  ;;  %v3813_v18 = vld [vmem:[#allocation2 + $0xf2] sm:$0xff] }
 0x46b   : > { %4506 = vmatmul.msk.bf16.gmra.mxu1 %vm530_vm1, %v3833_v6  ;;  %v3814_v6 = vld [vmem:[#allocation2 + $0xfa] sm:$0xff] }
 0x46c   : > { %v3837_v12 = vpack.c.bf16 %v3814_v6, %v3813_v18  ;;  %v7125_v6 = vld [vmem:[#allocation13_spill] sm:$0xff] }
 0x470   : > { %v3080_v9 = vpop.f32.mrf.mxu1 }
 0x471   : > { %v6558_v17 = vadd.f32 %v3080_v9, %v6412_v54  ;;  %v3383_v54 = vld [vmem:[#allocation2 + $0x198] sm:$0xff] }
 0x472   : > { %v3400_v19 = vpack.c.bf16 %v3384_v59, %v3383_v54  ;;  %v6614_v59 = vpop.f32.mrf.mxu3 }
 0x473   : > { %4482 = vmatmul.msk.bf16.gmra.mxu3 %vm530_vm1, %v6291_v20 }
 0x478   : > { %v3083_v63 = vpop.f32.mrf.mxu1 }
 0x479   : > { %v6563_v34 = vadd.f32 %v3083_v63, %v6420_v30  ;;  %v3605_v30 = vld [vmem:[#allocation2 + $0x199] sm:$0xff] }
 0x47a   : > { %4499 = vmatmul.msk.bf16.gmra.mxu0 %vm530_vm1, %v6464_v45  ;;  %4465 = vmatmul.msk.bf16.gmra.mxu2 %vm530_vm1, %v7121_v35  ;;  %v3810_v45 = vld [vmem:[#allocation2 + $0xca] sm:$0xff]  ;;  %v3622_v55 = vpack.c.bf16 %v3606_v27, %v3605_v30  ;;  %v3816_v27 = vld [vmem:[#allocation2 + $0x112] sm:$0xff]  ;;  %v6627_v61 = vpop.f32.mrf.mxu3 }
 0x47b   : > { %4507 = vmatmul.msk.bf16.gmra.mxu1 %vm530_vm1, %v3834_v46  ;;  %v3835_v40 = vpack.c.bf16 %v3810_v45, %v3809_v52  ;;  %v3815_v30 = vld [vmem:[#allocation2 + $0x10a] sm:$0xff]  ;;  %v6617_v52 = vpop.f32.mrf.mxu0 }
 0x480   : > { %v3085_v44 = vpop.f32.mrf.mxu1 }
 0x481   : > { %v6571_v20 = vadd.f32 %v3085_v44, %v6431_v38 }
 0x483   : > { %4483 = vmatmul.msk.bf16.gmra.mxu3 %vm530_vm1, %v3400_v19  ;;  %v7123_v19 = vld [vmem:[#allocation8_spill] sm:$0xff] }
 0x488   : > { %v3088_v60 = vpop.f32.mrf.mxu1 }
 0x489   : > { %v6575_v16 = vadd.f32 %v3088_v60, %v6439_v3 }
 0x48a   : > { %4500 = vmatmul.msk.bf16.gmra.mxu0 %vm530_vm1, %v3622_v55  ;;  %4466 = vmatmul.msk.bf16.gmra.mxu2 %vm530_vm1, %v6577_v36 }
 0x48b   : > { %4508 = vmatmul.msk.bf16.gmra.mxu1 %vm530_vm1, %v3835_v40  ;;  %v7124_v40 = vld [vmem:[#allocation12_spill] sm:$0xff] }
 0x490   : > { %v3090_v38 = vpop.f32.mrf.mxu1 }
 0x491   : > { %v6584_v43 = vadd.f32 %v3090_v38, %v6450_v32  ;;  %v6596_v32 = vld [vmem:[%s6816_s4] ss:$0 sm:$0xff] }
 0x498   : > { %v3093_v22 = vpop.f32.mrf.mxu1 }
 0x499   : > { %v6587_v3 = vadd.f32 %v3093_v22, %v6458_v53 }
 0x49b   : > { %4509 = vmatmul.msk.bf16.gmra.mxu1 %vm530_vm1, %v3836_v13  ;;  %v6629_v13 = vpop.f32.mrf.mxu0 }
 0x4a0   : > { %v3095_v21 = vpop.f32.mrf.mxu1 }
 0x4a1   : > { %v6591_v62 = vadd.f32 %v3095_v21, %v6471_v11  ;;  %v6603_v11 = vpop.f32.mrf.mxu2 }
 0x4a8   : > { %v3907_v26 = vpop.f32.mrf.mxu1 }
 0x4a9   : > { %v3987_v9 = vadd.f32 %v3907_v26, %v6479_v1  ;;  %v6619_v25 = vpop.f32.mrf.mxu2 }
 0x4ab   : > { %v4023_v53 = vadd.f32 %v6596_v32, %v3987_v9  ;;  %4510 = vmatmul.msk.bf16.gmra.mxu1 %vm530_vm1, %v3837_v12  ;;  %v3817_v9 = vld [vmem:[#allocation2 + $0x122] sm:$0xff]  ;;  %v3818_v12 = vld [vmem:[#allocation2 + $0x12a] sm:$0xff] }
 0x4ad   : > { %v4055_v63 = vadd.f32 %v4023_v53, %v7122_v4  ;;  %v6636_v4 = vpop.f32.mrf.mxu3 }
 0x4af   : > { %v4087_v46 = vmax.f32 %v4055_v63, 0.0 }
 0x4b0   : > { %v3909_v35 = vpop.f32.mrf.mxu1 }
 0x4b1   : > { %4119 = vst.msk [vmem:[%s6608_s23] sm:$0xff] %vm530_vm1, %v4087_v46  ;;  %v3988_v1 = vadd.f32 %v3909_v35, %v6489_v31  ;;  %v3838_v31 = vpack.c.bf16 %v3816_v27, %v3815_v30  ;;  %v3265_v18 = vpop.f32.mrf.mxu2  ;;  %v3839_v35 = vpack.c.bf16 %v3818_v12, %v3817_v9  ;;  %v7128_v9 = vld [vmem:[#allocation20_spill] sm:$0xff] }
 0x4b3   : > { %v4024_v54 = vadd.f32 %v6596_v32, %v3988_v1  ;;  %v6641_v1 = vpop.f32.mrf.mxu0 }
 0x4b5   : > { %v4056_v44 = vadd.f32 %v4024_v54, %v7123_v19  ;;  %v7126_v19 = vld [vmem:[#allocation16_spill] sm:$0xff] }
 0x4b7   : > { %v4088_v50 = vmax.f32 %v4056_v44, 0.0 }
 0x4b8   : > { %v3912_v45 = vpop.f32.mrf.mxu1 }
 0x4b9   : > { %4120 = vst.msk [vmem:[%s6608_s23 + $0x8] sm:$0xff] %vm530_vm1, %v4088_v50  ;;  %v3989_v55 = vadd.f32 %v3912_v45, %v6497_v24  ;;  %v3267_v54 = vpop.f32.mrf.mxu2  ;;  %v6649_v45 = vpop.f32.mrf.mxu3 }
 0x4bb   : > { %v4025_v60 = vadd.f32 %v6596_v32, %v3989_v55  ;;  %4511 = vmatmul.msk.bf16.gmra.mxu1 %vm530_vm1, %v3838_v31  ;;  %v6652_v55 = vpop.f32.mrf.mxu0  ;;  %v7127_v31 = vld [vmem:[#allocation17_spill] sm:$0xff] }
 0x4bd   : > { %v4057_v38 = vadd.f32 %v4025_v60, %v7124_v40 }
 0x4bf   : > { %v4089_v10 = vmax.f32 %v4057_v38, 0.0  ;;  %v3819_v38 = vld [vmem:[#allocation2 + $0x13a] sm:$0xff] }
 0x4c0   : > { %v3914_v22 = vpop.f32.mrf.mxu1 }
 0x4c1   : > { %4121 = vst.msk [vmem:[%s6608_s23 + $0x10] sm:$0xff] %vm530_vm1, %v4089_v10  ;;  %v3990_v21 = vadd.f32 %v3914_v22, %v6507_v29  ;;  %v6655_v40 = vpop.f32.mrf.mxu2  ;;  %v3820_v10 = vld [vmem:[#allocation2 + $0x142] sm:$0xff] }
 0x4c3   : > { %v4026_v24 = vadd.f32 %v6596_v32, %v3990_v21 }
 0x4c5   : > { %v4058_v26 = vadd.f32 %v4026_v24, %v7125_v6 }
 0x4c7   : > { %v4090_v53 = vmax.f32 %v4058_v26, 0.0  ;;  %v3493_v26 = vpop.f32.mrf.mxu3 }
 0x4c8   : > { %v3917_v63 = vpop.f32.mrf.mxu1 }
 0x4c9   : > { %4122 = vst.msk [vmem:[%s6608_s23 + $0x18] sm:$0xff] %vm530_vm1, %v4090_v53  ;;  %v3991_v46 = vadd.f32 %v3917_v63, %v6515_v37  ;;  %v3328_v53 = vadd.f32 %v6603_v11, %v6405_v5  ;;  %v6665_v63 = vpop.f32.mrf.mxu0  ;;  %v3329_v5 = vadd.f32 %v6619_v25, %v6416_v49  ;;  %v3330_v49 = vadd.f32 %v3265_v18, %v6424_v33 }
 0x4ca   : > { %v3331_v33 = vadd.f32 %v3267_v54, %v6435_v57 }
 0x4cb   : > { %v4027_v29 = vadd.f32 %v6596_v32, %v3991_v46  ;;  %4512 = vmatmul.msk.bf16.gmra.mxu1 %vm530_vm1, %v3839_v35  ;;  %v3272_v35 = vpop.f32.mrf.mxu2 }
 0x4cd   : > { %v4059_v44 = vadd.f32 %v4027_v29, %v7126_v19  ;;  %v3551_v19 = vadd.f32 %v6614_v59, %v3328_v53 }
 0x4cf   : > { %v4091_v30 = vmax.f32 %v4059_v44, 0.0 }
 0x4d0   : > { %v3919_v27 = vpop.f32.mrf.mxu1 }
 0x4d1   : > { %4123 = vst.msk [vmem:[%s6608_s23 + $0x20] sm:$0xff] %vm530_vm1, %v4091_v30  ;;  %v3992_v50 = vadd.f32 %v3919_v27, %v6525_v51  ;;  %v3840_v51 = vpack.c.bf16 %v3820_v10, %v3819_v38  ;;  %v7129_v30 = vld [vmem:[#allocation21_spill] sm:$0xff]  ;;  %v3717_v10 = vpop.f32.mrf.mxu0 }
 0x4d3   : > { %v4028_v37 = vadd.f32 %v6596_v32, %v3992_v50  ;;  %v3495_v50 = vpop.f32.mrf.mxu3 }
 0x4d5   : > { %v4060_v60 = vadd.f32 %v4028_v37, %v7127_v31  ;;  %v3821_v37 = vld [vmem:[#allocation2 + $0x152] sm:$0xff]  ;;  %v3822_v31 = vld [vmem:[#allocation2 + $0x15a] sm:$0xff] }
 0x4d6   : > { %v3841_v59 = vpack.c.bf16 %v3822_v31, %v3821_v37 }
 0x4d7   : > { %v4092_v22 = vmax.f32 %v4060_v60, 0.0  ;;  %v3773_v60 = vadd.f32 %v6617_v52, %v3551_v19  ;;  %v7131_v19 = vld [vmem:[#allocation27_spill] sm:$0xff] }
 0x4d8   : > { %v3922_v21 = vpop.f32.mrf.mxu1 }
 0x4d9   : > { %4124 = vst.msk [vmem:[%s6608_s23 + $0x28] sm:$0xff] %vm530_vm1, %v4092_v22  ;;  %v3993_v24 = vadd.f32 %v3922_v21, %v6533_v28  ;;  %v3275_v22 = vpop.f32.mrf.mxu2  ;;  %v3552_v21 = vadd.f32 %v6627_v61, %v3329_v5  ;;  %v3720_v61 = vpop.f32.mrf.mxu0 }
 0x4db   : > { %v4029_v6 = vadd.f32 %v6596_v32, %v3993_v24  ;;  %4513 = vmatmul.msk.bf16.gmra.mxu1 %vm530_vm1, %v3840_v51  ;;  %v7130_v51 = vld [vmem:[#allocation26_spill] sm:$0xff]  ;;  %v3774_v52 = vadd.f32 %v6629_v13, %v3552_v21 }
 0x4dd   : > { %v4061_v12 = vadd.f32 %v4029_v6, %v7128_v9  ;;  %v3498_v9 = vpop.f32.mrf.mxu3 }
 0x4df   : > { %v4093_v46 = vmax.f32 %v4061_v12, 0.0 }
 0x4e0   : > { %v3924_v29 = vpop.f32.mrf.mxu1 }
 0x4e1   : > { %4125 = vst.msk [vmem:[%s6608_s23 + $0x30] sm:$0xff] %vm530_vm1, %v4093_v46  ;;  %v3994_v28 = vadd.f32 %v3924_v29, %v6543_v41  ;;  %v3553_v46 = vadd.f32 %v6636_v4, %v3330_v49 }
 0x4e3   : > { %v4030_v44 = vadd.f32 %v6596_v32, %v3994_v28  ;;  %v3277_v28 = vpop.f32.mrf.mxu2  ;;  %v3775_v13 = vadd.f32 %v6641_v1, %v3553_v46  ;;  %v3332_v1 = vadd.f32 %v6655_v40, %v6443_v42 }
 0x4e5   : > { %v4062_v27 = vadd.f32 %v4030_v44, %v7129_v30  ;;  %v3823_v30 = vld [vmem:[#allocation2 + $0x16a] sm:$0xff]  ;;  %v3500_v4 = vpop.f32.mrf.mxu3 }
 0x4e7   : > { %v4094_v11 = vmax.f32 %v4062_v27, 0.0  ;;  %v3824_v27 = vld [vmem:[#allocation2 + $0x172] sm:$0xff] }
 0x4e8   : > { %v3927_v38 = vpop.f32.mrf.mxu1  ;;  %v3842_v5 = vpack.c.bf16 %v3824_v27, %v3823_v30 }
 0x4e9   : > { %4126 = vst.msk [vmem:[%s6608_s23 + $0x38] sm:$0xff] %vm530_vm1, %v4094_v11  ;;  %v3995_v41 = vadd.f32 %v3927_v38, %v3773_v60  ;;  %v3554_v11 = vadd.f32 %v6649_v45, %v3331_v33  ;;  %v3722_v38 = vpop.f32.mrf.mxu0  ;;  %v3555_v45 = vadd.f32 %v3493_v26, %v3332_v1 }
 0x4eb   : > { %v4031_v24 = vadd.f32 %v6596_v32, %v3995_v41  ;;  %4514 = vmatmul.msk.bf16.gmra.mxu1 %vm530_vm1, %v3841_v59  ;;  %v7132_v41 = vld [vmem:[#allocation31_spill] sm:$0xff]  ;;  %v3280_v57 = vpop.f32.mrf.mxu2  ;;  %v3776_v21 = vadd.f32 %v6652_v55, %v3554_v11  ;;  %v3777_v42 = vadd.f32 %v6665_v63, %v3555_v45  ;;  %v3828_v11 = vld [vmem:[#allocation2 + $0x1a2] sm:$0xff]  ;;  %v7136_v45 = vld [vmem:[#allocation4_spill] sm:$0xff] }
 0x4ed   : > { %v4063_v6 = vadd.f32 %v4031_v24, %v7130_v51  ;;  %v3503_v49 = vpop.f32.mrf.mxu3 }
 0x4ef   : > { %v4095_v25 = vmax.f32 %v4063_v6, 0.0 }
 0x4f0   : > { %v3929_v12 = vpop.f32.mrf.mxu1 }
 0x4f1   : > { %4127 = vst.msk [vmem:[%s6608_s23 + $0x40] sm:$0xff] %vm530_vm1, %v4095_v25  ;;  %v3996_v53 = vadd.f32 %v3929_v12, %v3774_v52  ;;  %v7133_v25 = vld [vmem:[#allocation32_spill] sm:$0xff]  ;;  %v3333_v12 = vadd.f32 %v3272_v35, %v6454_v39  ;;  %v3334_v39 = vadd.f32 %v3275_v22, %v6462_v23 }
 0x4f3   : > { %v4032_v29 = vadd.f32 %v6596_v32, %v3996_v53  ;;  %v3725_v53 = vpop.f32.mrf.mxu0  ;;  %v3282_v40 = vpop.f32.mrf.mxu2 }
 0x4f5   : > { %v4064_v44 = vadd.f32 %v4032_v29, %v7131_v19  ;;  %v3556_v19 = vadd.f32 %v3495_v50, %v3333_v12  ;;  %v3505_v27 = vpop.f32.mrf.mxu3  ;;  %v3557_v50 = vadd.f32 %v3498_v9, %v3334_v39 }
 0x4f7   : > { %v4096_v18 = vmax.f32 %v4064_v44, 0.0  ;;  %v7134_v44 = vld [vmem:[#allocation38_spill] sm:$0xff]  ;;  %v3778_v33 = vadd.f32 %v3717_v10, %v3556_v19  ;;  %v3779_v23 = vadd.f32 %v3720_v61, %v3557_v50 }
 0x4f8   : > { %v3932_v37 = vpop.f32.mrf.mxu1 }
 0x4f9   : > { %4128 = vst.msk [vmem:[%s6608_s23 + $0x48] sm:$0xff] %vm530_vm1, %v4096_v18  ;;  %v3997_v31 = vadd.f32 %v3932_v37, %v3775_v13 }
 0x4fb   : > { %v4033_v60 = vadd.f32 %v6596_v32, %v3997_v31  ;;  %4515 = vmatmul.msk.bf16.gmra.mxu1 %vm530_vm1, %v3842_v5  ;;  %v3727_v63 = vpop.f32.mrf.mxu0  ;;  %v3285_v37 = vpop.f32.mrf.mxu2  ;;  %v3827_v5 = vld [vmem:[#allocation2 + $0x19a] sm:$0xff] }
 0x4fc   : > { %v3844_v10 = vpack.c.bf16 %v3828_v11, %v3827_v5 }
 0x4fd   : > { %v4065_v59 = vadd.f32 %v4033_v60, %v7132_v41  ;;  %v3335_v41 = vadd.f32 %v3277_v28, %v6475_v58  ;;  %v3508_v22 = vpop.f32.mrf.mxu3  ;;  %v3336_v58 = vadd.f32 %v3280_v57, %v6483_v0 }
 0x4ff   : > { %v4097_v54 = vmax.f32 %v4065_v59, 0.0 }
 0x500   : > { %v3934_v24 = vpop.f32.mrf.mxu1 }
 0x501   : > { %4129 = vst.msk [vmem:[%s6608_s23 + $0x50] sm:$0xff] %vm530_vm1, %v4097_v54  ;;  %v3998_v51 = vadd.f32 %v3934_v24, %v3776_v21  ;;  %v3558_v21 = vadd.f32 %v3500_v4, %v3335_v41 }
 0x503   : > { %v4034_v6 = vadd.f32 %v6596_v32, %v3998_v51  ;;  %v3730_v24 = vpop.f32.mrf.mxu0  ;;  %v3287_v51 = vpop.f32.mrf.mxu2  ;;  %v3780_v28 = vadd.f32 %v3722_v38, %v3558_v21 }
 0x504   : > { %v3339_v41 = vadd.f32 %v3287_v51, %v6511_v2 }
 0x505   : > { %v4066_v52 = vadd.f32 %v4034_v6, %v7133_v25  ;;  %v3510_v12 = vpop.f32.mrf.mxu3 }
 0x507   : > { %v4098_v46 = vmax.f32 %v4066_v52, 0.0 }
 0x508   : > { %v3937_v29 = vpop.f32.mrf.mxu1 }
 0x509   : > { %4130 = vst.msk [vmem:[%s6608_s23 + $0x58] sm:$0xff] %vm530_vm1, %v4098_v46  ;;  %v3999_v55 = vadd.f32 %v3937_v29, %v3777_v42  ;;  %v3559_v46 = vadd.f32 %v3503_v49, %v3336_v58  ;;  %v7137_v29 = vld [vmem:[#allocation5_spill] sm:$0xff] }
 0x50a   : > { %v7138_v49 = vld [vmem:[#allocation9_spill] sm:$0xff] }
 0x50b   : > { %v4035_v26 = vadd.f32 %v6596_v32, %v3999_v55  ;;  %4516 = vmatmul.msk.bf16.gmra.mxu1 %vm530_vm1, %v6577_v36  ;;  %v7135_v36 = vld [vmem:[#allocation39_spill] sm:$0xff]  ;;  %v3732_v42 = vpop.f32.mrf.mxu0  ;;  %v3290_v19 = vpop.f32.mrf.mxu2  ;;  %v3781_v0 = vadd.f32 %v3725_v53, %v3559_v46 }
 0x50d   : > { %v4067_v30 = vadd.f32 %v4035_v26, %v7134_v44  ;;  %v3337_v26 = vadd.f32 %v3282_v40, %v6493_v8 }
 0x50f   : > { %v4099_v35 = vmax.f32 %v4067_v30, 0.0  ;;  %v3560_v30 = vadd.f32 %v3505_v27, %v3337_v26  ;;  %v7139_v27 = vld [vmem:[#allocation10_spill] sm:$0xff] }
 0x510   : > { %v3939_v18 = vpop.f32.mrf.mxu1 }
 0x511   : > { %4131 = vst.msk [vmem:[%s6608_s23 + $0x60] sm:$0xff] %vm530_vm1, %v4099_v35  ;;  %v4000_v13 = vadd.f32 %v3939_v18, %v3778_v33  ;;  %v3513_v35 = vpop.f32.mrf.mxu3  ;;  %v3338_v18 = vadd.f32 %v3285_v37, %v6501_v56 }
 0x513   : > { %v4036_v31 = vadd.f32 %v6596_v32, %v4000_v13  ;;  %v3735_v13 = vpop.f32.mrf.mxu0  ;;  %v3292_v8 = vpop.f32.mrf.mxu2  ;;  %v3561_v5 = vadd.f32 %v3508_v22, %v3338_v18  ;;  %v7140_v22 = vld [vmem:[#allocation14_spill] sm:$0xff] }
 0x514   : > { %v3341_v46 = vadd.f32 %v3292_v8, %v6529_v7 }
 0x515   : > { %v4068_v60 = vadd.f32 %v4036_v31, %v7135_v36  ;;  %v3782_v31 = vadd.f32 %v3727_v63, %v3560_v30  ;;  %v3783_v56 = vadd.f32 %v3730_v24, %v3561_v5 }
 0x517   : > { %v4100_v59 = vmax.f32 %v4068_v60, 0.0 }
 0x518   : > { %v3942_v1 = vpop.f32.mrf.mxu1 }
 0x519   : > { %4132 = vst.msk [vmem:[%s6608_s23 + $0x68] sm:$0xff] %vm530_vm1, %v4100_v59  ;;  %v4001_v54 = vadd.f32 %v3942_v1, %v3779_v23  ;;  %v3515_v60 = vpop.f32.mrf.mxu3  ;;  %v3562_v1 = vadd.f32 %v3510_v12, %v3339_v41  ;;  %v7144_v41 = vld [vmem:[#allocation22_spill] sm:$0xff] }
 0x51b   : > { %v4037_v9 = vadd.f32 %v6596_v32, %v4001_v54  ;;  %4517 = vmatmul.msk.bf16.gmra.mxu1 %vm530_vm1, %v3844_v10  ;;  %v3737_v23 = vpop.f32.mrf.mxu0  ;;  %v3295_v10 = vpop.f32.mrf.mxu2 }
 0x51c   : > { %v3342_v30 = vadd.f32 %v3295_v10, %v6537_v14 }
 0x51d   : > { %v4069_v6 = vadd.f32 %v4037_v9, %v7136_v45  ;;  %v3340_v9 = vadd.f32 %v3290_v19, %v6519_v47  ;;  %v3564_v19 = vadd.f32 %v3515_v60, %v3341_v46 }
 0x51f   : > { %v4101_v61 = vmax.f32 %v4069_v6, 0.0  ;;  %v3784_v6 = vadd.f32 %v3732_v42, %v3562_v1  ;;  %v3563_v58 = vadd.f32 %v3513_v35, %v3340_v9  ;;  %v3786_v7 = vadd.f32 %v3737_v23, %v3564_v19  ;;  %v7145_v9 = vld [vmem:[#allocation23_spill] sm:$0xff] }
 0x520   : > { %v3944_v25 = vpop.f32.mrf.mxu1 }
 0x521   : > { %4133 = vst.msk [vmem:[%s6608_s23 + $0x70] sm:$0xff] %vm530_vm1, %v4101_v61  ;;  %v4002_v52 = vadd.f32 %v3944_v25, %v3780_v28  ;;  %v3518_v2 = vpop.f32.mrf.mxu3  ;;  %v3785_v47 = vadd.f32 %v3735_v13, %v3563_v58 }
 0x523   : > { %v4038_v4 = vadd.f32 %v6596_v32, %v4002_v52  ;;  %v3740_v61 = vpop.f32.mrf.mxu0  ;;  %v3297_v25 = vpop.f32.mrf.mxu2  ;;  %v7141_v52 = vld [vmem:[#allocation15_spill] sm:$0xff] }
 0x524   : > { %v3343_v8 = vadd.f32 %v3297_v25, %v6546_v48 }
 0x525   : > { %v4070_v55 = vadd.f32 %v4038_v4, %v7137_v29 }
 0x527   : > { %v4102_v44 = vmax.f32 %v4070_v55, 0.0 }
 0x528   : > { %v3947_v57 = vpop.f32.mrf.mxu1 }
 0x529   : > { %4134 = vst.msk [vmem:[%s6608_s23 + $0x78] sm:$0xff] %vm530_vm1, %v4102_v44  ;;  %v4003_v38 = vadd.f32 %v3947_v57, %v3781_v0  ;;  %v3520_v55 = vpop.f32.mrf.mxu3  ;;  %v7142_v0 = vld [vmem:[#allocation18_spill] sm:$0xff] }
 0x52b   : > { %v4039_v39 = vadd.f32 %v6596_v32, %v4003_v38  ;;  %v3742_v44 = vpop.f32.mrf.mxu0  ;;  %v3300_v38 = vpop.f32.mrf.mxu2 }
 0x52d   : > { %v4071_v33 = vadd.f32 %v4039_v39, %v7138_v49 }
 0x52f   : > { %v4103_v50 = vmax.f32 %v4071_v33, 0.0  ;;  %v3565_v33 = vadd.f32 %v3518_v2, %v3342_v30 }
 0x530   : > { %v3949_v40 = vpop.f32.mrf.mxu1 }
 0x531   : > { %4135 = vst.msk [vmem:[%s6608_s23 + $0x80] sm:$0xff] %vm530_vm1, %v4103_v50  ;;  %v4004_v53 = vadd.f32 %v3949_v40, %v3782_v31  ;;  %v3523_v13 = vpop.f32.mrf.mxu3  ;;  %v7143_v50 = vld [vmem:[#allocation19_spill] sm:$0xff]  ;;  %v3787_v5 = vadd.f32 %v3740_v61, %v3565_v33 }
 0x533   : > { %v4040_v11 = vadd.f32 %v6596_v32, %v4004_v53  ;;  %v3745_v40 = vpop.f32.mrf.mxu0  ;;  %v3302_v14 = vpop.f32.mrf.mxu2 }
 0x535   : > { %v4072_v36 = vadd.f32 %v4040_v11, %v7139_v27 }
 0x537   : > { %v4104_v59 = vmax.f32 %v4072_v36, 0.0  ;;  %v3566_v36 = vadd.f32 %v3520_v55, %v3343_v8 }
 0x538   : > { %v3952_v37 = vpop.f32.mrf.mxu1 }
 0x539   : > { %4136 = vst.msk [vmem:[%s6608_s23 + $0x88] sm:$0xff] %vm530_vm1, %v4104_v59  ;;  %v4005_v63 = vadd.f32 %v3952_v37, %v3783_v56  ;;  %v3525_v56 = vpop.f32.mrf.mxu3  ;;  %v3344_v37 = vadd.f32 %v3300_v38, %v6551_v15  ;;  %v3788_v48 = vadd.f32 %v3742_v44, %v3566_v36  ;;  %v7149_v36 = vld [vmem:[#allocation34_spill] sm:$0xff] }
 0x53b   : > { %v4041_v54 = vadd.f32 %v6596_v32, %v4005_v63  ;;  %v3747_v10 = vpop.f32.mrf.mxu0 }
 0x53d   : > { %v4073_v21 = vadd.f32 %v4041_v54, %v7140_v22  ;;  %v3305_v54 = vpop.f32.mrf.mxu2  ;;  %v3567_v22 = vadd.f32 %v3523_v13, %v3344_v37  ;;  %v7148_v13 = vld [vmem:[#allocation33_spill] sm:$0xff] }
 0x53f   : > { %v4105_v45 = vmax.f32 %v4073_v21, 0.0 }
 0x540   : > { %v3954_v51 = vpop.f32.mrf.mxu1 }
 0x541   : > { %4137 = vst.msk [vmem:[%s6608_s23 + $0x90] sm:$0xff] %vm530_vm1, %v4105_v45  ;;  %v4006_v24 = vadd.f32 %v3954_v51, %v3784_v6  ;;  %v3345_v6 = vadd.f32 %v3302_v14, %v6558_v17  ;;  %v3789_v51 = vadd.f32 %v3745_v40, %v3567_v22  ;;  %v3528_v15 = vpop.f32.mrf.mxu3 }
 0x543   : > { %v4042_v28 = vadd.f32 %v6596_v32, %v4006_v24  ;;  %v3568_v61 = vadd.f32 %v3525_v56, %v3345_v6 }
 0x545   : > { %v4074_v12 = vadd.f32 %v4042_v28, %v7141_v52  ;;  %v3750_v28 = vpop.f32.mrf.mxu0  ;;  %v3307_v52 = vpop.f32.mrf.mxu2  ;;  %v3790_v17 = vadd.f32 %v3747_v10, %v3568_v61  ;;  %v7151_v61 = vld [vmem:[#allocation41_spill] sm:$0xff] }
 0x546   : > { %v3347_v30 = vadd.f32 %v3307_v52, %v6571_v20 }
 0x547   : > { %v4106_v4 = vmax.f32 %v4074_v12, 0.0  ;;  %v7146_v12 = vld [vmem:[#allocation28_spill] sm:$0xff] }
 0x548   : > { %v3957_v29 = vpop.f32.mrf.mxu1 }
 0x549   : > { %4138 = vst.msk [vmem:[%s6608_s23 + $0x98] sm:$0xff] %vm530_vm1, %v4106_v4  ;;  %v4007_v42 = vadd.f32 %v3957_v29, %v3785_v47  ;;  %v3346_v4 = vadd.f32 %v3305_v54, %v6563_v34  ;;  %v3530_v55 = vpop.f32.mrf.mxu3  ;;  %v7150_v54 = vld [vmem:[#allocation40_spill] sm:$0xff] }
 0x54b   : > { %v4043_v26 = vadd.f32 %v6596_v32, %v4007_v42  ;;  %v3569_v19 = vadd.f32 %v3528_v15, %v3346_v4 }
 0x54d   : > { %v4075_v57 = vadd.f32 %v4043_v26, %v7142_v0  ;;  %v3752_v44 = vpop.f32.mrf.mxu0  ;;  %v7147_v0 = vld [vmem:[#allocation29_spill] sm:$0xff]  ;;  %v3310_v38 = vpop.f32.mrf.mxu2  ;;  %v3791_v34 = vadd.f32 %v3750_v28, %v3569_v19 }
 0x54e   : > { %v3348_v8 = vadd.f32 %v3310_v38, %v6575_v16 }
 0x54f   : > { %v4107_v39 = vmax.f32 %v4075_v57, 0.0 }
 0x550   : > { %v3959_v35 = vpop.f32.mrf.mxu1 }
 0x551   : > { %4139 = vst.msk [vmem:[%s6608_s23 + $0xa0] sm:$0xff] %vm530_vm1, %v4107_v39  ;;  %v4008_v49 = vadd.f32 %v3959_v35, %v3786_v7 }
 0x553   : > { %v4044_v18 = vadd.f32 %v6596_v32, %v4008_v49  ;;  %v3570_v49 = vadd.f32 %v3530_v55, %v3347_v30 }
 0x555   : > { %v4076_v31 = vadd.f32 %v4044_v18, %v7143_v50  ;;  %v3533_v18 = vpop.f32.mrf.mxu3  ;;  %v3312_v20 = vpop.f32.mrf.mxu2 }
 0x557   : > { %v4108_v53 = vmax.f32 %v4076_v31, 0.0  ;;  %v3755_v31 = vpop.f32.mrf.mxu0 }
 0x558   : > { %v3962_v11 = vpop.f32.mrf.mxu1 }
 0x559   : > { %4140 = vst.msk [vmem:[%s6608_s23 + $0xa8] sm:$0xff] %vm530_vm1, %v4108_v53  ;;  %v4009_v27 = vadd.f32 %v3962_v11, %v3787_v5  ;;  %v3792_v53 = vadd.f32 %v3752_v44, %v3570_v49  ;;  %v3571_v11 = vadd.f32 %v3533_v18, %v3348_v8 }
 0x55b   : > { %v4045_v60 = vadd.f32 %v6596_v32, %v4009_v27  ;;  %v3793_v37 = vadd.f32 %v3755_v31, %v3571_v11 }
 0x55d   : > { %v4077_v59 = vadd.f32 %v4045_v60, %v7144_v41  ;;  %v3535_v41 = vpop.f32.mrf.mxu3 }
 0x55f   : > { %v4109_v23 = vmax.f32 %v4077_v59, 0.0  ;;  %v3349_v59 = vadd.f32 %v3312_v20, %v6584_v43 }
 0x560   : > { %v3964_v63 = vpop.f32.mrf.mxu1 }
 0x561   : > { %4141 = vst.msk [vmem:[%s6608_s23 + $0xb0] sm:$0xff] %vm530_vm1, %v4109_v23  ;;  %v4010_v1 = vadd.f32 %v3964_v63, %v3788_v48  ;;  %v3757_v48 = vpop.f32.mrf.mxu0  ;;  %v3315_v63 = vpop.f32.mrf.mxu2  ;;  %v3572_v10 = vadd.f32 %v3535_v41, %v3349_v59 }
 0x563   : > { %v4046_v21 = vadd.f32 %v6596_v32, %v4010_v1  ;;  %v3794_v43 = vadd.f32 %v3757_v48, %v3572_v10 }
 0x565   : > { %v4078_v45 = vadd.f32 %v4046_v21, %v7145_v9  ;;  %v3538_v21 = vpop.f32.mrf.mxu3  ;;  %v3350_v9 = vadd.f32 %v3315_v63, %v6587_v3 }
 0x567   : > { %v4110_v2 = vmax.f32 %v4078_v45, 0.0  ;;  %v3573_v15 = vadd.f32 %v3538_v21, %v3350_v9 }
 0x568   : > { %v3967_v24 = vpop.f32.mrf.mxu1 }
 0x569   : > { %4142 = vst.msk [vmem:[%s6608_s23 + $0xb8] sm:$0xff] %vm530_vm1, %v4110_v2  ;;  %v4011_v58 = vadd.f32 %v3967_v24, %v3789_v51  ;;  %v3760_v51 = vpop.f32.mrf.mxu0 }
 0x56b   : > { %v4047_v25 = vadd.f32 %v6596_v32, %v4011_v58  ;;  %v3317_v58 = vpop.f32.mrf.mxu2 }
 0x56c   : > { %v3351_v52 = vadd.f32 %v3317_v58, %v6591_v62 }
 0x56d   : > { %v4079_v46 = vadd.f32 %v4047_v25, %v7146_v12  ;;  %v3795_v25 = vadd.f32 %v3760_v51, %v3573_v15  ;;  %v3540_v3 = vpop.f32.mrf.mxu3 }
 0x56f   : > { %v4111_v47 = vmax.f32 %v4079_v46, 0.0 }
 0x570   : > { %v3969_v29 = vpop.f32.mrf.mxu1 }
 0x571   : > { %4143 = vst.msk [vmem:[%s6608_s23 + $0xc0] sm:$0xff] %vm530_vm1, %v4111_v47  ;;  %v4012_v42 = vadd.f32 %v3969_v29, %v3790_v17  ;;  %v3574_v47 = vadd.f32 %v3540_v3, %v3351_v52  ;;  %v3762_v29 = vpop.f32.mrf.mxu0 }
 0x573   : > { %v4048_v26 = vadd.f32 %v6596_v32, %v4012_v42  ;;  %v7152_v42 = vld [vmem:[#allocation63_spill] sm:$0xff]  ;;  %v3796_v19 = vadd.f32 %v3762_v29, %v3574_v47 }
 0x575   : > { %v4080_v57 = vadd.f32 %v4048_v26, %v7147_v0 }
 0x577   : > { %v4112_v39 = vmax.f32 %v4080_v57, 0.0  ;;  %v7153_v57 = vld [vmem:[#allocation64_spill] sm:$0xff] }
 0x578   : > { %v3972_v7 = vpop.f32.mrf.mxu1 }
 0x579   : > { %4144 = vst.msk [vmem:[%s6608_s23 + $0xc8] sm:$0xff] %vm530_vm1, %v4112_v39  ;;  %v4013_v35 = vadd.f32 %v3972_v7, %v3791_v34 }
 0x57b   : > { %v4049_v33 = vadd.f32 %v6596_v32, %v4013_v35 }
 0x57d   : > { %v4081_v50 = vadd.f32 %v4049_v33, %v7148_v13 }
 0x57f   : > { %v4113_v40 = vmax.f32 %v4081_v50, 0.0 }
 0x580   : > { %v3974_v5 = vpop.f32.mrf.mxu1 }
 0x581   : > { %4145 = vst.msk [vmem:[%s6608_s23 + $0xd0] sm:$0xff] %vm530_vm1, %v4113_v40  ;;  %v4014_v14 = vadd.f32 %v3974_v5, %v3792_v53 }
 0x583   : > { %v4050_v27 = vadd.f32 %v6596_v32, %v4014_v14 }
 0x585   : > { %v4082_v60 = vadd.f32 %v4050_v27, %v7149_v36 }
 0x587   : > { %v4114_v56 = vmax.f32 %v4082_v60, 0.0 }
 0x588   : > { %v3977_v23 = vpop.f32.mrf.mxu1 }
 0x589   : > { %4146 = vst.msk [vmem:[%s6608_s23 + $0xd8] sm:$0xff] %vm530_vm1, %v4114_v56  ;;  %v4015_v16 = vadd.f32 %v3977_v23, %v3793_v37 }
 0x58b   : > { %v4051_v1 = vadd.f32 %v6596_v32, %v4015_v16 }
 0x58d   : > { %v4083_v22 = vadd.f32 %v4051_v1, %v7150_v54 }
 0x58f   : > { %v4115_v45 = vmax.f32 %v4083_v22, 0.0 }
 0x590   : > { %v3979_v6 = vpop.f32.mrf.mxu1 }
 0x591   : > { %4147 = vst.msk [vmem:[%s6608_s23 + $0xe0] sm:$0xff] %vm530_vm1, %v4115_v45  ;;  %v4016_v2 = vadd.f32 %v3979_v6, %v3794_v43 }
 0x593   : > { %v4052_v24 = vadd.f32 %v6596_v32, %v4016_v2 }
 0x595   : > { %v4084_v28 = vadd.f32 %v4052_v24, %v7151_v61 }
 0x597   : > { %v4116_v12 = vmax.f32 %v4084_v28, 0.0 }
 0x598   : > { %v3982_v46 = vpop.f32.mrf.mxu1 }
 0x599   : > { %4148 = vst.msk [vmem:[%s6608_s23 + $0xe8] sm:$0xff] %vm530_vm1, %v4116_v12  ;;  %v4017_v4 = vadd.f32 %v3982_v46, %v3795_v25 }
 0x59b   : > { %v4053_v17 = vadd.f32 %v6596_v32, %v4017_v4 }
 0x59d   : > { %v4085_v55 = vadd.f32 %v4053_v17, %v7152_v42 }
 0x59f   : > { %v4117_v26 = vmax.f32 %v4085_v55, 0.0 }
 0x5a0   : > { %v3984_v44 = vpop.f32.mrf.mxu1 }
 0x5a1   : > { %4149 = vst.msk [vmem:[%s6608_s23 + $0xf0] sm:$0xff] %vm530_vm1, %v4117_v26  ;;  %v4018_v0 = vadd.f32 %v3984_v44, %v3796_v19 }
 0x5a3   : > { %v4054_v62 = vadd.f32 %v6596_v32, %v4018_v0 }
 0x5a5   : > { %v4086_v38 = vadd.f32 %v4054_v62, %v7153_v57 }
 0x5a7   : > { %v4118_v30 = vmax.f32 %v4086_v38, 0.0 }
 0x5a9   : > { %4150 = vst.msk [vmem:[%s6608_s23 + $0xf8] sm:$0xff] %vm530_vm1, %v4118_v30 }
 0x5aa PF: > { %s15_s18 = sadd.s32 1, %s4593_s18  }
 0x5ab   : > { %p12_p4 = scmp.ge.s32.totalorder %s15_s18, 4  }
 0x5ad   :  { %14 = sbr.rel (!%p12_p4) target bundleno = 1 (0x1), region = 88 }

</bundles_post_ra>
